<compile_context>
chip_gen: v6e
topology: v6e:2x2x1
jax: 0.10.0
libtpu: 0.0.40
codegen_flags: <defaults>
</compile_context>

<pallas_src>
import jax
import jax.numpy as jnp
from jax.experimental import pallas as pl
from jax.experimental.pallas import tpu as pltpu

HEIGHT = 28
WIDTH = 28
N_CLASSES = 10
C_PAD = 128        # lane-dense padded conv output-channel count
HIDDEN_PAD = 512   # fc1 hidden dim padded 500 -> 512 (4 x 128 lanes)


def _vmem_limit_bytes():
    """Generation-aware scoped-VMEM budget (~3/4 of per-core physical)."""
    try:
        phys = pltpu.get_tpu_info().vmem_capacity_bytes
        if phys and phys >= (32 << 20):
            return int(min(phys * 3 // 4, 96 << 20))
    except Exception:
        pass
    return 32 << 20


_VMEM_LIMIT = _vmem_limit_bytes()


def _row_tile(m, tile_m, min_steps=2):
    """Row tile <= tile_m giving >= min_steps grid steps when m allows.

    Rounded up to a multiple of 16 sublanes (bf16-friendly); falls back to the
    full extent when m itself is small (block == full dim is always legal)."""
    tm = min(tile_m, pl.cdiv(m, min_steps))
    tm = ((tm + 15) // 16) * 16
    return min(tm, m)


# ----------------------------- Pallas kernels ------------------------------ #

def _conv_relu_pool_kernel(p00_ref, p01_ref, p10_ref, p11_ref, w_ref, b_ref, o_ref):
    """Fused conv (im2col matmul, bf16 in / f32 acc) + bias + ReLU + 2x2/2 max-pool.

    Each p??_ref holds the im2col patches of one pooling-window corner.
    pooled = relu(max_corners(patches @ W) + b) == max_corners(relu(patches @ W + b))
    because ReLU is monotone and the bias is corner-independent.
    """
    w = w_ref[...]
    y = jnp.dot(p00_ref[...], w, preferred_element_type=jnp.float32)
    y = jnp.maximum(y, jnp.dot(p01_ref[...], w, preferred_element_type=jnp.float32))
    y = jnp.maximum(y, jnp.dot(p10_ref[...], w, preferred_element_type=jnp.float32))
    y = jnp.maximum(y, jnp.dot(p11_ref[...], w, preferred_element_type=jnp.float32))
    o_ref[...] = jnp.maximum(y + b_ref[...], 0.0).astype(o_ref.dtype)


def _fc_head_kernel(x_ref, w1_ref, b1_ref, w2_ref, b2_ref, o_ref):
    """Fused fc1 + ReLU + fc2 + log_softmax (bf16 matmul operands, f32 accum)."""
    h = jnp.dot(x_ref[...], w1_ref[...], preferred_element_type=jnp.float32)
    h = jnp.maximum(h + b1_ref[...], 0.0).astype(jnp.bfloat16)
    y = jnp.dot(h, w2_ref[...], preferred_element_type=jnp.float32) + b2_ref[...]
    m = jnp.max(y, axis=-1, keepdims=True)
    z = y - m
    lse = jnp.log(jnp.sum(jnp.exp(z), axis=-1, keepdims=True))
    o_ref[...] = (z - lse).astype(o_ref.dtype)


# ------------------------------ Pallas wrappers ----------------------------- #

def pallas_conv_relu_pool(patches, w, b, *, tile_m):
    """patches: 4 corner patch matrices (M, K) bf16; w: (K, C_PAD) bf16; b: (1, C_PAD) f32."""
    m, k = patches[0].shape
    n = w.shape[1]
    tm = _row_tile(m, tile_m)
    patch_spec = pl.BlockSpec((tm, k), lambda i: (i, 0))
    return pl.pallas_call(
        _conv_relu_pool_kernel,
        out_shape=jax.ShapeDtypeStruct((m, n), jnp.bfloat16),
        grid=(pl.cdiv(m, tm),),
        in_specs=[patch_spec] * 4 + [
            pl.BlockSpec((k, n), lambda i: (0, 0)),   # weight: grid-invariant
            pl.BlockSpec((1, n), lambda i: (0, 0)),   # bias:   grid-invariant
        ],
        out_specs=pl.BlockSpec((tm, n), lambda i: (i, 0)),
        compiler_params=pltpu.CompilerParams(
            dimension_semantics=("parallel",),
            vmem_limit_bytes=_VMEM_LIMIT),
    )(*patches, w, b)


def pallas_fc_head(x, w1, b1, w2, b2, *, tile_m):
    """log_softmax(relu(x @ w1 + b1) @ w2 + b2) in one kernel, tiled over rows."""
    m, kin = x.shape
    hid = w1.shape[1]
    n = w2.shape[1]
    tm = _row_tile(m, tile_m)
    return pl.pallas_call(
        _fc_head_kernel,
        out_shape=jax.ShapeDtypeStruct((m, n), jnp.float32),
        grid=(pl.cdiv(m, tm),),
        in_specs=[
            pl.BlockSpec((tm, kin), lambda i: (i, 0)),
            pl.BlockSpec((kin, hid), lambda i: (0, 0)),
            pl.BlockSpec((1, hid), lambda i: (0, 0)),
            pl.BlockSpec((hid, n), lambda i: (0, 0)),
            pl.BlockSpec((1, n), lambda i: (0, 0)),
        ],
        out_specs=pl.BlockSpec((tm, n), lambda i: (i, 0)),
        compiler_params=pltpu.CompilerParams(
            dimension_semantics=("parallel",),
            vmem_limit_bytes=_VMEM_LIMIT),
    )(x, w1, b1, w2, b2)


# ------------------------------- layout glue -------------------------------- #

def _pool_corner_patches(x, kh, kw):
    """x: NHWC (B,H,W,C).  For a valid kh x kw conv followed by a 2x2/2 max-pool,
    return 4 im2col patch matrices (one per pool-window corner (dy,dx)), each of
    shape (B*Hp*Wp, kh*kw*C) with the K axis ordered (kh, kw, c)."""
    B, H, W, C = x.shape
    Ho, Wo = H - kh + 1, W - kw + 1
    Hp, Wp = Ho // 2, Wo // 2
    cols = [x[:, i:i + Ho, j:j + Wo, :] for i in range(kh) for j in range(kw)]
    p = jnp.stack(cols, axis=3).reshape(B, Ho, Wo, kh * kw * C)
    return [p[:, dy::2, dx::2, :].reshape(B * Hp * Wp, kh * kw * C)
            for dy in (0, 1) for dx in (0, 1)]


def _conv_weight_matrix(w_oihw, n_pad):
    """PyTorch (OC, IC, KH, KW) -> (KH*KW*IC, n_pad), zero-padded output channels."""
    oc, ic, kh, kw = w_oihw.shape
    m = jnp.transpose(w_oihw, (2, 3, 1, 0)).reshape(kh * kw * ic, oc)
    return jnp.pad(m, ((0, 0), (0, n_pad - oc)))


# --------------------------------- params ----------------------------------- #

def init_params(key):
    k = jax.random.split(key, 8)
    return {
        "conv1_w": 0.1 * jax.random.normal(k[0], (20, 1, 5, 5), jnp.float32),
        "conv1_b": 0.1 * jax.random.normal(k[1], (20,), jnp.float32),
        "conv2_w": 0.05 * jax.random.normal(k[2], (50, 20, 5, 5), jnp.float32),
        "conv2_b": 0.05 * jax.random.normal(k[3], (50,), jnp.float32),
        "fc1_w": 0.02 * jax.random.normal(k[4], (500, 4 * 4 * 50), jnp.float32),
        "fc1_b": 0.02 * jax.random.normal(k[5], (500,), jnp.float32),
        "fc2_w": 0.05 * jax.random.normal(k[6], (N_CLASSES, 500), jnp.float32),
        "fc2_b": 0.05 * jax.random.normal(k[7], (N_CLASSES,), jnp.float32),
    }


def prepare_params(p):
    """One-time weight relayout: pad conv N to 128 lanes, fold the PyTorch NCHW
    flatten + channel padding into fc1's weight, pad fc1 hidden 500->512,
    pre-transpose fc weights, and store all matmul weights in bf16."""
    w1m = _conv_weight_matrix(p["conv1_w"], C_PAD).astype(jnp.bfloat16)
    b1m = jnp.pad(p["conv1_b"], (0, C_PAD - 20)).reshape(1, C_PAD)          # f32
    w2m = _conv_weight_matrix(p["conv2_w"], C_PAD).astype(jnp.bfloat16)
    b2m = jnp.pad(p["conv2_b"], (0, C_PAD - 50)).reshape(1, C_PAD)          # f32
    # fc1: PyTorch weight (500, 800) over NCHW-flattened (c, p, q) with c < 50.
    # Our activations arrive NHWC-flattened with padded channels: (p, q, c_pad).
    fw = p["fc1_w"].reshape(500, 50, 4, 4)               # (out, c, p, q)
    fw = jnp.transpose(fw, (2, 3, 1, 0))                 # (p, q, c, out)
    fw = jnp.pad(fw, ((0, 0), (0, 0), (0, C_PAD - 50), (0, 0)))
    fc1m = fw.reshape(4 * 4 * C_PAD, 500)                # (2048, 500)
    fc1m = jnp.pad(fc1m, ((0, 0), (0, HIDDEN_PAD - 500))).astype(jnp.bfloat16)
    fc1b = jnp.pad(p["fc1_b"], (0, HIDDEN_PAD - 500)).reshape(1, HIDDEN_PAD)  # f32
    fc2m = jnp.pad(jnp.transpose(p["fc2_w"]),
                   ((0, HIDDEN_PAD - 500), (0, 0))).astype(jnp.bfloat16)      # (512, 10)
    return {
        "w1m": w1m, "b1m": b1m, "w2m": w2m, "b2m": b2m,
        "fc1m": fc1m, "fc1b": fc1b,
        "fc2m": fc2m, "fc2b": p["fc2_b"].reshape(1, N_CLASSES),
    }


# --------------------------------- network ---------------------------------- #

@jax.jit
def net_forward(x, params):
    x = x.reshape(-1, 1, HEIGHT, WIDTH)                 # PyTorch x.view(-1, 1, 28, 28)
    B = x.shape[0]
    x = jnp.transpose(x, (0, 2, 3, 1)).astype(jnp.bfloat16)   # NHWC bf16 (B, 28, 28, 1)

    # conv1 5x5 (1->20, padded to 128 lanes) + ReLU + 2x2 max-pool, fused
    h = pallas_conv_relu_pool(_pool_corner_patches(x, 5, 5),
                              params["w1m"], params["b1m"], tile_m=2048)   # (B*144, 128) bf16
    h = h.reshape(B, 12, 12, C_PAD)[..., :20]           # drop zero pad lanes for conv2

    # conv2 5x5 (20->50, padded to 128 lanes) + ReLU + 2x2 max-pool, fused
    h = pallas_conv_relu_pool(_pool_corner_patches(h, 5, 5),
                              params["w2m"], params["b2m"], tile_m=1024)   # (B*16, 128) bf16
    flat = h.reshape(B, 4 * 4 * C_PAD)                  # (p, q, c_pad) order == fc1m rows

    # fc1 + ReLU + fc2 + log_softmax, fused in one kernel
    return pallas_fc_head(flat, params["fc1m"], params["fc1b"],
                          params["fc2m"], params["fc2b"], tile_m=1024)     # (B, 10) f32


# ------------------------------ pure-JAX reference --------------------------- #

def reference_forward(x, p):
    """Plain-JAX replica of the PyTorch forward (f32), for correctness checking."""
    x = x.reshape(-1, 1, HEIGHT, WIDTH).astype(jnp.float32)
    x = jnp.transpose(x, (0, 2, 3, 1))                  # NHWC

    def conv(v, w_oihw, b):
        w = jnp.transpose(w_oihw, (2, 3, 1, 0))         # HWIO
        y = jax.lax.conv_general_dilated(
            v, w, window_strides=(1, 1), padding="VALID",
            dimension_numbers=("NHWC", "HWIO", "NHWC"))
        return y + b.reshape(1, 1, 1, -1)

    def pool(v):
        return jax.lax.reduce_window(v, -jnp.inf, jax.lax.max,
                                     (1, 2, 2, 1), (1, 2, 2, 1), "VALID")

    h = pool(jax.nn.relu(conv(x, p["conv1_w"], p["conv1_b"])))
    h = pool(jax.nn.relu(conv(h, p["conv2_w"], p["conv2_b"])))
    h = jnp.transpose(h, (0, 3, 1, 2)).reshape(h.shape[0], -1)   # PyTorch NCHW flatten
    h = jax.nn.relu(h @ p["fc1_w"].T + p["fc1_b"])
    y = h @ p["fc2_w"].T + p["fc2_b"]
    return jax.nn.log_softmax(y, axis=-1)


if __name__ == "__main__":
    key = jax.random.PRNGKey(0)
    k_x, k_p = jax.random.split(key)
    x = jax.random.normal(k_x, (2, 1, HEIGHT, WIDTH), jnp.float32)
    raw = init_params(k_p)
    params = prepare_params(raw)

    out = jax.block_until_ready(net_forward(x, params))

    assert out.shape == (2, N_CLASSES)
    # log_softmax rows must exp-sum to 1
    assert bool(jnp.allclose(jnp.sum(jnp.exp(out), axis=1), 1.0, atol=1e-4))
    # bf16-pipeline output must track the f32 reference
    ref = reference_forward(x, raw)
    assert bool(jnp.allclose(out, ref, atol=1e-1))
    print("KERNEL_OK")
</pallas_src>

<mosaic_0001>
module attributes {stable_mosaic.version = 11 : i64} {
  func.func @_conv_relu_pool_kernel(%arg0: i32, %arg1: memref<144x25xbf16, #tpu.memory_space<vmem>>, %arg2: memref<144x25xbf16, #tpu.memory_space<vmem>>, %arg3: memref<144x25xbf16, #tpu.memory_space<vmem>>, %arg4: memref<144x25xbf16, #tpu.memory_space<vmem>>, %arg5: memref<25x128xbf16, #tpu.memory_space<vmem>>, %arg6: memref<1x128xf32, #tpu.memory_space<vmem>>, %arg7: memref<144x128xbf16, #tpu.memory_space<vmem>>) attributes {dimension_semantics = [#tpu.dimension_semantics<parallel>], iteration_bounds = array<i64: 2>, scalar_prefetch = 0 : i64, scratch_operands = 0 : i64, tpu.core_type = #tpu.core_type<tc>, window_params = [{transform_indices = @transform_0, window_bounds = array<i64: 144, 25>}, {transform_indices = @transform_1, window_bounds = array<i64: 144, 25>}, {transform_indices = @transform_2, window_bounds = array<i64: 144, 25>}, {transform_indices = @transform_3, window_bounds = array<i64: 144, 25>}, {pipeline_mode = #tpu.pipeline_mode<synchronous>, transform_indices = @transform_4, window_bounds = array<i64: 25, 128>}, {pipeline_mode = #tpu.pipeline_mode<synchronous>, transform_indices = @transform_5, window_bounds = array<i64: 1, 128>}, {transform_indices = @transform_6, window_bounds = array<i64: 144, 128>}]} {
    %c0 = arith.constant 0 : index
    %c0_0 = arith.constant 0 : index
    %0 = vector.load %arg5[%c0, %c0_0] : memref<25x128xbf16, #tpu.memory_space<vmem>>, vector<25x128xbf16>
    %c0_1 = arith.constant 0 : index
    %c0_2 = arith.constant 0 : index
    %1 = vector.load %arg1[%c0_1, %c0_2] : memref<144x25xbf16, #tpu.memory_space<vmem>>, vector<144x25xbf16>
    %cst = arith.constant dense<0.000000e+00> : vector<144x128xf32>
    %2 = tpu.matmul %1, %0, %cst {dimension_numbers = #tpu.dot_dimension_numbers<[1], [0], [0], [1], [0, 0, 1, 1], [], []>} : vector<144x25xbf16>, vector<25x128xbf16>, vector<144x128xf32> -> vector<144x128xf32>
    %c0_3 = arith.constant 0 : index
    %c0_4 = arith.constant 0 : index
    %3 = vector.load %arg2[%c0_3, %c0_4] : memref<144x25xbf16, #tpu.memory_space<vmem>>, vector<144x25xbf16>
    %cst_5 = arith.constant dense<0.000000e+00> : vector<144x128xf32>
    %4 = tpu.matmul %3, %0, %cst_5 {dimension_numbers = #tpu.dot_dimension_numbers<[1], [0], [0], [1], [0, 0, 1, 1], [], []>} : vector<144x25xbf16>, vector<25x128xbf16>, vector<144x128xf32> -> vector<144x128xf32>
    %5 = arith.maximumf %2, %4 : vector<144x128xf32>
    %c0_6 = arith.constant 0 : index
    %c0_7 = arith.constant 0 : index
    %6 = vector.load %arg3[%c0_6, %c0_7] : memref<144x25xbf16, #tpu.memory_space<vmem>>, vector<144x25xbf16>
    %cst_8 = arith.constant dense<0.000000e+00> : vector<144x128xf32>
    %7 = tpu.matmul %6, %0, %cst_8 {dimension_numbers = #tpu.dot_dimension_numbers<[1], [0], [0], [1], [0, 0, 1, 1], [], []>} : vector<144x25xbf16>, vector<25x128xbf16>, vector<144x128xf32> -> vector<144x128xf32>
    %8 = arith.maximumf %5, %7 : vector<144x128xf32>
    %c0_9 = arith.constant 0 : index
    %c0_10 = arith.constant 0 : index
    %9 = vector.load %arg4[%c0_9, %c0_10] : memref<144x25xbf16, #tpu.memory_space<vmem>>, vector<144x25xbf16>
    %cst_11 = arith.constant dense<0.000000e+00> : vector<144x128xf32>
    %10 = tpu.matmul %9, %0, %cst_11 {dimension_numbers = #tpu.dot_dimension_numbers<[1], [0], [0], [1], [0, 0, 1, 1], [], []>} : vector<144x25xbf16>, vector<25x128xbf16>, vector<144x128xf32> -> vector<144x128xf32>
    %11 = arith.maximumf %8, %10 : vector<144x128xf32>
    %c0_12 = arith.constant 0 : index
    %c0_13 = arith.constant 0 : index
    %12 = vector.load %arg6[%c0_12, %c0_13] : memref<1x128xf32, #tpu.memory_space<vmem>>, vector<1x128xf32>
    %13 = vector.broadcast %12 : vector<1x128xf32> to vector<144x128xf32>
    %14 = arith.addf %11, %13 : vector<144x128xf32>
    %cst_14 = arith.constant 0.000000e+00 : f32
    %15 = vector.broadcast %cst_14 : f32 to vector<144x128xf32>
    %16 = arith.maximumf %14, %15 : vector<144x128xf32>
    %17 = arith.truncf %16 : vector<144x128xf32> to vector<144x128xbf16>
    %c0_15 = arith.constant 0 : index
    %c0_16 = arith.constant 0 : index
    %18 = vector.load %arg7[%c0_15, %c0_16] : memref<144x128xbf16, #tpu.memory_space<vmem>>, vector<144x128xbf16>
    tpu.vector_store %arg7[%c0_15, %c0_16], %17 {strides = array<i32>} : memref<144x128xbf16, #tpu.memory_space<vmem>>, vector<144x128xbf16>,
    return
  }
  func.func @transform_0(%arg0: i32) -> (i32, i32) {
    %c0_i32 = arith.constant 0 : i32
    %c0_i32_0 = arith.constant 0 : i32
    return %arg0, %c0_i32 : i32, i32
  }
  func.func @transform_1(%arg0: i32) -> (i32, i32) {
    %c0_i32 = arith.constant 0 : i32
    %c0_i32_0 = arith.constant 0 : i32
    return %arg0, %c0_i32 : i32, i32
  }
  func.func @transform_2(%arg0: i32) -> (i32, i32) {
    %c0_i32 = arith.constant 0 : i32
    %c0_i32_0 = arith.constant 0 : i32
    return %arg0, %c0_i32 : i32, i32
  }
  func.func @transform_3(%arg0: i32) -> (i32, i32) {
    %c0_i32 = arith.constant 0 : i32
    %c0_i32_0 = arith.constant 0 : i32
    return %arg0, %c0_i32 : i32, i32
  }
  func.func @transform_4(%arg0: i32) -> (i32, i32) {
    %c0_i32 = arith.constant 0 : i32
    %c0_i32_0 = arith.constant 0 : i32
    %c0_i32_1 = arith.constant 0 : i32
    return %c0_i32, %c0_i32_0 : i32, i32
  }
  func.func @transform_5(%arg0: i32) -> (i32, i32) {
    %c0_i32 = arith.constant 0 : i32
    %c0_i32_0 = arith.constant 0 : i32
    %c0_i32_1 = arith.constant 0 : i32
    return %c0_i32, %c0_i32_0 : i32, i32
  }
  func.func @transform_6(%arg0: i32) -> (i32, i32) {
    %c0_i32 = arith.constant 0 : i32
    %c0_i32_0 = arith.constant 0 : i32
    return %arg0, %c0_i32 : i32, i32
  }
}

module attributes {stable_mosaic.version = 11 : i64} {
  func.func @_conv_relu_pool_kernel(%arg0: i32, %arg1: memref<16x500xbf16, #tpu.memory_space<vmem>>, %arg2: memref<16x500xbf16, #tpu.memory_space<vmem>>, %arg3: memref<16x500xbf16, #tpu.memory_space<vmem>>, %arg4: memref<16x500xbf16, #tpu.memory_space<vmem>>, %arg5: memref<500x128xbf16, #tpu.memory_space<vmem>>, %arg6: memref<1x128xf32, #tpu.memory_space<vmem>>, %arg7: memref<16x128xbf16, #tpu.memory_space<vmem>>) attributes {dimension_semantics = [#tpu.dimension_semantics<parallel>], iteration_bounds = array<i64: 2>, scalar_prefetch = 0 : i64, scratch_operands = 0 : i64, tpu.core_type = #tpu.core_type<tc>, window_params = [{transform_indices = @transform_0, window_bounds = array<i64: 16, 500>}, {transform_indices = @transform_1, window_bounds = array<i64: 16, 500>}, {transform_indices = @transform_2, window_bounds = array<i64: 16, 500>}, {transform_indices = @transform_3, window_bounds = array<i64: 16, 500>}, {pipeline_mode = #tpu.pipeline_mode<synchronous>, transform_indices = @transform_4, window_bounds = array<i64: 500, 128>}, {pipeline_mode = #tpu.pipeline_mode<synchronous>, transform_indices = @transform_5, window_bounds = array<i64: 1, 128>}, {transform_indices = @transform_6, window_bounds = array<i64: 16, 128>}]} {
    %c0 = arith.constant 0 : index
    %c0_0 = arith.constant 0 : index
    %0 = vector.load %arg5[%c0, %c0_0] : memref<500x128xbf16, #tpu.memory_space<vmem>>, vector<500x128xbf16>
    %c0_1 = arith.constant 0 : index
    %c0_2 = arith.constant 0 : index
    %1 = vector.load %arg1[%c0_1, %c0_2] : memref<16x500xbf16, #tpu.memory_space<vmem>>, vector<16x500xbf16>
    %cst = arith.constant dense<0.000000e+00> : vector<16x128xf32>
    %2 = tpu.matmul %1, %0, %cst {dimension_numbers = #tpu.dot_dimension_numbers<[1], [0], [0], [1], [0, 0, 1, 1], [], []>} : vector<16x500xbf16>, vector<500x128xbf16>, vector<16x128xf32> -> vector<16x128xf32>
    %c0_3 = arith.constant 0 : index
    %c0_4 = arith.constant 0 : index
    %3 = vector.load %arg2[%c0_3, %c0_4] : memref<16x500xbf16, #tpu.memory_space<vmem>>, vector<16x500xbf16>
    %cst_5 = arith.constant dense<0.000000e+00> : vector<16x128xf32>
    %4 = tpu.matmul %3, %0, %cst_5 {dimension_numbers = #tpu.dot_dimension_numbers<[1], [0], [0], [1], [0, 0, 1, 1], [], []>} : vector<16x500xbf16>, vector<500x128xbf16>, vector<16x128xf32> -> vector<16x128xf32>
    %5 = arith.maximumf %2, %4 : vector<16x128xf32>
    %c0_6 = arith.constant 0 : index
    %c0_7 = arith.constant 0 : index
    %6 = vector.load %arg3[%c0_6, %c0_7] : memref<16x500xbf16, #tpu.memory_space<vmem>>, vector<16x500xbf16>
    %cst_8 = arith.constant dense<0.000000e+00> : vector<16x128xf32>
    %7 = tpu.matmul %6, %0, %cst_8 {dimension_numbers = #tpu.dot_dimension_numbers<[1], [0], [0], [1], [0, 0, 1, 1], [], []>} : vector<16x500xbf16>, vector<500x128xbf16>, vector<16x128xf32> -> vector<16x128xf32>
    %8 = arith.maximumf %5, %7 : vector<16x128xf32>
    %c0_9 = arith.constant 0 : index
    %c0_10 = arith.constant 0 : index
    %9 = vector.load %arg4[%c0_9, %c0_10] : memref<16x500xbf16, #tpu.memory_space<vmem>>, vector<16x500xbf16>
    %cst_11 = arith.constant dense<0.000000e+00> : vector<16x128xf32>
    %10 = tpu.matmul %9, %0, %cst_11 {dimension_numbers = #tpu.dot_dimension_numbers<[1], [0], [0], [1], [0, 0, 1, 1], [], []>} : vector<16x500xbf16>, vector<500x128xbf16>, vector<16x128xf32> -> vector<16x128xf32>
    %11 = arith.maximumf %8, %10 : vector<16x128xf32>
    %c0_12 = arith.constant 0 : index
    %c0_13 = arith.constant 0 : index
    %12 = vector.load %arg6[%c0_12, %c0_13] : memref<1x128xf32, #tpu.memory_space<vmem>>, vector<1x128xf32>
    %13 = vector.broadcast %12 : vector<1x128xf32> to vector<16x128xf32>
    %14 = arith.addf %11, %13 : vector<16x128xf32>
    %cst_14 = arith.constant 0.000000e+00 : f32
    %15 = vector.broadcast %cst_14 : f32 to vector<16x128xf32>
    %16 = arith.maximumf %14, %15 : vector<16x128xf32>
    %17 = arith.truncf %16 : vector<16x128xf32> to vector<16x128xbf16>
    %c0_15 = arith.constant 0 : index
    %c0_16 = arith.constant 0 : index
    %18 = vector.load %arg7[%c0_15, %c0_16] : memref<16x128xbf16, #tpu.memory_space<vmem>>, vector<16x128xbf16>
    tpu.vector_store %arg7[%c0_15, %c0_16], %17 {strides = array<i32>} : memref<16x128xbf16, #tpu.memory_space<vmem>>, vector<16x128xbf16>,
    return
  }
  func.func @transform_0(%arg0: i32) -> (i32, i32) {
    %c0_i32 = arith.constant 0 : i32
    %c0_i32_0 = arith.constant 0 : i32
    return %arg0, %c0_i32 : i32, i32
  }
  func.func @transform_1(%arg0: i32) -> (i32, i32) {
    %c0_i32 = arith.constant 0 : i32
    %c0_i32_0 = arith.constant 0 : i32
    return %arg0, %c0_i32 : i32, i32
  }
  func.func @transform_2(%arg0: i32) -> (i32, i32) {
    %c0_i32 = arith.constant 0 : i32
    %c0_i32_0 = arith.constant 0 : i32
    return %arg0, %c0_i32 : i32, i32
  }
  func.func @transform_3(%arg0: i32) -> (i32, i32) {
    %c0_i32 = arith.constant 0 : i32
    %c0_i32_0 = arith.constant 0 : i32
    return %arg0, %c0_i32 : i32, i32
  }
  func.func @transform_4(%arg0: i32) -> (i32, i32) {
    %c0_i32 = arith.constant 0 : i32
    %c0_i32_0 = arith.constant 0 : i32
    %c0_i32_1 = arith.constant 0 : i32
    return %c0_i32, %c0_i32_0 : i32, i32
  }
  func.func @transform_5(%arg0: i32) -> (i32, i32) {
    %c0_i32 = arith.constant 0 : i32
    %c0_i32_0 = arith.constant 0 : i32
    %c0_i32_1 = arith.constant 0 : i32
    return %c0_i32, %c0_i32_0 : i32, i32
  }
  func.func @transform_6(%arg0: i32) -> (i32, i32) {
    %c0_i32 = arith.constant 0 : i32
    %c0_i32_0 = arith.constant 0 : i32
    return %arg0, %c0_i32 : i32, i32
  }
}

module attributes {stable_mosaic.version = 11 : i64} {
  func.func @_fc_head_kernel(%arg0: i32, %arg1: memref<2x2048xbf16, #tpu.memory_space<vmem>>, %arg2: memref<2048x512xbf16, #tpu.memory_space<vmem>>, %arg3: memref<1x512xf32, #tpu.memory_space<vmem>>, %arg4: memref<512x10xbf16, #tpu.memory_space<vmem>>, %arg5: memref<1x10xf32, #tpu.memory_space<vmem>>, %arg6: memref<2x10xf32, #tpu.memory_space<vmem>>) attributes {dimension_semantics = [#tpu.dimension_semantics<parallel>], iteration_bounds = array<i64: 1>, scalar_prefetch = 0 : i64, scratch_operands = 0 : i64, tpu.core_type = #tpu.core_type<tc>, window_params = [{transform_indices = @transform_0, window_bounds = array<i64: 2, 2048>}, {pipeline_mode = #tpu.pipeline_mode<synchronous>, transform_indices = @transform_1, window_bounds = array<i64: 2048, 512>}, {pipeline_mode = #tpu.pipeline_mode<synchronous>, transform_indices = @transform_2, window_bounds = array<i64: 1, 512>}, {pipeline_mode = #tpu.pipeline_mode<synchronous>, transform_indices = @transform_3, window_bounds = array<i64: 512, 10>}, {pipeline_mode = #tpu.pipeline_mode<synchronous>, transform_indices = @transform_4, window_bounds = array<i64: 1, 10>}, {transform_indices = @transform_5, window_bounds = array<i64: 2, 10>}]} {
    %c0 = arith.constant 0 : index
    %c0_0 = arith.constant 0 : index
    %0 = vector.load %arg1[%c0, %c0_0] : memref<2x2048xbf16, #tpu.memory_space<vmem>>, vector<2x2048xbf16>
    %c0_1 = arith.constant 0 : index
    %c0_2 = arith.constant 0 : index
    %1 = vector.load %arg2[%c0_1, %c0_2] : memref<2048x512xbf16, #tpu.memory_space<vmem>>, vector<2048x512xbf16>
    %cst = arith.constant dense<0.000000e+00> : vector<2x512xf32>
    %2 = tpu.matmul %0, %1, %cst {dimension_numbers = #tpu.dot_dimension_numbers<[1], [0], [0], [1], [0, 0, 1, 1], [], []>} : vector<2x2048xbf16>, vector<2048x512xbf16>, vector<2x512xf32> -> vector<2x512xf32>
    %c0_3 = arith.constant 0 : index
    %c0_4 = arith.constant 0 : index
    %3 = vector.load %arg3[%c0_3, %c0_4] : memref<1x512xf32, #tpu.memory_space<vmem>>, vector<1x512xf32>
    %4 = vector.broadcast %3 : vector<1x512xf32> to vector<2x512xf32>
    %5 = arith.addf %2, %4 : vector<2x512xf32>
    %cst_5 = arith.constant 0.000000e+00 : f32
    %6 = vector.broadcast %cst_5 : f32 to vector<2x512xf32>
    %7 = arith.maximumf %5, %6 : vector<2x512xf32>
    %8 = arith.truncf %7 : vector<2x512xf32> to vector<2x512xbf16>
    %c0_6 = arith.constant 0 : index
    %c0_7 = arith.constant 0 : index
    %9 = vector.load %arg4[%c0_6, %c0_7] : memref<512x10xbf16, #tpu.memory_space<vmem>>, vector<512x10xbf16>
    %cst_8 = arith.constant dense<0.000000e+00> : vector<2x10xf32>
    %10 = tpu.matmul %8, %9, %cst_8 {dimension_numbers = #tpu.dot_dimension_numbers<[1], [0], [0], [1], [0, 0, 1, 1], [], []>} : vector<2x512xbf16>, vector<512x10xbf16>, vector<2x10xf32> -> vector<2x10xf32>
    %c0_9 = arith.constant 0 : index
    %c0_10 = arith.constant 0 : index
    %11 = vector.load %arg5[%c0_9, %c0_10] : memref<1x10xf32, #tpu.memory_space<vmem>>, vector<1x10xf32>
    %12 = vector.broadcast %11 : vector<1x10xf32> to vector<2x10xf32>
    %13 = arith.addf %10, %12 : vector<2x10xf32>
    %cst_11 = arith.constant dense<0xFF800000> : vector<2xf32>
    %14 = vector.multi_reduction <maximumf>, %13, %cst_11 [1] : vector<2x10xf32> to vector<2xf32>
    %15 = vector.shape_cast %14 : vector<2xf32> to vector<2x1xf32>
    %16 = vector.broadcast %15 : vector<2x1xf32> to vector<2x10xf32>
    %17 = arith.subf %13, %16 : vector<2x10xf32>
    %18 = math.exp %17 : vector<2x10xf32>
    %cst_12 = arith.constant dense<0.000000e+00> : vector<2xf32>
    %19 = vector.multi_reduction <add>, %18, %cst_12 [1] : vector<2x10xf32> to vector<2xf32>
    %20 = vector.shape_cast %19 : vector<2xf32> to vector<2x1xf32>
    %21 = math.log %20 : vector<2x1xf32>
    %22 = vector.broadcast %21 : vector<2x1xf32> to vector<2x10xf32>
    %23 = arith.subf %17, %22 : vector<2x10xf32>
    %c0_13 = arith.constant 0 : index
    %c0_14 = arith.constant 0 : index
    %24 = vector.load %arg6[%c0_13, %c0_14] : memref<2x10xf32, #tpu.memory_space<vmem>>, vector<2x10xf32>
    tpu.vector_store %arg6[%c0_13, %c0_14], %23 {strides = array<i32>} : memref<2x10xf32, #tpu.memory_space<vmem>>, vector<2x10xf32>,
    return
  }
  func.func @transform_0(%arg0: i32) -> (i32, i32) {
    %c0_i32 = arith.constant 0 : i32
    %c0_i32_0 = arith.constant 0 : i32
    return %arg0, %c0_i32 : i32, i32
  }
  func.func @transform_1(%arg0: i32) -> (i32, i32) {
    %c0_i32 = arith.constant 0 : i32
    %c0_i32_0 = arith.constant 0 : i32
    %c0_i32_1 = arith.constant 0 : i32
    return %c0_i32, %c0_i32_0 : i32, i32
  }
  func.func @transform_2(%arg0: i32) -> (i32, i32) {
    %c0_i32 = arith.constant 0 : i32
    %c0_i32_0 = arith.constant 0 : i32
    %c0_i32_1 = arith.constant 0 : i32
    return %c0_i32, %c0_i32_0 : i32, i32
  }
  func.func @transform_3(%arg0: i32) -> (i32, i32) {
    %c0_i32 = arith.constant 0 : i32
    %c0_i32_0 = arith.constant 0 : i32
    %c0_i32_1 = arith.constant 0 : i32
    return %c0_i32, %c0_i32_0 : i32, i32
  }
  func.func @transform_4(%arg0: i32) -> (i32, i32) {
    %c0_i32 = arith.constant 0 : i32
    %c0_i32_0 = arith.constant 0 : i32
    %c0_i32_1 = arith.constant 0 : i32
    return %c0_i32, %c0_i32_0 : i32, i32
  }
  func.func @transform_5(%arg0: i32) -> (i32, i32) {
    %c0_i32 = arith.constant 0 : i32
    %c0_i32_0 = arith.constant 0 : i32
    return %arg0, %c0_i32 : i32, i32
  }
}

</mosaic_0001>

<bundles_post_ra>
// kernel: net_forward.3
= control target key start
LH: loop header
LB: loop body
LE: loop exit
PB: predicated region body
PF: predicated region fallthrough
CT: control target
= control target key end

     0   :  { %s1879_s21 = smov 0   ;;  %s2274_s0 = inlined_call_operand.vmem [shape: bf16[288,25], index: 0, kind: input, shape index: {}]   ;;  %s2275_s1 = inlined_call_operand.vmem [shape: bf16[288,25], index: 1, kind: input, shape index: {}]   ;;  %s2276_s2 = inlined_call_operand.vmem [shape: bf16[288,25], index: 2, kind: input, shape index: {}]   ;;  %s2277_s3 = inlined_call_operand.vmem [shape: bf16[288,25], index: 3, kind: input, shape index: {}]   ;;  %s2278_s4 = inlined_call_operand.vmem [shape: bf16[25,128], index: 4, kind: input, shape index: {}]   ;;  %s2279_s5 = inlined_call_operand.vmem [shape: f32[1,128], index: 5, kind: input, shape index: {}]   ;;  %s2280_s6 = inlined_call_operand.vmem [shape: bf16[288,128], index: 6, kind: output, shape index: {}]  }
   0x1 LB: > { %s1404_s22 = sadd.s32 4294967295, %s1839_s21   ;;  %p1408_p0 = scmp.ge.s32.totalorder %s1839_s21, 1  ;;  %s1839_s21 = sphi %s1879_s21, %s16_s21  }
   0x2   : > { %p246_p1 = scmp.lt.s32.totalorder %s1839_s21, 3 }
   0x4   : > { %p247_p2 = pnand %p1408_p0, %p246_p1 }
   0x5   : > { %s291_s25 = smul.u32 (!%p247_p2), 18, %s1404_s22 }
   0x6   : > { %250 = sbr.rel (%p247_p2) target bundleno = 367 (0x16f), region = 44 }
   0x7   : > { %p292_p3 = scmp.lt.s32.totalorder (!%p247_p2), %s291_s25, 35 }
   0xb   : > { %vm428_vm0 = vcmask 1043456   ;;  %v1841_v0 = vmov 0.0   ;;  %v1795_v1 = vld [vmem:[%s2278_s4 + $0x8] sm:$0x1f]   ;;  %vm429_vm1 = vcmask 1044480   ;;  %v1842_v2 = vmov 65535  }
   0xc   : > { %1624 = vmatprep.subr.bf16.mxu0 %v1841_v0  ;;  %1664 = vmatprep.subr.bf16.mxu1 %v1841_v0  ;;  %v430_v3 = vsel %vm428_vm0, 4294967295, %v1842_v2  ;;  %vm1843_vm2 = vmmov 0   ;;  %v1796_v6 = vld [vmem:[%s2278_s4] sm:$0xff]   ;;  %s2287_s25 = smov (!%p292_p3, %s291_s25), 35  ;;  %vm400_vm3 = vcmask 203776  }
   0xd   : > { %v431_v4 = vsel %vm429_vm1, %v430_v3, 0  ;;  %1628 = vmatprep.mubr.msk.bf16.mxu0 %vm1843_vm2, %v1841_v0  ;;  %1668 = vmatprep.mubr.msk.bf16.mxu1 %vm1843_vm2, %v1841_v0  ;;  %s1901_s28 = sshll.u32 %s2287_s25, 2 }
   0xe   : > { %v433_v5 = vand.u32 %v1795_v1, %v431_v4  ;;  %s1907_s7 = scalar_lea.vmem %s2274_s0, %s1901_s28  ;;  %s1913_s10 = scalar_lea.vmem %s2275_s1, %s1901_s28 }
   0xf   : > { %v1797_v7 = vld [vmem:[%s1907_s7] sm:$0xff]   ;;  %v1799_v9 = vld [vmem:[%s1907_s7 + $0x8] sm:$0xff]   ;;  %v1801_v11 = vld [vmem:[%s1907_s7 + $0x10] sm:$0xff]   ;;  %s1941_s13 = scalar_lea.vmem %s2276_s2, %s1901_s28  ;;  %s1947_s16 = scalar_lea.vmem %s2277_s3, %s1901_s28 }
  0x10   : > { %1625 = vmatpush3.bf16.msra.mxu0 %v433_v5  ;;  %1665 = vmatpush3.bf16.msra.mxu1 %v433_v5  ;;  %v1798_v8 = vld [vmem:[%s1913_s10] sm:$0xff]   ;;  %v1800_v10 = vld [vmem:[%s1913_s10 + $0x8] sm:$0xff]   ;;  %v1802_v12 = vld [vmem:[%s1913_s10 + $0x10] sm:$0xff]   ;;  %s2199_s22 = scalar_lea.vmem %s2280_s6, %s1901_s28 }
  0x11   : > { %1626 = vmatprep.subr.bf16.mxu0 %v1841_v0  ;;  %1666 = vmatprep.subr.bf16.mxu1 %v1841_v0  ;;  %v1803_v13 = vld [vmem:[%s1907_s7 + $0x18] sm:$0xff]   ;;  %v1805_v15 = vld [vmem:[%s1907_s7 + $0x20] sm:$0xff]   ;;  %v1807_v17 = vld [vmem:[%s1907_s7 + $0x28] sm:$0xff]  }
  0x12   : > { %v1804_v14 = vld [vmem:[%s1913_s10 + $0x18] sm:$0xff]   ;;  %v1806_v16 = vld [vmem:[%s1913_s10 + $0x20] sm:$0xff]   ;;  %v1808_v18 = vld [vmem:[%s1913_s10 + $0x28] sm:$0xff]  }
  0x13   : > { %v1809_v19 = vld [vmem:[%s1907_s7 + $0x30] sm:$0xff]   ;;  %v1811_v21 = vld [vmem:[%s1907_s7 + $0x38] sm:$0xff]   ;;  %v1813_v23 = vld [vmem:[%s1907_s7 + $0x40] sm:$0xff]  }
  0x14   : > { %1627 = vmatpush3.bf16.msra.mxu0 %v1796_v6  ;;  %1667 = vmatpush3.bf16.msra.mxu1 %v1796_v6  ;;  %v1810_v20 = vld [vmem:[%s1913_s10 + $0x30] sm:$0xff]   ;;  %v1812_v22 = vld [vmem:[%s1913_s10 + $0x38] sm:$0xff]   ;;  %v1814_v24 = vld [vmem:[%s1913_s10 + $0x40] sm:$0xff]  }
  0x15   : > { %1704 = vmatprep.subr.bf16.mxu0 %v1841_v0  ;;  %1744 = vmatprep.subr.bf16.mxu1 %v1841_v0  ;;  %v1815_v25 = vld [vmem:[%s1941_s13] sm:$0xff]   ;;  %v1817_v27 = vld [vmem:[%s1941_s13 + $0x8] sm:$0xff]   ;;  %v1819_v29 = vld [vmem:[%s1941_s13 + $0x10] sm:$0xff]  }
  0x16   : > { %v1816_v26 = vld [vmem:[%s1947_s16] sm:$0xff]   ;;  %v1818_v28 = vld [vmem:[%s1947_s16 + $0x8] sm:$0xff]   ;;  %v1820_v30 = vld [vmem:[%s1947_s16 + $0x10] sm:$0xff]  }
  0x17   : > { %1629 = vmatmul.mubr.msk.bf16.vlgmr.msra.gmra.mxu0 %vm400_vm3, %v1797_v7  ;;  %1669 = vmatmul.mubr.msk.bf16.vlgmr.msra.gmra.mxu1 %vm400_vm3, %v1798_v8  ;;  %v1821_v31 = vld [vmem:[%s1941_s13 + $0x18] sm:$0xff]   ;;  %v1823_v33 = vld [vmem:[%s1941_s13 + $0x20] sm:$0xff]   ;;  %v1825_v35 = vld [vmem:[%s1941_s13 + $0x28] sm:$0xff]  }
  0x18   : > { %1705 = vmatpush3.bf16.msra.mxu0 %v433_v5  ;;  %1745 = vmatpush3.bf16.msra.mxu1 %v433_v5  ;;  %v1822_v32 = vld [vmem:[%s1947_s16 + $0x18] sm:$0xff]   ;;  %v1824_v34 = vld [vmem:[%s1947_s16 + $0x20] sm:$0xff]   ;;  %v1826_v36 = vld [vmem:[%s1947_s16 + $0x28] sm:$0xff]  }
  0x19   : > { %1632 = vmatprep.mubr.msk.bf16.mxu0 %vm1843_vm2, %v1841_v0  ;;  %1672 = vmatprep.mubr.msk.bf16.mxu1 %vm1843_vm2, %v1841_v0  ;;  %v1827_v37 = vld [vmem:[%s1941_s13 + $0x30] sm:$0xff]   ;;  %v1829_v39 = vld [vmem:[%s1941_s13 + $0x38] sm:$0xff]   ;;  %v1831_v41 = vld [vmem:[%s1941_s13 + $0x40] sm:$0xff]  }
  0x1a   : > { %1706 = vmatprep.subr.bf16.mxu0 %v1841_v0  ;;  %1746 = vmatprep.subr.bf16.mxu1 %v1841_v0  ;;  %v1828_v38 = vld [vmem:[%s1947_s16 + $0x30] sm:$0xff]   ;;  %v1830_v40 = vld [vmem:[%s1947_s16 + $0x38] sm:$0xff]   ;;  %v1832_v42 = vld [vmem:[%s1947_s16 + $0x40] sm:$0xff]  }
  0x1c   : > { %1707 = vmatpush3.bf16.msra.mxu0 %v1796_v6  ;;  %1747 = vmatpush3.bf16.msra.mxu1 %v1796_v6 }
  0x1f   : > { %1633 = vmatmul.mubr.msk.bf16.gmra.mxu0 %vm400_vm3, %v1799_v9  ;;  %1673 = vmatmul.mubr.msk.bf16.gmra.mxu1 %vm400_vm3, %v1800_v10 }
  0x20   : > { %1636 = vmatprep.mubr.msk.bf16.mxu0 %vm1843_vm2, %v1841_v0  ;;  %1676 = vmatprep.mubr.msk.bf16.mxu1 %vm1843_vm2, %v1841_v0 }
  0x27   : > { %1637 = vmatmul.mubr.msk.bf16.gmra.mxu0 %vm400_vm3, %v1801_v11  ;;  %1677 = vmatmul.mubr.msk.bf16.gmra.mxu1 %vm400_vm3, %v1802_v12 }
  0x28   : > { %1640 = vmatprep.mubr.msk.bf16.mxu0 %vm1843_vm2, %v1841_v0  ;;  %1680 = vmatprep.mubr.msk.bf16.mxu1 %vm1843_vm2, %v1841_v0 }
  0x2f   : > { %1641 = vmatmul.mubr.msk.bf16.gmra.mxu0 %vm400_vm3, %v1803_v13  ;;  %1681 = vmatmul.mubr.msk.bf16.gmra.mxu1 %vm400_vm3, %v1804_v14 }
  0x30   : > { %1644 = vmatprep.mubr.msk.bf16.mxu0 %vm1843_vm2, %v1841_v0  ;;  %1684 = vmatprep.mubr.msk.bf16.mxu1 %vm1843_vm2, %v1841_v0 }
  0x37   : > { %1645 = vmatmul.mubr.msk.bf16.gmra.mxu0 %vm400_vm3, %v1805_v15  ;;  %1685 = vmatmul.mubr.msk.bf16.gmra.mxu1 %vm400_vm3, %v1806_v16 }
  0x38   : > { %1648 = vmatprep.mubr.msk.bf16.mxu0 %vm1843_vm2, %v1841_v0  ;;  %1688 = vmatprep.mubr.msk.bf16.mxu1 %vm1843_vm2, %v1841_v0 }
  0x3f   : > { %1649 = vmatmul.mubr.msk.bf16.gmra.mxu0 %vm400_vm3, %v1807_v17  ;;  %1689 = vmatmul.mubr.msk.bf16.gmra.mxu1 %vm400_vm3, %v1808_v18 }
  0x40   : > { %1652 = vmatprep.mubr.msk.bf16.mxu0 %vm1843_vm2, %v1841_v0  ;;  %1692 = vmatprep.mubr.msk.bf16.mxu1 %vm1843_vm2, %v1841_v0 }
  0x47   : > { %1653 = vmatmul.mubr.msk.bf16.gmra.mxu0 %vm400_vm3, %v1809_v19  ;;  %1693 = vmatmul.mubr.msk.bf16.gmra.mxu1 %vm400_vm3, %v1810_v20 }
  0x48   : > { %1656 = vmatprep.mubr.msk.bf16.mxu0 %vm1843_vm2, %v1841_v0  ;;  %1696 = vmatprep.mubr.msk.bf16.mxu1 %vm1843_vm2, %v1841_v0 }
  0x4f   : > { %1657 = vmatmul.mubr.msk.bf16.gmra.mxu0 %vm400_vm3, %v1811_v21  ;;  %1697 = vmatmul.mubr.msk.bf16.gmra.mxu1 %vm400_vm3, %v1812_v22 }
  0x50   : > { %1660 = vmatprep.mubr.msk.bf16.mxu0 %vm1843_vm2, %v1841_v0  ;;  %1700 = vmatprep.mubr.msk.bf16.mxu1 %vm1843_vm2, %v1841_v0 }
  0x57   : > { %1661 = vmatmul.mubr.msk.bf16.gmra.mxu0 %vm400_vm3, %v1813_v23  ;;  %1701 = vmatmul.mubr.msk.bf16.gmra.mxu1 %vm400_vm3, %v1814_v24 }
  0x58   : > { %1708 = vmatprep.mubr.msk.bf16.mxu0 %vm1843_vm2, %v1841_v0  ;;  %1748 = vmatprep.mubr.msk.bf16.mxu1 %vm1843_vm2, %v1841_v0 }
  0x5f   : > { %1709 = vmatmul.mubr.msk.bf16.vlgmr.msra.gmra.mxu0 %vm400_vm3, %v1815_v25  ;;  %1749 = vmatmul.mubr.msk.bf16.vlgmr.msra.gmra.mxu1 %vm400_vm3, %v1816_v26 }
  0x60   : > { %1712 = vmatprep.mubr.msk.bf16.mxu0 %vm1843_vm2, %v1841_v0  ;;  %1752 = vmatprep.mubr.msk.bf16.mxu1 %vm1843_vm2, %v1841_v0 }
  0x67   : > { %1713 = vmatmul.mubr.msk.bf16.gmra.mxu0 %vm400_vm3, %v1817_v27  ;;  %1753 = vmatmul.mubr.msk.bf16.gmra.mxu1 %vm400_vm3, %v1818_v28 }
  0x68   : > { %1716 = vmatprep.mubr.msk.bf16.mxu0 %vm1843_vm2, %v1841_v0  ;;  %1756 = vmatprep.mubr.msk.bf16.mxu1 %vm1843_vm2, %v1841_v0 }
  0x6f   : > { %1717 = vmatmul.mubr.msk.bf16.gmra.mxu0 %vm400_vm3, %v1819_v29  ;;  %1757 = vmatmul.mubr.msk.bf16.gmra.mxu1 %vm400_vm3, %v1820_v30 }
  0x70   : > { %1720 = vmatprep.mubr.msk.bf16.mxu0 %vm1843_vm2, %v1841_v0  ;;  %1760 = vmatprep.mubr.msk.bf16.mxu1 %vm1843_vm2, %v1841_v0 }
  0x77   : > { %1721 = vmatmul.mubr.msk.bf16.gmra.mxu0 %vm400_vm3, %v1821_v31  ;;  %1761 = vmatmul.mubr.msk.bf16.gmra.mxu1 %vm400_vm3, %v1822_v32 }
  0x78   : > { %1724 = vmatprep.mubr.msk.bf16.mxu0 %vm1843_vm2, %v1841_v0  ;;  %1764 = vmatprep.mubr.msk.bf16.mxu1 %vm1843_vm2, %v1841_v0 }
  0x7f   : > { %1725 = vmatmul.mubr.msk.bf16.gmra.mxu0 %vm400_vm3, %v1823_v33  ;;  %1765 = vmatmul.mubr.msk.bf16.gmra.mxu1 %vm400_vm3, %v1824_v34 }
  0x80   : > { %1728 = vmatprep.mubr.msk.bf16.mxu0 %vm1843_vm2, %v1841_v0  ;;  %1768 = vmatprep.mubr.msk.bf16.mxu1 %vm1843_vm2, %v1841_v0 }
  0x87   : > { %1729 = vmatmul.mubr.msk.bf16.gmra.mxu0 %vm400_vm3, %v1825_v35  ;;  %1769 = vmatmul.mubr.msk.bf16.gmra.mxu1 %vm400_vm3, %v1826_v36 }
  0x88   : > { %1732 = vmatprep.mubr.msk.bf16.mxu0 %vm1843_vm2, %v1841_v0  ;;  %1772 = vmatprep.mubr.msk.bf16.mxu1 %vm1843_vm2, %v1841_v0 }
  0x8f   : > { %1733 = vmatmul.mubr.msk.bf16.gmra.mxu0 %vm400_vm3, %v1827_v37  ;;  %1773 = vmatmul.mubr.msk.bf16.gmra.mxu1 %vm400_vm3, %v1828_v38 }
  0x90   : > { %1736 = vmatprep.mubr.msk.bf16.mxu0 %vm1843_vm2, %v1841_v0  ;;  %1776 = vmatprep.mubr.msk.bf16.mxu1 %vm1843_vm2, %v1841_v0 }
  0x97   : > { %1737 = vmatmul.mubr.msk.bf16.gmra.mxu0 %vm400_vm3, %v1829_v39  ;;  %1777 = vmatmul.mubr.msk.bf16.gmra.mxu1 %vm400_vm3, %v1830_v40 }
  0x98   : > { %1740 = vmatprep.mubr.msk.bf16.mxu0 %vm1843_vm2, %v1841_v0  ;;  %1780 = vmatprep.mubr.msk.bf16.mxu1 %vm1843_vm2, %v1841_v0 }
  0x9f   : > { %1741 = vmatmul.mubr.msk.bf16.gmra.mxu0 %vm400_vm3, %v1831_v41  ;;  %1781 = vmatmul.mubr.msk.bf16.gmra.mxu1 %vm400_vm3, %v1832_v42 }
  0xd7   : > { %v2071_v43 = vpop.f32.mrf.mxu0  ;;  %v2073_v44 = vpop.f32.mrf.mxu1 }
  0xd8   : > { %v735_v45 = vmax.f32 %v2071_v43, %v2073_v44 }
  0xd9   : > { %v1630_v46 = vpop.f32.mrf.mxu0  ;;  %v1670_v47 = vpop.f32.mrf.mxu1 }
  0xdb   : > { %v2077_v48 = vpop.f32.mrf.mxu0  ;;  %v2079_v49 = vpop.f32.mrf.mxu1 }
  0xdc   : > { %v736_v50 = vmax.f32 %v2077_v48, %v2079_v49 }
  0xdd   : > { %v1631_v51 = vpop.f32.mrf.mxu0  ;;  %v1671_v52 = vpop.f32.mrf.mxu1 }
  0xdf   : > { %v2083_v53 = vpop.f32.mrf.mxu0  ;;  %v2085_v54 = vpop.f32.mrf.mxu1 }
  0xe0   : > { %v737_v55 = vmax.f32 %v2083_v53, %v2085_v54 }
  0xe1   : > { %v1634_v56 = vpop.f32.mrf.mxu0  ;;  %v1674_v57 = vpop.f32.mrf.mxu1 }
  0xe3   : > { %v2089_v58 = vpop.f32.mrf.mxu0  ;;  %v2091_v59 = vpop.f32.mrf.mxu1 }
  0xe4   : > { %v738_v60 = vmax.f32 %v2089_v58, %v2091_v59 }
  0xe5   : > { %v1635_v61 = vpop.f32.mrf.mxu0  ;;  %v1675_v62 = vpop.f32.mrf.mxu1 }
  0xe7   : > { %v2095_v63 = vpop.f32.mrf.mxu0  ;;  %v2097_v0 = vpop.f32.mrf.mxu1 }
  0xe8   : > { %v739_v1 = vmax.f32 %v2095_v63, %v2097_v0 }
  0xe9   : > { %v1638_v2 = vpop.f32.mrf.mxu0  ;;  %v1678_v3 = vpop.f32.mrf.mxu1 }
  0xeb   : > { %v2101_v4 = vpop.f32.mrf.mxu0  ;;  %v2103_v5 = vpop.f32.mrf.mxu1 }
  0xec   : > { %v740_v6 = vmax.f32 %v2101_v4, %v2103_v5 }
  0xed   : > { %v1639_v7 = vpop.f32.mrf.mxu0  ;;  %v1679_v8 = vpop.f32.mrf.mxu1 }
  0xef   : > { %v2107_v9 = vpop.f32.mrf.mxu0  ;;  %v2109_v10 = vpop.f32.mrf.mxu1 }
  0xf0   : > { %v741_v11 = vmax.f32 %v2107_v9, %v2109_v10 }
  0xf1   : > { %v1642_v12 = vpop.f32.mrf.mxu0  ;;  %v1682_v13 = vpop.f32.mrf.mxu1 }
  0xf3   : > { %v2113_v14 = vpop.f32.mrf.mxu0  ;;  %v2115_v15 = vpop.f32.mrf.mxu1 }
  0xf4   : > { %v742_v16 = vmax.f32 %v2113_v14, %v2115_v15 }
  0xf5   : > { %v1643_v17 = vpop.f32.mrf.mxu0  ;;  %v1683_v18 = vpop.f32.mrf.mxu1 }
  0xf7   : > { %v2119_v19 = vpop.f32.mrf.mxu0  ;;  %v2121_v20 = vpop.f32.mrf.mxu1 }
  0xf8   : > { %v743_v21 = vmax.f32 %v2119_v19, %v2121_v20 }
  0xf9   : > { %v1646_v22 = vpop.f32.mrf.mxu0  ;;  %v1686_v23 = vpop.f32.mrf.mxu1 }
  0xfb   : > { %v2125_v24 = vpop.f32.mrf.mxu0  ;;  %v2127_v25 = vpop.f32.mrf.mxu1 }
  0xfc   : > { %v744_v26 = vmax.f32 %v2125_v24, %v2127_v25 }
  0xfd   : > { %v1647_v27 = vpop.f32.mrf.mxu0  ;;  %v1687_v28 = vpop.f32.mrf.mxu1 }
  0xff   : > { %v2131_v29 = vpop.f32.mrf.mxu0  ;;  %v2133_v30 = vpop.f32.mrf.mxu1 }
 0x100   : > { %v745_v31 = vmax.f32 %v2131_v29, %v2133_v30 }
 0x101   : > { %v1650_v32 = vpop.f32.mrf.mxu0  ;;  %v1690_v33 = vpop.f32.mrf.mxu1 }
 0x103   : > { %v2137_v34 = vpop.f32.mrf.mxu0  ;;  %v2139_v35 = vpop.f32.mrf.mxu1 }
 0x104   : > { %v746_v36 = vmax.f32 %v2137_v34, %v2139_v35 }
 0x105   : > { %v1651_v37 = vpop.f32.mrf.mxu0  ;;  %v1691_v38 = vpop.f32.mrf.mxu1 }
 0x107   : > { %v2143_v39 = vpop.f32.mrf.mxu0  ;;  %v2145_v40 = vpop.f32.mrf.mxu1 }
 0x108   : > { %v747_v41 = vmax.f32 %v2143_v39, %v2145_v40 }
 0x109   : > { %v1654_v42 = vpop.f32.mrf.mxu0  ;;  %v1694_v46 = vpop.f32.mrf.mxu1 }
 0x10b   : > { %v2149_v47 = vpop.f32.mrf.mxu0  ;;  %v2151_v51 = vpop.f32.mrf.mxu1 }
 0x10d   : > { %v1655_v56 = vpop.f32.mrf.mxu0  ;;  %v1695_v57 = vpop.f32.mrf.mxu1 }
 0x10f   : > { %v2155_v61 = vpop.f32.mrf.mxu0  ;;  %v2157_v62 = vpop.f32.mrf.mxu1 }
 0x111   : > { %v1658_v3 = vpop.f32.mrf.mxu0  ;;  %v1698_v7 = vpop.f32.mrf.mxu1 }
 0x113   : > { %v2161_v8 = vpop.f32.mrf.mxu0  ;;  %v2163_v12 = vpop.f32.mrf.mxu1 }
 0x115   : > { %v1659_v17 = vpop.f32.mrf.mxu0  ;;  %v1699_v18 = vpop.f32.mrf.mxu1 }
 0x117   : > { %v2167_v22 = vpop.f32.mrf.mxu0  ;;  %v2169_v23 = vpop.f32.mrf.mxu1 }
 0x119   : > { %v1662_v28 = vpop.f32.mrf.mxu0  ;;  %v1702_v32 = vpop.f32.mrf.mxu1 }
 0x11a   : > { %v2185_v28 = vld [vmem:[%s2279_s5] ss:$0 sm:$0xff] }
 0x11b   : > { %v2173_v33 = vpop.f32.mrf.mxu0  ;;  %v2175_v37 = vpop.f32.mrf.mxu1 }
 0x11d   : > { %v1663_v42 = vpop.f32.mrf.mxu0  ;;  %v1703_v46 = vpop.f32.mrf.mxu1 }
 0x11f   : > { %v877_v56 = vpop.f32.mrf.mxu0  ;;  %v1090_v57 = vpop.f32.mrf.mxu1 }
 0x120   : > { %v948_v3 = vmax.f32 %v735_v45, %v877_v56 }
 0x121   : > { %v1710_v7 = vpop.f32.mrf.mxu0  ;;  %v1750_v17 = vpop.f32.mrf.mxu1 }
 0x122   : > { %v1161_v18 = vmax.f32 %v948_v3, %v1090_v57 }
 0x123   : > { %v880_v32 = vpop.f32.mrf.mxu0  ;;  %v1093_v27 = vpop.f32.mrf.mxu1 }
 0x124   : > { %v949_v42 = vmax.f32 %v736_v50, %v880_v32  ;;  %v1186_v43 = vadd.f32 %v2185_v28, %v1161_v18 }
 0x125   : > { %v1711_v46 = vpop.f32.mrf.mxu0  ;;  %v1751_v38 = vpop.f32.mrf.mxu1 }
 0x126   : > { %v1162_v44 = vmax.f32 %v949_v42, %v1093_v27  ;;  %v1204_v13 = vmax.f32 %v1186_v43, 0.0 }
 0x127   : > { %v885_v45 = vpop.f32.mrf.mxu0  ;;  %v1098_v56 = vpop.f32.mrf.mxu1 }
 0x128   : > { %v1187_v57 = vadd.f32 %v2185_v28, %v1162_v44  ;;  %v950_v3 = vmax.f32 %v737_v55, %v885_v45 }
 0x129   : > { %v1714_v7 = vpop.f32.mrf.mxu0  ;;  %v1754_v17 = vpop.f32.mrf.mxu1 }
 0x12a   : > { %v1205_v2 = vmax.f32 %v1187_v57, 0.0  ;;  %v1163_v52 = vmax.f32 %v950_v3, %v1098_v56 }
 0x12b   : > { %v888_v48 = vpop.f32.mrf.mxu0  ;;  %v1101_v49 = vpop.f32.mrf.mxu1 }
 0x12c   : > { %v1530_v50 = vpack.c.bf16 %v1205_v2, %v1204_v13  ;;  %v951_v27 = vmax.f32 %v738_v60, %v888_v48  ;;  %v1188_v55 = vadd.f32 %v2185_v28, %v1163_v52 }
 0x12d   : > { %v1715_v53 = vpop.f32.mrf.mxu0  ;;  %v1755_v54 = vpop.f32.mrf.mxu1 }
 0x12e   : > { %1531 = vst [vmem:[%s2199_s22] sm:$0xff] %v1530_v50   ;;  %v1164_v38 = vmax.f32 %v951_v27, %v1101_v49  ;;  %v1206_v43 = vmax.f32 %v1188_v55, 0.0 }
 0x12f   : > { %v893_v18 = vpop.f32.mrf.mxu0  ;;  %v1106_v32 = vpop.f32.mrf.mxu1 }
 0x130   : > { %v1189_v42 = vadd.f32 %v2185_v28, %v1164_v38  ;;  %v952_v46 = vmax.f32 %v739_v1, %v893_v18 }
 0x131   : > { %v1718_v2 = vpop.f32.mrf.mxu0  ;;  %v1758_v13 = vpop.f32.mrf.mxu1 }
 0x132   : > { %v1207_v58 = vmax.f32 %v1189_v42, 0.0  ;;  %v1165_v59 = vmax.f32 %v952_v46, %v1106_v32 }
 0x133   : > { %v896_v60 = vpop.f32.mrf.mxu0  ;;  %v1109_v44 = vpop.f32.mrf.mxu1 }
 0x134   : > { %v1535_v45 = vpack.c.bf16 %v1207_v58, %v1206_v43  ;;  %v953_v52 = vmax.f32 %v740_v6, %v896_v60  ;;  %v1190_v3 = vadd.f32 %v2185_v28, %v1165_v59 }
 0x135   : > { %v1719_v56 = vpop.f32.mrf.mxu0  ;;  %v1759_v57 = vpop.f32.mrf.mxu1 }
 0x136   : > { %1572 = vst [vmem:[%s2199_s22 + $0x8] sm:$0xff] %v1535_v45   ;;  %v1166_v7 = vmax.f32 %v953_v52, %v1109_v44  ;;  %v1208_v50 = vmax.f32 %v1190_v3, 0.0 }
 0x137   : > { %v901_v63 = vpop.f32.mrf.mxu0  ;;  %v1114_v0 = vpop.f32.mrf.mxu1 }
 0x138   : > { %v1191_v1 = vadd.f32 %v2185_v28, %v1166_v7  ;;  %v954_v17 = vmax.f32 %v741_v11, %v901_v63 }
 0x139   : > { %v1722_v48 = vpop.f32.mrf.mxu0  ;;  %v1762_v49 = vpop.f32.mrf.mxu1 }
 0x13a   : > { %v1209_v4 = vmax.f32 %v1191_v1, 0.0  ;;  %v1167_v5 = vmax.f32 %v954_v17, %v1114_v0 }
 0x13b   : > { %v904_v6 = vpop.f32.mrf.mxu0  ;;  %v1117_v27 = vpop.f32.mrf.mxu1 }
 0x13c   : > { %v1540_v53 = vpack.c.bf16 %v1209_v4, %v1208_v50  ;;  %v955_v54 = vmax.f32 %v742_v16, %v904_v6  ;;  %v1192_v18 = vadd.f32 %v2185_v28, %v1167_v5 }
 0x13d   : > { %v1723_v55 = vpop.f32.mrf.mxu0  ;;  %v1763_v38 = vpop.f32.mrf.mxu1 }
 0x13e   : > { %1573 = vst [vmem:[%s2199_s22 + $0x10] sm:$0xff] %v1540_v53   ;;  %v1168_v32 = vmax.f32 %v955_v54, %v1117_v27  ;;  %v1210_v13 = vmax.f32 %v1192_v18, 0.0  ;;  %v2281_v55 = vmax.f32 %v2149_v47, %v2151_v51 }
 0x13f   : > { %v909_v9 = vpop.f32.mrf.mxu0  ;;  %v1122_v10 = vpop.f32.mrf.mxu1 }
 0x140   : > { %v1193_v11 = vadd.f32 %v2185_v28, %v1168_v32  ;;  %v956_v42 = vmax.f32 %v743_v21, %v909_v9 }
 0x141   : > { %v1726_v46 = vpop.f32.mrf.mxu0  ;;  %v1766_v2 = vpop.f32.mrf.mxu1 }
 0x142   : > { %v1211_v14 = vmax.f32 %v1193_v11, 0.0  ;;  %v1169_v15 = vmax.f32 %v956_v42, %v1122_v10  ;;  %v2282_v11 = vmax.f32 %v2155_v61, %v2157_v62 }
 0x143   : > { %v912_v16 = vpop.f32.mrf.mxu0  ;;  %v1125_v43 = vpop.f32.mrf.mxu1 }
 0x144   : > { %v1545_v58 = vpack.c.bf16 %v1211_v14, %v1210_v13  ;;  %v957_v59 = vmax.f32 %v744_v26, %v912_v16  ;;  %v1194_v45 = vadd.f32 %v2185_v28, %v1169_v15 }
 0x145   : > { %v1727_v60 = vpop.f32.mrf.mxu0  ;;  %v1767_v44 = vpop.f32.mrf.mxu1 }
 0x146   : > { %1574 = vst [vmem:[%s2199_s22 + $0x18] sm:$0xff] %v1545_v58   ;;  %v1170_v52 = vmax.f32 %v957_v59, %v1125_v43  ;;  %v1212_v7 = vmax.f32 %v1194_v45, 0.0  ;;  %v2283_v43 = vmax.f32 %v2161_v8, %v2163_v12 }
 0x147   : > { %v917_v19 = vpop.f32.mrf.mxu0  ;;  %v1130_v20 = vpop.f32.mrf.mxu1 }
 0x148   : > { %v1195_v21 = vadd.f32 %v2185_v28, %v1170_v52  ;;  %v958_v56 = vmax.f32 %v745_v31, %v917_v19  ;;  %v2284_v19 = vmax.f32 %v2167_v22, %v2169_v23 }
 0x149   : > { %v1730_v57 = vpop.f32.mrf.mxu0  ;;  %v1770_v3 = vpop.f32.mrf.mxu1 }
 0x14a   : > { %v1213_v24 = vmax.f32 %v1195_v21, 0.0  ;;  %v1171_v25 = vmax.f32 %v958_v56, %v1130_v20 }
 0x14b   : > { %v920_v26 = vpop.f32.mrf.mxu0  ;;  %v1133_v63 = vpop.f32.mrf.mxu1 }
 0x14c   : > { %v1550_v0 = vpack.c.bf16 %v1213_v24, %v1212_v7  ;;  %v959_v1 = vmax.f32 %v746_v36, %v920_v26  ;;  %v1196_v49 = vadd.f32 %v2185_v28, %v1171_v25  ;;  %v2285_v26 = vmax.f32 %v2173_v33, %v2175_v37 }
 0x14d   : > { %v1731_v17 = vpop.f32.mrf.mxu0  ;;  %v1771_v48 = vpop.f32.mrf.mxu1 }
 0x14e   : > { %1575 = vst [vmem:[%s2199_s22 + $0x20] sm:$0xff] %v1550_v0   ;;  %v1172_v50 = vmax.f32 %v959_v1, %v1133_v63  ;;  %v1214_v27 = vmax.f32 %v1196_v49, 0.0 }
 0x14f   : > { %v925_v29 = vpop.f32.mrf.mxu0  ;;  %v1138_v30 = vpop.f32.mrf.mxu1 }
 0x150   : > { %v1197_v31 = vadd.f32 %v2185_v28, %v1172_v50  ;;  %v960_v4 = vmax.f32 %v747_v41, %v925_v29 }
 0x151   : > { %v1734_v5 = vpop.f32.mrf.mxu0  ;;  %v1774_v6 = vpop.f32.mrf.mxu1 }
 0x152   : > { %v1215_v34 = vmax.f32 %v1197_v31, 0.0  ;;  %v1173_v35 = vmax.f32 %v960_v4, %v1138_v30 }
 0x153   : > { %v928_v36 = vpop.f32.mrf.mxu0  ;;  %v1141_v53 = vpop.f32.mrf.mxu1 }
 0x154   : > { %v1555_v54 = vpack.c.bf16 %v1215_v34, %v1214_v27  ;;  %v961_v38 = vmax.f32 %v2281_v55, %v928_v36  ;;  %v1198_v9 = vadd.f32 %v2185_v28, %v1173_v35 }
 0x155   : > { %v1735_v18 = vpop.f32.mrf.mxu0  ;;  %v1775_v32 = vpop.f32.mrf.mxu1 }
 0x156   : > { %1576 = vst [vmem:[%s2199_s22 + $0x28] sm:$0xff] %v1555_v54   ;;  %v1174_v10 = vmax.f32 %v961_v38, %v1141_v53  ;;  %v1216_v13 = vmax.f32 %v1198_v9, 0.0 }
 0x157   : > { %v933_v39 = vpop.f32.mrf.mxu0  ;;  %v1146_v40 = vpop.f32.mrf.mxu1 }
 0x158   : > { %v1199_v41 = vadd.f32 %v2185_v28, %v1174_v10  ;;  %v962_v42 = vmax.f32 %v2282_v11, %v933_v39 }
 0x159   : > { %v1738_v46 = vpop.f32.mrf.mxu0  ;;  %v1778_v2 = vpop.f32.mrf.mxu1 }
 0x15a   : > { %v1217_v47 = vmax.f32 %v1199_v41, 0.0  ;;  %v1175_v51 = vmax.f32 %v962_v42, %v1146_v40 }
 0x15b   : > { %v936_v14 = vpop.f32.mrf.mxu0  ;;  %v1149_v15 = vpop.f32.mrf.mxu1 }
 0x15c   : > { %v1560_v16 = vpack.c.bf16 %v1217_v47, %v1216_v13  ;;  %v963_v58 = vmax.f32 %v2283_v43, %v936_v14  ;;  %v1200_v44 = vadd.f32 %v2185_v28, %v1175_v51 }
 0x15d   : > { %v1739_v59 = vpop.f32.mrf.mxu0  ;;  %v1779_v60 = vpop.f32.mrf.mxu1 }
 0x15e   : > { %1577 = vst [vmem:[%s2199_s22 + $0x30] sm:$0xff] %v1560_v16   ;;  %v1176_v45 = vmax.f32 %v963_v58, %v1149_v15  ;;  %v1218_v57 = vmax.f32 %v1200_v44, 0.0 }
 0x15f   : > { %v941_v61 = vpop.f32.mrf.mxu0  ;;  %v1154_v62 = vpop.f32.mrf.mxu1 }
 0x160   : > { %v1201_v52 = vadd.f32 %v2185_v28, %v1176_v45  ;;  %v964_v20 = vmax.f32 %v2284_v19, %v941_v61 }
 0x161   : > { %v1742_v21 = vpop.f32.mrf.mxu0  ;;  %v1782_v56 = vpop.f32.mrf.mxu1 }
 0x162   : > { %v1219_v8 = vmax.f32 %v1201_v52, 0.0  ;;  %v1177_v12 = vmax.f32 %v964_v20, %v1154_v62 }
 0x163   : > { %v944_v3 = vpop.f32.mrf.mxu0  ;;  %v1157_v7 = vpop.f32.mrf.mxu1 }
 0x164   : > { %v1565_v24 = vpack.c.bf16 %v1219_v8, %v1218_v57  ;;  %v1202_v25 = vadd.f32 %v2185_v28, %v1177_v12  ;;  %v965_v63 = vmax.f32 %v2285_v26, %v944_v3 }
 0x165   : > { %v1743_v0 = vpop.f32.mrf.mxu0  ;;  %v1783_v1 = vpop.f32.mrf.mxu1 }
 0x166   : > { %1578 = vst [vmem:[%s2199_s22 + $0x38] sm:$0xff] %v1565_v24   ;;  %v1178_v22 = vmax.f32 %v965_v63, %v1157_v7  ;;  %v1220_v17 = vmax.f32 %v1202_v25, 0.0 }
 0x168   : > { %v1203_v23 = vadd.f32 %v2185_v28, %v1178_v22 }
 0x16a   : > { %v1221_v48 = vmax.f32 %v1203_v23, 0.0 }
 0x16c   : > { %v1570_v49 = vpack.c.bf16 %v1221_v48, %v1220_v17 }
 0x16e   : > { %1579 = vst [vmem:[%s2199_s22 + $0x40] sm:$0xff] %v1570_v49  }
 0x16f PF: > { %s16_s21 = sadd.s32 1, %s1839_s21  }
 0x170   : > { %p13_p4 = scmp.ge.s32.totalorder %s16_s21, 4  }
 0x172   :  { %15 = sbr.rel (!%p13_p4) target bundleno = 1 (0x1), region = 83 }

// kernel: net_forward.4
= control target key start
LH: loop header
LB: loop body
LE: loop exit
PB: predicated region body
PF: predicated region fallthrough
CT: control target
= control target key end

     0   :  { %s1516_s21 = smov 0   ;;  %s1871_s0 = inlined_call_operand.vmem [shape: bf16[32,500], index: 0, kind: input, shape index: {}]   ;;  %s1872_s1 = inlined_call_operand.vmem [shape: bf16[32,500], index: 1, kind: input, shape index: {}]   ;;  %s1873_s2 = inlined_call_operand.vmem [shape: bf16[32,500], index: 2, kind: input, shape index: {}]   ;;  %s1874_s3 = inlined_call_operand.vmem [shape: bf16[32,500], index: 3, kind: input, shape index: {}]   ;;  %s1875_s4 = inlined_call_operand.vmem [shape: bf16[500,128], index: 4, kind: input, shape index: {}]   ;;  %s1876_s5 = inlined_call_operand.vmem [shape: f32[1,128], index: 5, kind: input, shape index: {}]   ;;  %s1877_s6 = inlined_call_operand.vmem [shape: bf16[32,128], index: 6, kind: output, shape index: {}]  }
   0x1 LB: > { %s1142_s22 = sadd.s32 4294967295, %s1479_s21   ;;  %p1146_p0 = scmp.ge.s32.totalorder %s1479_s21, 1  ;;  %s1479_s21 = sphi %s1516_s21, %s16_s21  }
   0x2   : > { %p250_p1 = scmp.lt.s32.totalorder %s1479_s21, 3 }
   0x4   : > { %p251_p2 = pnand %p1146_p0, %p250_p1 }
   0x5   : > { %s1147_s9 = sshll.u32 (!%p251_p2), %s1142_s22, 1 }
   0x6   : > { %254 = sbr.rel (%p251_p2) target bundleno = 355 (0x163), region = 44  ;;  %p300_p3 = scmp.lt.s32.totalorder (!%p251_p2), %s1147_s9, 3 }
   0xb   : > { %v1527_v0 = vld [vmem:[%s1875_s4 + $0x78] sm:$0xff]   ;;  %vm613_vm0 = vcmask 1041408   ;;  %v1551_v4 = vld [vmem:[%s1875_s4 + $0x70] sm:$0xff]   ;;  %v1575_v8 = vld [vmem:[%s1875_s4 + $0x68] sm:$0xff]   ;;  %s1879_s9 = smov (!%p300_p3, %s1147_s9), 3  ;;  %vm609_vm1 = vcmask 949248  }
   0xc   : > { %v1532_v1 = vld [vmem:[%s1875_s4 + $0xf8] ss:$0 sps:$4 sm:$0x33]   ;;  %1229 = vmatprep.subr.bf16.mxu0 %v1527_v0  ;;  %v1557_v5 = vld [vmem:[%s1875_s4 + $0xf0] sm:$0xff]   ;;  %v1581_v9 = vld [vmem:[%s1875_s4 + $0xe8] sm:$0xff]   ;;  %s1690_s10 = sshll.u32 %s1879_s9, 4 }
   0xd   : > { %v1537_v2 = vld [vmem:[%s1875_s4 + $0x38] sm:$0xff]   ;;  %1405 = vmatprep.subr.msk.bf16.mxu1 %vm613_vm0, %v1532_v1  ;;  %v1563_v6 = vld [vmem:[%s1875_s4 + $0x30] sm:$0xff]   ;;  %v1587_v10 = vld [vmem:[%s1875_s4 + $0x28] sm:$0xff]   ;;  %s304_s18 = scalar_lea.vmem %s1871_s0, %s1690_s10  ;;  %s1731_s27 = scalar_lea.vmem %s1872_s1, %s1690_s10 }
   0xe   : > { %1230 = vmatpush3.bf16.msra.mxu0 %v1537_v2  ;;  %v1546_v3 = vld [vmem:[%s1875_s4 + $0xb8] sm:$0xff]   ;;  %v1569_v7 = vld [vmem:[%s1875_s4 + $0xb0] sm:$0xff]   ;;  %v1593_v11 = vld [vmem:[%s1875_s4 + $0xa8] sm:$0xff]   ;;  %s1745_s30 = scalar_lea.vmem %s1873_s2, %s1690_s10  ;;  %s1753_s11 = scalar_lea.vmem %s1874_s3, %s1690_s10 }
   0xf   : > { %1252 = vmatpush3.bf16.msra.mxu1 %v1546_v3  ;;  %1231 = vmatprep.subr.bf16.mxu0 %v1551_v4  ;;  %v1599_v12 = vld [vmem:[%s1875_s4 + $0x60] sm:$0xff]   ;;  %v1625_v16 = vld [vmem:[%s1875_s4 + $0x58] sm:$0xff]   ;;  %v1649_v20 = vld [vmem:[%s1875_s4 + $0x50] sm:$0xff]   ;;  %s1160_s13 = sshll.u32 %s1879_s9, 2 }
  0x10   : > { %1253 = vmatprep.subr.bf16.mxu1 %v1557_v5  ;;  %v1605_v13 = vld [vmem:[%s1875_s4 + $0xe0] sm:$0xff]   ;;  %v1631_v17 = vld [vmem:[%s1875_s4 + $0xd8] sm:$0xff]   ;;  %v1655_v21 = vld [vmem:[%s1875_s4 + $0xd0] sm:$0xff]   ;;  %s331_s22 = scalar_lea.vmem %s1877_s6, %s1160_s13 }
  0x11   : > { %v1611_v14 = vld [vmem:[%s1875_s4 + $0x20] sm:$0xff]   ;;  %v1637_v18 = vld [vmem:[%s1875_s4 + $0x18] sm:$0xff]   ;;  %v1661_v22 = vld [vmem:[%s1875_s4 + $0x10] sm:$0xff]  }
  0x12   : > { %1232 = vmatpush3.bf16.msra.mxu0 %v1563_v6  ;;  %v1617_v15 = vld [vmem:[%s1875_s4 + $0xa0] sm:$0xff]   ;;  %v1643_v19 = vld [vmem:[%s1875_s4 + $0x98] sm:$0xff]   ;;  %v1669_v23 = vld [vmem:[%s1875_s4 + $0x90] sm:$0xff]  }
  0x13   : > { %1254 = vmatpush3.bf16.msra.mxu1 %v1569_v7  ;;  %1233 = vmatprep.subr.bf16.mxu0 %v1575_v8  ;;  %v1675_v24 = vld [vmem:[%s1875_s4 + $0x48] sm:$0xff]   ;;  %v1702_v28 = vld [vmem:[%s1875_s4 + $0x40] sm:$0xff]  }
  0x14   : > { %1255 = vmatprep.subr.bf16.mxu1 %v1581_v9  ;;  %v1681_v25 = vld [vmem:[%s1875_s4 + $0xc8] sm:$0xff]   ;;  %v1708_v29 = vld [vmem:[%s1875_s4 + $0xc0] sm:$0xff]  }
  0x15   : > { %v1687_v26 = vld [vmem:[%s1875_s4 + $0x8] sm:$0xff]   ;;  %v1718_v30 = vld [vmem:[%s1875_s4] sm:$0xff]  }
  0x16   : > { %1234 = vmatpush3.bf16.msra.mxu0 %v1587_v10  ;;  %v1696_v27 = vld [vmem:[%s1875_s4 + $0x88] sm:$0xff]   ;;  %v1724_v31 = vld [vmem:[%s1875_s4 + $0x80] sm:$0xff]  }
  0x17   : > { %1256 = vmatpush3.bf16.msra.mxu1 %v1593_v11  ;;  %1235 = vmatprep.subr.bf16.mxu0 %v1599_v12  ;;  %v1449_v32 = vld [vmem:[%s304_s18] ss:$16 sps:$4 sm:$0xff]   ;;  %v1451_v33 = vld [vmem:[%s304_s18 + $0x4] ss:$16 sps:$4 sm:$0xff]   ;;  %v1452_v34 = vld [vmem:[%s304_s18 + $0x8] ss:$16 sps:$4 sm:$0xff]  }
  0x18   : > { %1257 = vmatprep.subr.bf16.mxu1 %v1605_v13  ;;  %649 = vmatprep.mubr.bf16.mxu0 %v1451_v33  ;;  %v1454_v35 = vld [vmem:[%s304_s18 + $0xc] ss:$16 sps:$4 sm:$0xff]   ;;  %v1457_v36 = vld [vmem:[%s1731_s27 + $0x4] ss:$16 sps:$4 sm:$0xff]   ;;  %v1455_v38 = vld [vmem:[%s1731_s27] ss:$16 sps:$4 sm:$0xff]  }
  0x19   : > { %1197 = vmatprep.mubr.msk.bf16.mxu1 %vm609_vm1, %v1454_v35  ;;  %v1458_v37 = vld [vmem:[%s1731_s27 + $0xc] ss:$16 sps:$4 sm:$0xff]   ;;  %v1463_v39 = vld [vmem:[%s1745_s30 + $0x4] ss:$16 sps:$4 sm:$0xff]   ;;  %v1460_v40 = vld [vmem:[%s1731_s27 + $0x8] ss:$16 sps:$4 sm:$0xff]  }
  0x1a   : > { %1236 = vmatpush3.bf16.msra.mxu0 %v1611_v14  ;;  %v1464_v41 = vld [vmem:[%s1745_s30 + $0xc] ss:$16 sps:$4 sm:$0xff]   ;;  %v1461_v42 = vld [vmem:[%s1745_s30] ss:$16 sps:$4 sm:$0xff]   ;;  %v1469_v43 = vld [vmem:[%s1753_s11 + $0x4] ss:$16 sps:$4 sm:$0xff]  }
  0x1b   : > { %1258 = vmatpush3.bf16.msra.mxu1 %v1617_v15  ;;  %1237 = vmatprep.subr.bf16.mxu0 %v1625_v16  ;;  %v1466_v44 = vld [vmem:[%s1745_s30 + $0x8] ss:$16 sps:$4 sm:$0xff]   ;;  %v1470_v45 = vld [vmem:[%s1753_s11 + $0xc] ss:$16 sps:$4 sm:$0xff]   ;;  %v1467_v46 = vld [vmem:[%s1753_s11] ss:$16 sps:$4 sm:$0xff]  }
  0x1c   : > { %1259 = vmatprep.subr.bf16.mxu1 %v1631_v17  ;;  %v1472_v47 = vld [vmem:[%s1753_s11 + $0x8] ss:$16 sps:$4 sm:$0xff]  }
  0x1e   : > { %1238 = vmatpush3.bf16.msra.mxu0 %v1637_v18 }
  0x1f   : > { %1260 = vmatpush3.bf16.msra.mxu1 %v1643_v19  ;;  %1239 = vmatprep.subr.bf16.mxu0 %v1649_v20 }
  0x20   : > { %1261 = vmatprep.subr.bf16.mxu1 %v1655_v21 }
  0x22   : > { %1240 = vmatpush3.bf16.msra.mxu0 %v1661_v22 }
  0x23   : > { %1262 = vmatpush3.bf16.msra.mxu1 %v1669_v23  ;;  %1241 = vmatprep.subr.bf16.mxu0 %v1675_v24 }
  0x24   : > { %1263 = vmatprep.subr.bf16.mxu1 %v1681_v25 }
  0x26   : > { %1242 = vmatpush3.bf16.msra.mxu0 %v1687_v26 }
  0x27   : > { %1264 = vmatpush3.bf16.msra.mxu1 %v1696_v27  ;;  %1243 = vmatprep.subr.bf16.mxu0 %v1702_v28 }
  0x28   : > { %1265 = vmatprep.subr.bf16.mxu1 %v1708_v29 }
  0x2a   : > { %1244 = vmatpush3.bf16.msra.mxu0 %v1718_v30 }
  0x2b   : > { %1266 = vmatpush3.bf16.msra.mxu1 %v1724_v31  ;;  %1273 = vmatprep.subr.bf16.mxu0 %v1527_v0 }
  0x2c   : > { %1406 = vmatprep.subr.msk.bf16.mxu1 %vm613_vm0, %v1532_v1 }
  0x2d   : > { %650 = vmatmul.mubr.bf16.vlgmr.msra.gmra.mxu0 %v1449_v32 }
  0x2e   : > { %1274 = vmatpush3.bf16.msra.mxu0 %v1537_v2  ;;  %691 = vmatmul.mubr.bf16.vlgmr.msra.gmra.mxu1 %v1452_v34 }
  0x2f   : > { %1275 = vmatprep.subr.bf16.mxu0 %v1551_v4  ;;  %1296 = vmatpush3.bf16.msra.mxu1 %v1546_v3 }
  0x30   : > { %757 = vmatprep.mubr.bf16.mxu0 %v1457_v36  ;;  %1297 = vmatprep.subr.bf16.mxu1 %v1557_v5 }
  0x31   : > { %1202 = vmatprep.mubr.msk.bf16.mxu1 %vm609_vm1, %v1458_v37 }
  0x32   : > { %1276 = vmatpush3.bf16.msra.mxu0 %v1563_v6 }
  0x33   : > { %1277 = vmatprep.subr.bf16.mxu0 %v1575_v8  ;;  %1298 = vmatpush3.bf16.msra.mxu1 %v1569_v7 }
  0x34   : > { %1299 = vmatprep.subr.bf16.mxu1 %v1581_v9 }
  0x36   : > { %1278 = vmatpush3.bf16.msra.mxu0 %v1587_v10 }
  0x37   : > { %1279 = vmatprep.subr.bf16.mxu0 %v1599_v12  ;;  %1300 = vmatpush3.bf16.msra.mxu1 %v1593_v11 }
  0x38   : > { %1301 = vmatprep.subr.bf16.mxu1 %v1605_v13 }
  0x3a   : > { %1280 = vmatpush3.bf16.msra.mxu0 %v1611_v14 }
  0x3b   : > { %1281 = vmatprep.subr.bf16.mxu0 %v1625_v16  ;;  %1302 = vmatpush3.bf16.msra.mxu1 %v1617_v15 }
  0x3c   : > { %1303 = vmatprep.subr.bf16.mxu1 %v1631_v17 }
  0x3e   : > { %1282 = vmatpush3.bf16.msra.mxu0 %v1637_v18 }
  0x3f   : > { %1283 = vmatprep.subr.bf16.mxu0 %v1649_v20  ;;  %1304 = vmatpush3.bf16.msra.mxu1 %v1643_v19 }
  0x40   : > { %1305 = vmatprep.subr.bf16.mxu1 %v1655_v21 }
  0x42   : > { %1284 = vmatpush3.bf16.msra.mxu0 %v1661_v22 }
  0x43   : > { %1285 = vmatprep.subr.bf16.mxu0 %v1675_v24  ;;  %1306 = vmatpush3.bf16.msra.mxu1 %v1669_v23 }
  0x44   : > { %1307 = vmatprep.subr.bf16.mxu1 %v1681_v25 }
  0x46   : > { %1286 = vmatpush3.bf16.msra.mxu0 %v1687_v26 }
  0x47   : > { %1287 = vmatprep.subr.bf16.mxu0 %v1702_v28  ;;  %1308 = vmatpush3.bf16.msra.mxu1 %v1696_v27 }
  0x48   : > { %1309 = vmatprep.subr.bf16.mxu1 %v1708_v29 }
  0x4a   : > { %1288 = vmatpush3.bf16.msra.mxu0 %v1718_v30 }
  0x4b   : > { %1317 = vmatprep.subr.bf16.mxu0 %v1527_v0  ;;  %1310 = vmatpush3.bf16.msra.mxu1 %v1724_v31 }
  0x4c   : > { %1407 = vmatprep.subr.msk.bf16.mxu1 %vm613_vm0, %v1532_v1 }
  0x4d   : > { %758 = vmatmul.mubr.bf16.vlgmr.msra.gmra.mxu0 %v1455_v38 }
  0x4e   : > { %1318 = vmatpush3.bf16.msra.mxu0 %v1537_v2  ;;  %867 = vmatprep.mubr.bf16.mxu0 %v1463_v39 }
  0x4f   : > { %799 = vmatmul.mubr.bf16.vlgmr.msra.gmra.mxu1 %v1460_v40  ;;  %1319 = vmatprep.subr.bf16.mxu0 %v1551_v4 }
  0x50   : > { %1340 = vmatpush3.bf16.msra.mxu1 %v1546_v3  ;;  %1207 = vmatprep.mubr.msk.bf16.mxu1 %vm609_vm1, %v1464_v41 }
  0x51   : > { %1341 = vmatprep.subr.bf16.mxu1 %v1557_v5 }
  0x52   : > { %1320 = vmatpush3.bf16.msra.mxu0 %v1563_v6 }
  0x53   : > { %1321 = vmatprep.subr.bf16.mxu0 %v1575_v8 }
  0x54   : > { %1342 = vmatpush3.bf16.msra.mxu1 %v1569_v7 }
  0x55   : > { %1343 = vmatprep.subr.bf16.mxu1 %v1581_v9 }
  0x56   : > { %1322 = vmatpush3.bf16.msra.mxu0 %v1587_v10 }
  0x57   : > { %1323 = vmatprep.subr.bf16.mxu0 %v1599_v12 }
  0x58   : > { %1344 = vmatpush3.bf16.msra.mxu1 %v1593_v11 }
  0x59   : > { %1345 = vmatprep.subr.bf16.mxu1 %v1605_v13 }
  0x5a   : > { %1324 = vmatpush3.bf16.msra.mxu0 %v1611_v14 }
  0x5b   : > { %1325 = vmatprep.subr.bf16.mxu0 %v1625_v16 }
  0x5c   : > { %1346 = vmatpush3.bf16.msra.mxu1 %v1617_v15 }
  0x5d   : > { %1347 = vmatprep.subr.bf16.mxu1 %v1631_v17 }
  0x5e   : > { %1326 = vmatpush3.bf16.msra.mxu0 %v1637_v18 }
  0x5f   : > { %1327 = vmatprep.subr.bf16.mxu0 %v1649_v20 }
  0x60   : > { %1348 = vmatpush3.bf16.msra.mxu1 %v1643_v19 }
  0x61   : > { %1349 = vmatprep.subr.bf16.mxu1 %v1655_v21 }
  0x62   : > { %1328 = vmatpush3.bf16.msra.mxu0 %v1661_v22 }
  0x63   : > { %1329 = vmatprep.subr.bf16.mxu0 %v1675_v24 }
  0x64   : > { %1350 = vmatpush3.bf16.msra.mxu1 %v1669_v23 }
  0x65   : > { %1351 = vmatprep.subr.bf16.mxu1 %v1681_v25 }
  0x66   : > { %1330 = vmatpush3.bf16.msra.mxu0 %v1687_v26 }
  0x67   : > { %1331 = vmatprep.subr.bf16.mxu0 %v1702_v28 }
  0x68   : > { %1352 = vmatpush3.bf16.msra.mxu1 %v1696_v27 }
  0x69   : > { %1353 = vmatprep.subr.bf16.mxu1 %v1708_v29 }
  0x6a   : > { %1332 = vmatpush3.bf16.msra.mxu0 %v1718_v30 }
  0x6b   : > { %1361 = vmatprep.subr.bf16.mxu0 %v1527_v0 }
  0x6c   : > { %1354 = vmatpush3.bf16.msra.mxu1 %v1724_v31 }
  0x6d   : > { %868 = vmatmul.mubr.bf16.vlgmr.msra.gmra.mxu0 %v1461_v42  ;;  %1408 = vmatprep.subr.msk.bf16.mxu1 %vm613_vm0, %v1532_v1 }
  0x6e   : > { %1362 = vmatpush3.bf16.msra.mxu0 %v1537_v2  ;;  %977 = vmatprep.mubr.bf16.mxu0 %v1469_v43  ;;  %v1213_v43 = vld [vmem:[%s1876_s5] ss:$0 sm:$0xff] }
  0x6f   : > { %909 = vmatmul.mubr.bf16.vlgmr.msra.gmra.mxu1 %v1466_v44  ;;  %1363 = vmatprep.subr.bf16.mxu0 %v1551_v4 }
  0x70   : > { %1384 = vmatpush3.bf16.msra.mxu1 %v1546_v3  ;;  %1212 = vmatprep.mubr.msk.bf16.mxu1 %vm609_vm1, %v1470_v45 }
  0x71   : > { %1385 = vmatprep.subr.bf16.mxu1 %v1557_v5 }
  0x72   : > { %1364 = vmatpush3.bf16.msra.mxu0 %v1563_v6 }
  0x73   : > { %1365 = vmatprep.subr.bf16.mxu0 %v1575_v8 }
  0x74   : > { %1386 = vmatpush3.bf16.msra.mxu1 %v1569_v7 }
  0x75   : > { %1387 = vmatprep.subr.bf16.mxu1 %v1581_v9 }
  0x76   : > { %1366 = vmatpush3.bf16.msra.mxu0 %v1587_v10 }
  0x77   : > { %1367 = vmatprep.subr.bf16.mxu0 %v1599_v12 }
  0x78   : > { %1388 = vmatpush3.bf16.msra.mxu1 %v1593_v11 }
  0x79   : > { %1389 = vmatprep.subr.bf16.mxu1 %v1605_v13 }
  0x7a   : > { %1368 = vmatpush3.bf16.msra.mxu0 %v1611_v14 }
  0x7b   : > { %1369 = vmatprep.subr.bf16.mxu0 %v1625_v16 }
  0x7c   : > { %1390 = vmatpush3.bf16.msra.mxu1 %v1617_v15 }
  0x7d   : > { %1391 = vmatprep.subr.bf16.mxu1 %v1631_v17 }
  0x7e   : > { %1370 = vmatpush3.bf16.msra.mxu0 %v1637_v18 }
  0x7f   : > { %1371 = vmatprep.subr.bf16.mxu0 %v1649_v20 }
  0x80   : > { %1392 = vmatpush3.bf16.msra.mxu1 %v1643_v19 }
  0x81   : > { %1393 = vmatprep.subr.bf16.mxu1 %v1655_v21 }
  0x82   : > { %1372 = vmatpush3.bf16.msra.mxu0 %v1661_v22 }
  0x83   : > { %1373 = vmatprep.subr.bf16.mxu0 %v1675_v24 }
  0x84   : > { %1394 = vmatpush3.bf16.msra.mxu1 %v1669_v23 }
  0x85   : > { %1395 = vmatprep.subr.bf16.mxu1 %v1681_v25 }
  0x86   : > { %1374 = vmatpush3.bf16.msra.mxu0 %v1687_v26 }
  0x87   : > { %1375 = vmatprep.subr.bf16.mxu0 %v1702_v28 }
  0x88   : > { %1396 = vmatpush3.bf16.msra.mxu1 %v1696_v27 }
  0x89   : > { %1397 = vmatprep.subr.bf16.mxu1 %v1708_v29 }
  0x8a   : > { %1376 = vmatpush3.bf16.msra.mxu0 %v1718_v30 }
  0x8c   : > { %1398 = vmatpush3.bf16.msra.mxu1 %v1724_v31 }
  0x8d   : > { %978 = vmatmul.mubr.bf16.vlgmr.msra.gmra.mxu0 %v1467_v46 }
  0x8f   : > { %1019 = vmatmul.mubr.bf16.vlgmr.msra.gmra.mxu1 %v1472_v47 }
  0xed   : > { %v1245_v48 = vpop.f32.mrf.mxu0 }
  0xee   : > { %v1267_v49 = vpop.f32.mrf.mxu1 }
  0xef   : > { %v1246_v50 = vpop.f32.mrf.mxu0 }
  0xf0   : > { %v1268_v51 = vpop.f32.mrf.mxu1  ;;  %v1247_v8 = vadd.f32 %v1246_v50, %v1245_v48 }
  0xf1   : > { %v1248_v52 = vpop.f32.mrf.mxu0  ;;  %v1269_v9 = vadd.f32 %v1268_v51, %v1267_v49 }
  0xf2   : > { %v1270_v53 = vpop.f32.mrf.mxu1 }
  0xf3   : > { %v1249_v54 = vpop.f32.mrf.mxu0  ;;  %v693_v18 = vadd.f32 %v1269_v9, %v1247_v8 }
  0xf4   : > { %v1271_v55 = vpop.f32.mrf.mxu1  ;;  %v1250_v19 = vadd.f32 %v1249_v54, %v1248_v52 }
  0xf5   : > { %v1272_v20 = vadd.f32 %v1271_v55, %v1270_v53 }
  0xf7   : > { %v696_v32 = vadd.f32 %v1272_v20, %v1250_v19 }
 0x10d   : > { %v1289_v56 = vpop.f32.mrf.mxu0 }
 0x10f   : > { %v1311_v57 = vpop.f32.mrf.mxu1  ;;  %v1290_v58 = vpop.f32.mrf.mxu0 }
 0x110   : > { %v1291_v6 = vadd.f32 %v1290_v58, %v1289_v56 }
 0x111   : > { %v1312_v59 = vpop.f32.mrf.mxu1  ;;  %v1292_v60 = vpop.f32.mrf.mxu0 }
 0x112   : > { %v1313_v7 = vadd.f32 %v1312_v59, %v1311_v57 }
 0x113   : > { %v1314_v61 = vpop.f32.mrf.mxu1  ;;  %v1293_v62 = vpop.f32.mrf.mxu0 }
 0x114   : > { %v801_v15 = vadd.f32 %v1313_v7, %v1291_v6  ;;  %v1294_v16 = vadd.f32 %v1293_v62, %v1292_v60 }
 0x115   : > { %v1315_v63 = vpop.f32.mrf.mxu1 }
 0x116   : > { %v1316_v17 = vadd.f32 %v1315_v63, %v1314_v61  ;;  %v807_v29 = vmax.f32 %v693_v18, %v801_v15 }
 0x118   : > { %v804_v30 = vadd.f32 %v1316_v17, %v1294_v16 }
 0x11a   : > { %v808_v40 = vmax.f32 %v696_v32, %v804_v30 }
 0x12d   : > { %v1333_v0 = vpop.f32.mrf.mxu0 }
 0x12f   : > { %v1355_v1 = vpop.f32.mrf.mxu1  ;;  %v1334_v2 = vpop.f32.mrf.mxu0 }
 0x130   : > { %v1335_v11 = vadd.f32 %v1334_v2, %v1333_v0 }
 0x131   : > { %v1356_v3 = vpop.f32.mrf.mxu1  ;;  %v1336_v4 = vpop.f32.mrf.mxu0 }
 0x132   : > { %v1357_v12 = vadd.f32 %v1356_v3, %v1355_v1 }
 0x133   : > { %v1358_v5 = vpop.f32.mrf.mxu1  ;;  %v1337_v10 = vpop.f32.mrf.mxu0 }
 0x134   : > { %v911_v23 = vadd.f32 %v1357_v12, %v1335_v11  ;;  %v1338_v24 = vadd.f32 %v1337_v10, %v1336_v4 }
 0x135   : > { %v1359_v13 = vpop.f32.mrf.mxu1 }
 0x136   : > { %v1360_v25 = vadd.f32 %v1359_v13, %v1358_v5  ;;  %v917_v35 = vmax.f32 %v807_v29, %v911_v23 }
 0x138   : > { %v914_v36 = vadd.f32 %v1360_v25, %v1338_v24 }
 0x13a   : > { %v918_v44 = vmax.f32 %v808_v40, %v914_v36 }
 0x14d   : > { %v1377_v14 = vpop.f32.mrf.mxu0 }
 0x14f   : > { %v1399_v21 = vpop.f32.mrf.mxu1  ;;  %v1378_v22 = vpop.f32.mrf.mxu0 }
 0x150   : > { %v1379_v26 = vadd.f32 %v1378_v22, %v1377_v14 }
 0x151   : > { %v1400_v27 = vpop.f32.mrf.mxu1  ;;  %v1380_v28 = vpop.f32.mrf.mxu0 }
 0x152   : > { %v1401_v31 = vadd.f32 %v1400_v27, %v1399_v21 }
 0x153   : > { %v1402_v33 = vpop.f32.mrf.mxu1  ;;  %v1381_v34 = vpop.f32.mrf.mxu0 }
 0x154   : > { %v1021_v37 = vadd.f32 %v1401_v31, %v1379_v26  ;;  %v1382_v38 = vadd.f32 %v1381_v34, %v1380_v28 }
 0x155   : > { %v1403_v39 = vpop.f32.mrf.mxu1 }
 0x156   : > { %v1027_v41 = vmax.f32 %v917_v35, %v1021_v37  ;;  %v1404_v42 = vadd.f32 %v1403_v39, %v1402_v33 }
 0x158   : > { %v1024_v45 = vadd.f32 %v1404_v42, %v1382_v38  ;;  %v1036_v46 = vadd.f32 %v1213_v43, %v1027_v41 }
 0x15a   : > { %v1028_v47 = vmax.f32 %v918_v44, %v1024_v45  ;;  %v1038_v49 = vmax.f32 %v1036_v46, 0.0 }
 0x15c   : > { %v1037_v48 = vadd.f32 %v1213_v43, %v1028_v47 }
 0x15e   : > { %v1039_v50 = vmax.f32 %v1037_v48, 0.0 }
 0x160   : > { %v1227_v51 = vpack.c.bf16 %v1039_v50, %v1038_v49 }
 0x162   : > { %1228 = vst [vmem:[%s331_s22] sm:$0xff] %v1227_v51  }
 0x163 PF: > { %s16_s21 = sadd.s32 1, %s1479_s21  }
 0x164   : > { %p13_p4 = scmp.ge.s32.totalorder %s16_s21, 4  }
 0x166   :  { %15 = sbr.rel (!%p13_p4) target bundleno = 1 (0x1), region = 83 }

// kernel: net_forward.5
= control target key start
LH: loop header
LB: loop body
LE: loop exit
PB: predicated region body
PF: predicated region fallthrough
CT: control target
= control target key end

     0   :  { %v538_v36 = vlaneseq  ;;  %v5689_v37 = vmov 1966171168   ;;  %s7522_s0 = inlined_call_operand.vmem [shape: bf16[2,2048], index: 0, kind: input, shape index: {}]   ;;  %s7523_s1 = inlined_call_operand.vmem [shape: bf16[2048,512], index: 1, kind: input, shape index: {}]   ;;  %s7524_s2 = inlined_call_operand.vmem [shape: f32[1,512], index: 2, kind: input, shape index: {}]   ;;  %s7525_s3 = inlined_call_operand.vmem [shape: bf16[512,10], index: 3, kind: input, shape index: {}]   ;;  %s7526_s4 = inlined_call_operand.vmem [shape: f32[1,10], index: 4, kind: input, shape index: {}]   ;;  %s7527_s5 = inlined_call_operand.hbm [shape: f32[2,10], index: 5, kind: output, shape index: {}]  }
   0x1   :  { %v4860_v0 = vld [vmem:[%s7523_s1 + $0xe4] ss:$16 sps:$4 sm:$0xff]   ;;  %v4864_v2 = vld [vmem:[%s7523_s1 + $0xe0] ss:$16 sps:$4 sm:$0xff]   ;;  %v562_v38 = vunpack.c.l.s4 %v5689_v37 }
   0x2   :  { %v4862_v1 = vld [vmem:[%s7523_s1 + $0x2e4] ss:$16 sps:$4 sm:$0xff]   ;;  %3234 = vmatprep.subr.bf16.mxu0 %v4860_v0  ;;  %v4865_v3 = vld [vmem:[%s7523_s1 + $0x2e0] ss:$16 sps:$4 sm:$0xff]   ;;  %v5838_v42 = vshrl.u32 %v538_v36, 7 }
   0x3   :  { %3275 = vmatprep.subr.bf16.mxu1 %v4862_v1  ;;  %v4866_v4 = vld [vmem:[%s7523_s1 + $0xc4] ss:$16 sps:$4 sm:$0xff]   ;;  %3235 = vmatpush1.bf16.msra.mxu0 %v4864_v2  ;;  %v4870_v6 = vld [vmem:[%s7523_s1 + $0xc0] ss:$16 sps:$4 sm:$0xff]   ;;  %v563_v43 = vunpack.c.0.s8 %v562_v38 }
   0x4   :  { %3276 = vmatpush1.bf16.msra.mxu1 %v4865_v3  ;;  %v4868_v5 = vld [vmem:[%s7523_s1 + $0x2c4] ss:$16 sps:$4 sm:$0xff]   ;;  %3236 = vmatprep.subr.bf16.mxu0 %v4866_v4  ;;  %v4871_v7 = vld [vmem:[%s7523_s1 + $0x2c0] ss:$16 sps:$4 sm:$0xff]  }
   0x5   :  { %3277 = vmatprep.subr.bf16.mxu1 %v4868_v5  ;;  %v4872_v8 = vld [vmem:[%s7523_s1 + $0xa4] ss:$16 sps:$4 sm:$0xff]   ;;  %v4876_v10 = vld [vmem:[%s7523_s1 + $0xa0] ss:$16 sps:$4 sm:$0xff]   ;;  %v5856_v49 = vsub.s32 %v563_v43, %v5838_v42 }
   0x6   :  { %v4874_v9 = vld [vmem:[%s7523_s1 + $0x2a4] ss:$16 sps:$4 sm:$0xff]   ;;  %v4877_v11 = vld [vmem:[%s7523_s1 + $0x2a0] ss:$16 sps:$4 sm:$0xff]  }
   0x7   :  { %3237 = vmatpush1.bf16.msra.mxu0 %v4870_v6  ;;  %v4878_v12 = vld [vmem:[%s7523_s1 + $0x84] ss:$16 sps:$4 sm:$0xff]   ;;  %v4882_v14 = vld [vmem:[%s7523_s1 + $0x80] ss:$16 sps:$4 sm:$0xff]  }
   0x8   :  { %3278 = vmatpush1.bf16.msra.mxu1 %v4871_v7  ;;  %3238 = vmatprep.subr.bf16.mxu0 %v4872_v8  ;;  %v4880_v13 = vld [vmem:[%s7523_s1 + $0x284] ss:$16 sps:$4 sm:$0xff]   ;;  %v4883_v15 = vld [vmem:[%s7523_s1 + $0x280] ss:$16 sps:$4 sm:$0xff]  }
   0x9   :  { %3279 = vmatprep.subr.bf16.mxu1 %v4874_v9  ;;  %v4884_v16 = vld [vmem:[%s7523_s1 + $0x64] ss:$16 sps:$4 sm:$0xff]   ;;  %v4888_v18 = vld [vmem:[%s7523_s1 + $0x60] ss:$16 sps:$4 sm:$0xff]  }
   0xa   :  { %v4886_v17 = vld [vmem:[%s7523_s1 + $0x264] ss:$16 sps:$4 sm:$0xff]   ;;  %v4889_v19 = vld [vmem:[%s7523_s1 + $0x260] ss:$16 sps:$4 sm:$0xff]  }
   0xb   :  { %3239 = vmatpush1.bf16.msra.mxu0 %v4876_v10  ;;  %v4890_v20 = vld [vmem:[%s7523_s1 + $0x44] ss:$16 sps:$4 sm:$0xff]   ;;  %v4894_v22 = vld [vmem:[%s7523_s1 + $0x40] ss:$16 sps:$4 sm:$0xff]  }
   0xc   :  { %3280 = vmatpush1.bf16.msra.mxu1 %v4877_v11  ;;  %3240 = vmatprep.subr.bf16.mxu0 %v4878_v12  ;;  %v4892_v21 = vld [vmem:[%s7523_s1 + $0x244] ss:$16 sps:$4 sm:$0xff]   ;;  %v4895_v23 = vld [vmem:[%s7523_s1 + $0x240] ss:$16 sps:$4 sm:$0xff]  }
   0xd   :  { %3281 = vmatprep.subr.bf16.mxu1 %v4880_v13  ;;  %v4896_v24 = vld [vmem:[%s7523_s1 + $0x24] ss:$16 sps:$4 sm:$0xff]   ;;  %v4900_v26 = vld [vmem:[%s7523_s1 + $0x20] ss:$16 sps:$4 sm:$0xff]  }
   0xe   :  { %v4898_v25 = vld [vmem:[%s7523_s1 + $0x224] ss:$16 sps:$4 sm:$0xff]   ;;  %v4901_v27 = vld [vmem:[%s7523_s1 + $0x220] ss:$16 sps:$4 sm:$0xff]  }
   0xf   :  { %3241 = vmatpush1.bf16.msra.mxu0 %v4882_v14  ;;  %v4902_v28 = vld [vmem:[%s7523_s1 + $0x4] ss:$16 sps:$4 sm:$0xff]   ;;  %v4906_v30 = vld [vmem:[%s7523_s1] ss:$16 sps:$4 sm:$0xff]  }
  0x10   :  { %3282 = vmatpush1.bf16.msra.mxu1 %v4883_v15  ;;  %3242 = vmatprep.subr.bf16.mxu0 %v4884_v16  ;;  %v4904_v29 = vld [vmem:[%s7523_s1 + $0x204] ss:$16 sps:$4 sm:$0xff]   ;;  %v4907_v31 = vld [vmem:[%s7523_s1 + $0x200] ss:$16 sps:$4 sm:$0xff]  }
  0x11   :  { %3283 = vmatprep.subr.bf16.mxu1 %v4886_v17  ;;  %v4908_v32 = vld [vmem:[%s7523_s1 + $0x1e4] ss:$16 sps:$4 sm:$0xff]   ;;  %v4912_v34 = vld [vmem:[%s7523_s1 + $0x1e0] ss:$16 sps:$4 sm:$0xff]  }
  0x12   :  { %v4910_v33 = vld [vmem:[%s7523_s1 + $0x3e4] ss:$16 sps:$4 sm:$0xff]   ;;  %v4913_v35 = vld [vmem:[%s7523_s1 + $0x3e0] ss:$16 sps:$4 sm:$0xff]  }
  0x13   :  { %3243 = vmatpush1.bf16.msra.mxu0 %v4888_v18  ;;  %v4914_v39 = vld [vmem:[%s7523_s1 + $0x1c4] ss:$16 sps:$4 sm:$0xff]   ;;  %v4918_v41 = vld [vmem:[%s7523_s1 + $0x1c0] ss:$16 sps:$4 sm:$0xff]  }
  0x14   :  { %3284 = vmatpush1.bf16.msra.mxu1 %v4889_v19  ;;  %3244 = vmatprep.subr.bf16.mxu0 %v4890_v20  ;;  %v4916_v40 = vld [vmem:[%s7523_s1 + $0x3c4] ss:$16 sps:$4 sm:$0xff]   ;;  %v4919_v44 = vld [vmem:[%s7523_s1 + $0x3c0] ss:$16 sps:$4 sm:$0xff]  }
  0x15   :  { %3285 = vmatprep.subr.bf16.mxu1 %v4892_v21  ;;  %v4920_v45 = vld [vmem:[%s7523_s1 + $0x1a4] ss:$16 sps:$4 sm:$0xff]   ;;  %v4924_v47 = vld [vmem:[%s7523_s1 + $0x1a0] ss:$16 sps:$4 sm:$0xff]  }
  0x16   :  { %v4922_v46 = vld [vmem:[%s7523_s1 + $0x3a4] ss:$16 sps:$4 sm:$0xff]   ;;  %v4925_v48 = vld [vmem:[%s7523_s1 + $0x3a0] ss:$16 sps:$4 sm:$0xff]  }
  0x17   :  { %3245 = vmatpush1.bf16.msra.mxu0 %v4894_v22  ;;  %v4926_v50 = vld [vmem:[%s7523_s1 + $0x184] ss:$16 sps:$4 sm:$0xff]   ;;  %v4930_v53 = vld [vmem:[%s7523_s1 + $0x180] ss:$16 sps:$4 sm:$0xff]  }
  0x18   :  { %3286 = vmatpush1.bf16.msra.mxu1 %v4895_v23  ;;  %3246 = vmatprep.subr.bf16.mxu0 %v4896_v24  ;;  %v4928_v51 = vld [vmem:[%s7523_s1 + $0x384] ss:$16 sps:$4 sm:$0xff]   ;;  %v4931_v55 = vld [vmem:[%s7523_s1 + $0x380] ss:$16 sps:$4 sm:$0xff]  }
  0x19   :  { %3287 = vmatprep.subr.bf16.mxu1 %v4898_v25  ;;  %v22_v52 = vld [vmem:[%s7522_s0] sm:$0xff] }
  0x1a   :  { %v567_v54 = vrot.slane %v22_v52, %v5856_v49  ;;  %v4932_v56 = vld [vmem:[%s7523_s1 + $0x164] ss:$16 sps:$4 sm:$0xff]   ;;  %v4936_v59 = vld [vmem:[%s7523_s1 + $0x160] ss:$16 sps:$4 sm:$0xff]   ;;  %v560_v1 = vcombine.high %v22_v52, %v22_v52 }
  0x1b   :  { %3247 = vmatpush1.bf16.msra.mxu0 %v4900_v26  ;;  %v4934_v57 = vld [vmem:[%s7523_s1 + $0x364] ss:$16 sps:$4 sm:$0xff]   ;;  %v4937_v61 = vld [vmem:[%s7523_s1 + $0x360] ss:$16 sps:$4 sm:$0xff]  }
  0x1c   :  { %3288 = vmatpush1.bf16.msra.mxu1 %v4901_v27  ;;  %3248 = vmatprep.subr.bf16.mxu0 %v4902_v28  ;;  %v575_v58 = vcombine.high %v567_v54, %v567_v54  ;;  %v4938_v62 = vld [vmem:[%s7523_s1 + $0x144] ss:$16 sps:$4 sm:$0xff]   ;;  %v4942_v2 = vld [vmem:[%s7523_s1 + $0x140] ss:$16 sps:$4 sm:$0xff]   ;;  %v5914_v6 = vrot.slane %v560_v1, %v5856_v49  ;;  %v5934_v13 = vrot.slane %v567_v54, %v5856_v49 }
  0x1d   :  { %3289 = vmatprep.subr.bf16.mxu1 %v4904_v29  ;;  %v4940_v63 = vld [vmem:[%s7523_s1 + $0x344] ss:$16 sps:$4 sm:$0xff]   ;;  %v4943_v3 = vld [vmem:[%s7523_s1 + $0x340] ss:$16 sps:$4 sm:$0xff]  }
  0x1e   :  { %v5884_v60 = vrot.slane %v575_v58, %v5856_v49  ;;  %v4944_v4 = vld [vmem:[%s7523_s1 + $0x124] ss:$16 sps:$4 sm:$0xff]   ;;  %v4948_v7 = vld [vmem:[%s7523_s1 + $0x120] ss:$16 sps:$4 sm:$0xff]   ;;  %v576_v11 = vcombine.high %v5914_v6, %v5914_v6  ;;  %v5950_v18 = vcombine.high %v5934_v13, %v5934_v13 }
  0x1f   :  { %3249 = vmatpush1.bf16.msra.mxu0 %v4906_v30  ;;  %v4946_v5 = vld [vmem:[%s7523_s1 + $0x324] ss:$16 sps:$4 sm:$0xff]   ;;  %v4949_v8 = vld [vmem:[%s7523_s1 + $0x320] ss:$16 sps:$4 sm:$0xff]  }
  0x20   :  { %3290 = vmatpush1.bf16.msra.mxu1 %v4907_v31  ;;  %3250 = vmatprep.subr.bf16.mxu0 %v4908_v32  ;;  %v5897_v0 = vcombine.high %v5884_v60, %v5884_v60  ;;  %v4950_v9 = vld [vmem:[%s7523_s1 + $0x104] ss:$16 sps:$4 sm:$0xff]   ;;  %v4954_v12 = vld [vmem:[%s7523_s1 + $0x100] ss:$16 sps:$4 sm:$0xff]   ;;  %v5946_v17 = vrot.slane %v576_v11, %v5856_v49 }
  0x21   :  { %3291 = vmatprep.subr.bf16.mxu1 %v4910_v33  ;;  %3266 = vmatprep.mubr.bf16.mxu0 %v5884_v60  ;;  %v4952_v10 = vld [vmem:[%s7523_s1 + $0x304] ss:$16 sps:$4 sm:$0xff]   ;;  %v4955_v14 = vld [vmem:[%s7523_s1 + $0x300] ss:$16 sps:$4 sm:$0xff]  }
  0x22   :  { %3307 = vmatprep.mubr.bf16.mxu1 %v5897_v0  ;;  %v4958_v15 = vld [vmem:[%s7523_s1 + $0x4e4] ss:$16 sps:$4 sm:$0xff]   ;;  %v4956_v19 = vld [vmem:[%s7523_s1 + $0x4e0] ss:$16 sps:$4 sm:$0xff]   ;;  %v5966_v23 = vcombine.high %v5946_v17, %v5946_v17 }
  0x23   :  { %3251 = vmatpush2.bf16.msra.mxu0 %v4912_v34  ;;  %v4961_v16 = vld [vmem:[%s7523_s1 + $0x6e4] ss:$16 sps:$4 sm:$0xff]   ;;  %v4959_v20 = vld [vmem:[%s7523_s1 + $0x6e0] ss:$16 sps:$4 sm:$0xff]  }
  0x24   :  { %3292 = vmatpush2.bf16.msra.mxu1 %v4913_v35  ;;  %3252 = vmatprep.subr.bf16.mxu0 %v4914_v39  ;;  %v4964_v21 = vld [vmem:[%s7523_s1 + $0x4c4] ss:$16 sps:$4 sm:$0xff]   ;;  %v4962_v24 = vld [vmem:[%s7523_s1 + $0x4c0] ss:$16 sps:$4 sm:$0xff]  }
  0x25   :  { %3293 = vmatprep.subr.bf16.mxu1 %v4916_v40  ;;  %v4967_v22 = vld [vmem:[%s7523_s1 + $0x6c4] ss:$16 sps:$4 sm:$0xff]   ;;  %v4965_v25 = vld [vmem:[%s7523_s1 + $0x6c0] ss:$16 sps:$4 sm:$0xff]  }
  0x26   :  { %v4970_v26 = vld [vmem:[%s7523_s1 + $0x4a4] ss:$16 sps:$4 sm:$0xff]   ;;  %v4968_v28 = vld [vmem:[%s7523_s1 + $0x4a0] ss:$16 sps:$4 sm:$0xff]  }
  0x27   :  { %3253 = vmatpush2.bf16.msra.mxu0 %v4918_v41  ;;  %v4973_v27 = vld [vmem:[%s7523_s1 + $0x6a4] ss:$16 sps:$4 sm:$0xff]   ;;  %v4971_v29 = vld [vmem:[%s7523_s1 + $0x6a0] ss:$16 sps:$4 sm:$0xff]  }
  0x28   :  { %3294 = vmatpush2.bf16.msra.mxu1 %v4919_v44  ;;  %3254 = vmatprep.subr.bf16.mxu0 %v4920_v45  ;;  %v4976_v30 = vld [vmem:[%s7523_s1 + $0x484] ss:$16 sps:$4 sm:$0xff]   ;;  %v4974_v32 = vld [vmem:[%s7523_s1 + $0x480] ss:$16 sps:$4 sm:$0xff]  }
  0x29   :  { %3295 = vmatprep.subr.bf16.mxu1 %v4922_v46  ;;  %v4979_v31 = vld [vmem:[%s7523_s1 + $0x684] ss:$16 sps:$4 sm:$0xff]   ;;  %v4977_v33 = vld [vmem:[%s7523_s1 + $0x680] ss:$16 sps:$4 sm:$0xff]  }
  0x2a   :  { %v4982_v34 = vld [vmem:[%s7523_s1 + $0x464] ss:$16 sps:$4 sm:$0xff]   ;;  %v4980_v36 = vld [vmem:[%s7523_s1 + $0x460] ss:$16 sps:$4 sm:$0xff]  }
  0x2b   :  { %3255 = vmatpush2.bf16.msra.mxu0 %v4924_v47  ;;  %v4985_v35 = vld [vmem:[%s7523_s1 + $0x664] ss:$16 sps:$4 sm:$0xff]   ;;  %v4983_v37 = vld [vmem:[%s7523_s1 + $0x660] ss:$16 sps:$4 sm:$0xff]  }
  0x2c   :  { %3296 = vmatpush2.bf16.msra.mxu1 %v4925_v48  ;;  %3256 = vmatprep.subr.bf16.mxu0 %v4926_v50  ;;  %v4988_v38 = vld [vmem:[%s7523_s1 + $0x444] ss:$16 sps:$4 sm:$0xff]   ;;  %v4986_v40 = vld [vmem:[%s7523_s1 + $0x440] ss:$16 sps:$4 sm:$0xff]  }
  0x2d   :  { %3297 = vmatprep.subr.bf16.mxu1 %v4928_v51  ;;  %v4991_v39 = vld [vmem:[%s7523_s1 + $0x644] ss:$16 sps:$4 sm:$0xff]   ;;  %v4989_v41 = vld [vmem:[%s7523_s1 + $0x640] ss:$16 sps:$4 sm:$0xff]  }
  0x2e   :  { %v4994_v43 = vld [vmem:[%s7523_s1 + $0x424] ss:$16 sps:$4 sm:$0xff]   ;;  %v4992_v45 = vld [vmem:[%s7523_s1 + $0x420] ss:$16 sps:$4 sm:$0xff]  }
  0x2f   :  { %3257 = vmatpush2.bf16.msra.mxu0 %v4930_v53  ;;  %v4997_v44 = vld [vmem:[%s7523_s1 + $0x624] ss:$16 sps:$4 sm:$0xff]   ;;  %v4995_v46 = vld [vmem:[%s7523_s1 + $0x620] ss:$16 sps:$4 sm:$0xff]  }
  0x30   :  { %3298 = vmatpush2.bf16.msra.mxu1 %v4931_v55  ;;  %3258 = vmatprep.subr.bf16.mxu0 %v4932_v56  ;;  %v5000_v47 = vld [vmem:[%s7523_s1 + $0x404] ss:$16 sps:$4 sm:$0xff]   ;;  %v4998_v50 = vld [vmem:[%s7523_s1 + $0x400] ss:$16 sps:$4 sm:$0xff]  }
  0x31   :  { %3299 = vmatprep.subr.bf16.mxu1 %v4934_v57  ;;  %v5003_v48 = vld [vmem:[%s7523_s1 + $0x604] ss:$16 sps:$4 sm:$0xff]   ;;  %v5001_v51 = vld [vmem:[%s7523_s1 + $0x600] ss:$16 sps:$4 sm:$0xff]  }
  0x32   :  { %v5006_v52 = vld [vmem:[%s7523_s1 + $0x5e4] ss:$16 sps:$4 sm:$0xff]   ;;  %v5004_v54 = vld [vmem:[%s7523_s1 + $0x5e0] ss:$16 sps:$4 sm:$0xff]  }
  0x33   :  { %3259 = vmatpush2.bf16.msra.mxu0 %v4936_v59  ;;  %v5009_v53 = vld [vmem:[%s7523_s1 + $0x7e4] ss:$16 sps:$4 sm:$0xff]   ;;  %v5007_v55 = vld [vmem:[%s7523_s1 + $0x7e0] ss:$16 sps:$4 sm:$0xff]  }
  0x34   :  { %3300 = vmatpush2.bf16.msra.mxu1 %v4937_v61  ;;  %3260 = vmatprep.subr.bf16.mxu0 %v4938_v62  ;;  %v5012_v56 = vld [vmem:[%s7523_s1 + $0x5c4] ss:$16 sps:$4 sm:$0xff]   ;;  %v5010_v58 = vld [vmem:[%s7523_s1 + $0x5c0] ss:$16 sps:$4 sm:$0xff]  }
  0x35   :  { %3301 = vmatprep.subr.bf16.mxu1 %v4940_v63  ;;  %v5015_v57 = vld [vmem:[%s7523_s1 + $0x7c4] ss:$16 sps:$4 sm:$0xff]   ;;  %v5013_v59 = vld [vmem:[%s7523_s1 + $0x7c0] ss:$16 sps:$4 sm:$0xff]  }
  0x36   :  { %v5018_v61 = vld [vmem:[%s7523_s1 + $0x5a4] ss:$16 sps:$4 sm:$0xff]   ;;  %v5016_v63 = vld [vmem:[%s7523_s1 + $0x5a0] ss:$16 sps:$4 sm:$0xff]  }
  0x37   :  { %3261 = vmatpush2.bf16.msra.mxu0 %v4942_v2  ;;  %v5021_v62 = vld [vmem:[%s7523_s1 + $0x7a4] ss:$16 sps:$4 sm:$0xff]   ;;  %v5019_v1 = vld [vmem:[%s7523_s1 + $0x7a0] ss:$16 sps:$4 sm:$0xff]  }
  0x38   :  { %3302 = vmatpush2.bf16.msra.mxu1 %v4943_v3  ;;  %3262 = vmatprep.subr.bf16.mxu0 %v4944_v4  ;;  %v5024_v2 = vld [vmem:[%s7523_s1 + $0x584] ss:$16 sps:$4 sm:$0xff]   ;;  %v5022_v4 = vld [vmem:[%s7523_s1 + $0x580] ss:$16 sps:$4 sm:$0xff]  }
  0x39   :  { %3303 = vmatprep.subr.bf16.mxu1 %v4946_v5  ;;  %v5027_v3 = vld [vmem:[%s7523_s1 + $0x784] ss:$16 sps:$4 sm:$0xff]   ;;  %v5025_v5 = vld [vmem:[%s7523_s1 + $0x780] ss:$16 sps:$4 sm:$0xff]  }
  0x3a   :  { %v5036_v11 = vld [vmem:[%s7523_s1 + $0x544] ss:$16 sps:$4 sm:$0xff]  }
  0x3b   :  { %3263 = vmatpush2.bf16.msra.mxu0 %v4948_v7  ;;  %v5030_v7 = vld [vmem:[%s7523_s1 + $0x564] ss:$16 sps:$4 sm:$0xff]  }
  0x3c   :  { %3304 = vmatpush2.bf16.msra.mxu1 %v4949_v8  ;;  %3264 = vmatprep.subr.bf16.mxu0 %v4950_v9  ;;  %v5033_v8 = vld [vmem:[%s7523_s1 + $0x764] ss:$16 sps:$4 sm:$0xff]   ;;  %v5028_v9 = vld [vmem:[%s7523_s1 + $0x560] ss:$16 sps:$4 sm:$0xff]  }
  0x3d   :  { %3305 = vmatprep.subr.bf16.mxu1 %v4952_v10  ;;  %v5031_v10 = vld [vmem:[%s7523_s1 + $0x760] ss:$16 sps:$4 sm:$0xff]  }
  0x3f   :  { %3265 = vmatpush2.bf16.msra.mxu0 %v4954_v12  ;;  %v5039_v12 = vld [vmem:[%s7523_s1 + $0x744] ss:$16 sps:$4 sm:$0xff]  }
  0x40   :  { %3306 = vmatpush2.bf16.msra.mxu1 %v4955_v14  ;;  %3316 = vmatprep.subr.bf16.mxu0 %v4958_v15  ;;  %v5034_v14 = vld [vmem:[%s7523_s1 + $0x540] ss:$16 sps:$4 sm:$0xff]  }
  0x41   :  { %3357 = vmatprep.subr.bf16.mxu1 %v4961_v16  ;;  %v5037_v15 = vld [vmem:[%s7523_s1 + $0x740] ss:$16 sps:$4 sm:$0xff]   ;;  %v5042_v16 = vld [vmem:[%s7523_s1 + $0x524] ss:$16 sps:$4 sm:$0xff]  }
  0x42   :  { %3267 = vmatmul.mubr.bf16.vlgmr.msra.gmra.mxu0 %v5934_v13 }
  0x43   :  { %3308 = vmatmul.mubr.bf16.vlgmr.msra.gmra.mxu1 %v5950_v18  ;;  %3317 = vmatpush1.bf16.msra.mxu0 %v4956_v19  ;;  %v5045_v19 = vld [vmem:[%s7523_s1 + $0x724] ss:$16 sps:$4 sm:$0xff]  }
  0x44   :  { %3358 = vmatpush1.bf16.msra.mxu1 %v4959_v20  ;;  %3318 = vmatprep.subr.bf16.mxu0 %v4964_v21  ;;  %v5040_v20 = vld [vmem:[%s7523_s1 + $0x520] ss:$16 sps:$4 sm:$0xff]  }
  0x45   :  { %3359 = vmatprep.subr.bf16.mxu1 %v4967_v22  ;;  %3348 = vmatprep.mubr.bf16.mxu0 %v5946_v17  ;;  %v5043_v21 = vld [vmem:[%s7523_s1 + $0x720] ss:$16 sps:$4 sm:$0xff]   ;;  %v5048_v22 = vld [vmem:[%s7523_s1 + $0x504] ss:$16 sps:$4 sm:$0xff]  }
  0x46   :  { %3389 = vmatprep.mubr.bf16.mxu1 %v5966_v23 }
  0x47   :  { %3319 = vmatpush1.bf16.msra.mxu0 %v4962_v24  ;;  %v5051_v24 = vld [vmem:[%s7523_s1 + $0x704] ss:$16 sps:$4 sm:$0xff]  }
  0x48   :  { %3360 = vmatpush1.bf16.msra.mxu1 %v4965_v25  ;;  %3320 = vmatprep.subr.bf16.mxu0 %v4970_v26  ;;  %v5046_v25 = vld [vmem:[%s7523_s1 + $0x500] ss:$16 sps:$4 sm:$0xff]   ;;  %v6145_v26 = vrot.slane %v5914_v6, %v5856_v49 }
  0x49   :  { %3361 = vmatprep.subr.bf16.mxu1 %v4973_v27  ;;  %v5049_v27 = vld [vmem:[%s7523_s1 + $0x700] ss:$16 sps:$4 sm:$0xff]  }
  0x4a   :  { %v6158_v6 = vcombine.high %v6145_v26, %v6145_v26 }
  0x4b   :  { %3321 = vmatpush1.bf16.msra.mxu0 %v4968_v28  ;;  %v5055_v28 = vld [vmem:[%s7523_s1 + $0x8e4] ss:$16 sps:$4 sm:$0xff]  }
  0x4c   :  { %3362 = vmatpush1.bf16.msra.mxu1 %v4971_v29  ;;  %3322 = vmatprep.subr.bf16.mxu0 %v4976_v30  ;;  %v5058_v29 = vld [vmem:[%s7523_s1 + $0xae4] ss:$16 sps:$4 sm:$0xff]   ;;  %v5053_v30 = vld [vmem:[%s7523_s1 + $0x8e0] ss:$16 sps:$4 sm:$0xff]  }
  0x4d   :  { %3363 = vmatprep.subr.bf16.mxu1 %v4979_v31  ;;  %v5056_v31 = vld [vmem:[%s7523_s1 + $0xae0] ss:$16 sps:$4 sm:$0xff]  }
  0x4f   :  { %3323 = vmatpush1.bf16.msra.mxu0 %v4974_v32  ;;  %v6169_v32 = vld [vmem:[%s7522_s0 + $0x8] sm:$0xff] }
  0x50   :  { %3364 = vmatpush1.bf16.msra.mxu1 %v4977_v33  ;;  %3324 = vmatprep.subr.bf16.mxu0 %v4982_v34  ;;  %v5061_v33 = vld [vmem:[%s7523_s1 + $0x8c4] ss:$16 sps:$4 sm:$0xff]  }
  0x51   :  { %3365 = vmatprep.subr.bf16.mxu1 %v4985_v35  ;;  %v5064_v34 = vld [vmem:[%s7523_s1 + $0xac4] ss:$16 sps:$4 sm:$0xff]   ;;  %v6179_v35 = vrot.slane %v6169_v32, %v5856_v49 }
  0x53   :  { %3325 = vmatpush1.bf16.msra.mxu0 %v4980_v36  ;;  %v624_v36 = vcombine.high %v6179_v35, %v6179_v35 }
  0x54   :  { %3366 = vmatpush1.bf16.msra.mxu1 %v4983_v37  ;;  %3326 = vmatprep.subr.bf16.mxu0 %v4988_v38  ;;  %v5059_v37 = vld [vmem:[%s7523_s1 + $0x8c0] ss:$16 sps:$4 sm:$0xff]  }
  0x55   :  { %3367 = vmatprep.subr.bf16.mxu1 %v4991_v39  ;;  %v5062_v38 = vld [vmem:[%s7523_s1 + $0xac0] ss:$16 sps:$4 sm:$0xff]   ;;  %v5067_v39 = vld [vmem:[%s7523_s1 + $0x8a4] ss:$16 sps:$4 sm:$0xff]  }
  0x57   :  { %3327 = vmatpush1.bf16.msra.mxu0 %v4986_v40  ;;  %v5070_v40 = vld [vmem:[%s7523_s1 + $0xaa4] ss:$16 sps:$4 sm:$0xff]  }
  0x58   :  { %3368 = vmatpush1.bf16.msra.mxu1 %v4989_v41  ;;  %3328 = vmatprep.subr.bf16.mxu0 %v4994_v43  ;;  %v6198_v41 = vrot.slane %v624_v36, %v5856_v49  ;;  %v5131_v36 = vld [vmem:[%s7523_s1 + $0x940] ss:$16 sps:$4 sm:$0xff]  }
  0x59   :  { %3369 = vmatprep.subr.bf16.mxu1 %v4997_v44  ;;  %v5065_v44 = vld [vmem:[%s7523_s1 + $0x8a0] ss:$16 sps:$4 sm:$0xff]  }
  0x5a   :  { %v6203_v43 = vcombine.high %v6198_v41, %v6198_v41 }
  0x5b   :  { %3329 = vmatpush1.bf16.msra.mxu0 %v4992_v45  ;;  %v5068_v45 = vld [vmem:[%s7523_s1 + $0xaa0] ss:$16 sps:$4 sm:$0xff]  }
  0x5c   :  { %3370 = vmatpush1.bf16.msra.mxu1 %v4995_v46  ;;  %3330 = vmatprep.subr.bf16.mxu0 %v5000_v47  ;;  %v5073_v46 = vld [vmem:[%s7523_s1 + $0x884] ss:$16 sps:$4 sm:$0xff]  }
  0x5d   :  { %3371 = vmatprep.subr.bf16.mxu1 %v5003_v48  ;;  %v5076_v47 = vld [vmem:[%s7523_s1 + $0xa84] ss:$16 sps:$4 sm:$0xff]   ;;  %v5071_v48 = vld [vmem:[%s7523_s1 + $0x880] ss:$16 sps:$4 sm:$0xff]  }
  0x5f   :  { %3331 = vmatpush1.bf16.msra.mxu0 %v4998_v50  ;;  %v5074_v50 = vld [vmem:[%s7523_s1 + $0xa80] ss:$16 sps:$4 sm:$0xff]  }
  0x60   :  { %3372 = vmatpush1.bf16.msra.mxu1 %v5001_v51  ;;  %3332 = vmatprep.subr.bf16.mxu0 %v5006_v52  ;;  %v5079_v51 = vld [vmem:[%s7523_s1 + $0x864] ss:$16 sps:$4 sm:$0xff]  }
  0x61   :  { %3373 = vmatprep.subr.bf16.mxu1 %v5009_v53  ;;  %v5082_v52 = vld [vmem:[%s7523_s1 + $0xa64] ss:$16 sps:$4 sm:$0xff]   ;;  %v5077_v53 = vld [vmem:[%s7523_s1 + $0x860] ss:$16 sps:$4 sm:$0xff]  }
  0x63   :  { %3333 = vmatpush2.bf16.msra.mxu0 %v5004_v54  ;;  %v5080_v54 = vld [vmem:[%s7523_s1 + $0xa60] ss:$16 sps:$4 sm:$0xff]  }
  0x64   :  { %3374 = vmatpush2.bf16.msra.mxu1 %v5007_v55  ;;  %3334 = vmatprep.subr.bf16.mxu0 %v5012_v56  ;;  %v5085_v55 = vld [vmem:[%s7523_s1 + $0x844] ss:$16 sps:$4 sm:$0xff]  }
  0x65   :  { %3375 = vmatprep.subr.bf16.mxu1 %v5015_v57  ;;  %v5088_v56 = vld [vmem:[%s7523_s1 + $0xa44] ss:$16 sps:$4 sm:$0xff]   ;;  %v5083_v57 = vld [vmem:[%s7523_s1 + $0x840] ss:$16 sps:$4 sm:$0xff]  }
  0x67   :  { %3335 = vmatpush2.bf16.msra.mxu0 %v5010_v58  ;;  %v5086_v58 = vld [vmem:[%s7523_s1 + $0xa40] ss:$16 sps:$4 sm:$0xff]  }
  0x68   :  { %3376 = vmatpush2.bf16.msra.mxu1 %v5013_v59  ;;  %3336 = vmatprep.subr.bf16.mxu0 %v5018_v61  ;;  %v5091_v59 = vld [vmem:[%s7523_s1 + $0x824] ss:$16 sps:$4 sm:$0xff]  }
  0x69   :  { %3377 = vmatprep.subr.bf16.mxu1 %v5021_v62  ;;  %v5094_v61 = vld [vmem:[%s7523_s1 + $0xa24] ss:$16 sps:$4 sm:$0xff]   ;;  %v5089_v62 = vld [vmem:[%s7523_s1 + $0x820] ss:$16 sps:$4 sm:$0xff]  }
  0x6b   :  { %3337 = vmatpush2.bf16.msra.mxu0 %v5016_v63  ;;  %v5092_v63 = vld [vmem:[%s7523_s1 + $0xa20] ss:$16 sps:$4 sm:$0xff]  }
  0x6c   :  { %3378 = vmatpush2.bf16.msra.mxu1 %v5019_v1  ;;  %3338 = vmatprep.subr.bf16.mxu0 %v5024_v2  ;;  %v5097_v1 = vld [vmem:[%s7523_s1 + $0x804] ss:$16 sps:$4 sm:$0xff]  }
  0x6d   :  { %3379 = vmatprep.subr.bf16.mxu1 %v5027_v3  ;;  %v5100_v2 = vld [vmem:[%s7523_s1 + $0xa04] ss:$16 sps:$4 sm:$0xff]   ;;  %v5095_v3 = vld [vmem:[%s7523_s1 + $0x800] ss:$16 sps:$4 sm:$0xff]  }
  0x6f   :  { %3339 = vmatpush2.bf16.msra.mxu0 %v5022_v4  ;;  %v5098_v4 = vld [vmem:[%s7523_s1 + $0xa00] ss:$16 sps:$4 sm:$0xff]  }
  0x70   :  { %3380 = vmatpush2.bf16.msra.mxu1 %v5025_v5  ;;  %3340 = vmatprep.subr.bf16.mxu0 %v5030_v7  ;;  %v5103_v5 = vld [vmem:[%s7523_s1 + $0x9e4] ss:$16 sps:$4 sm:$0xff]  }
  0x71   :  { %3381 = vmatprep.subr.bf16.mxu1 %v5033_v8  ;;  %v5106_v7 = vld [vmem:[%s7523_s1 + $0xbe4] ss:$16 sps:$4 sm:$0xff]   ;;  %v5101_v8 = vld [vmem:[%s7523_s1 + $0x9e0] ss:$16 sps:$4 sm:$0xff]  }
  0x73   :  { %3341 = vmatpush2.bf16.msra.mxu0 %v5028_v9  ;;  %v5104_v9 = vld [vmem:[%s7523_s1 + $0xbe0] ss:$16 sps:$4 sm:$0xff]  }
  0x74   :  { %3382 = vmatpush2.bf16.msra.mxu1 %v5031_v10  ;;  %3342 = vmatprep.subr.bf16.mxu0 %v5036_v11  ;;  %v5109_v10 = vld [vmem:[%s7523_s1 + $0x9c4] ss:$16 sps:$4 sm:$0xff]  }
  0x75   :  { %3383 = vmatprep.subr.bf16.mxu1 %v5039_v12  ;;  %v5112_v11 = vld [vmem:[%s7523_s1 + $0xbc4] ss:$16 sps:$4 sm:$0xff]   ;;  %v5107_v12 = vld [vmem:[%s7523_s1 + $0x9c0] ss:$16 sps:$4 sm:$0xff]  }
  0x77   :  { %3343 = vmatpush2.bf16.msra.mxu0 %v5034_v14  ;;  %v5110_v14 = vld [vmem:[%s7523_s1 + $0xbc0] ss:$16 sps:$4 sm:$0xff]  }
  0x78   :  { %3384 = vmatpush2.bf16.msra.mxu1 %v5037_v15  ;;  %3344 = vmatprep.subr.bf16.mxu0 %v5042_v16  ;;  %v5115_v15 = vld [vmem:[%s7523_s1 + $0x9a4] ss:$16 sps:$4 sm:$0xff]  }
  0x79   :  { %3385 = vmatprep.subr.bf16.mxu1 %v5045_v19  ;;  %v5118_v16 = vld [vmem:[%s7523_s1 + $0xba4] ss:$16 sps:$4 sm:$0xff]   ;;  %v5113_v19 = vld [vmem:[%s7523_s1 + $0x9a0] ss:$16 sps:$4 sm:$0xff]  }
  0x7b   :  { %3345 = vmatpush2.bf16.msra.mxu0 %v5040_v20  ;;  %v5116_v20 = vld [vmem:[%s7523_s1 + $0xba0] ss:$16 sps:$4 sm:$0xff]  }
  0x7c   :  { %3386 = vmatpush2.bf16.msra.mxu1 %v5043_v21  ;;  %3346 = vmatprep.subr.bf16.mxu0 %v5048_v22  ;;  %v5121_v21 = vld [vmem:[%s7523_s1 + $0x984] ss:$16 sps:$4 sm:$0xff]  }
  0x7d   :  { %3387 = vmatprep.subr.bf16.mxu1 %v5051_v24  ;;  %v5124_v22 = vld [vmem:[%s7523_s1 + $0xb84] ss:$16 sps:$4 sm:$0xff]   ;;  %v5119_v24 = vld [vmem:[%s7523_s1 + $0x980] ss:$16 sps:$4 sm:$0xff]  }
  0x7f   :  { %3347 = vmatpush2.bf16.msra.mxu0 %v5046_v25  ;;  %v5122_v25 = vld [vmem:[%s7523_s1 + $0xb80] ss:$16 sps:$4 sm:$0xff]  }
  0x80   :  { %3388 = vmatpush2.bf16.msra.mxu1 %v5049_v27  ;;  %3398 = vmatprep.subr.bf16.mxu0 %v5055_v28  ;;  %v5127_v27 = vld [vmem:[%s7523_s1 + $0x964] ss:$16 sps:$4 sm:$0xff]  }
  0x81   :  { %3439 = vmatprep.subr.bf16.mxu1 %v5058_v29  ;;  %v5130_v28 = vld [vmem:[%s7523_s1 + $0xb64] ss:$16 sps:$4 sm:$0xff]   ;;  %v5125_v29 = vld [vmem:[%s7523_s1 + $0x960] ss:$16 sps:$4 sm:$0xff]  }
  0x82   :  { %3349 = vmatmul.mubr.bf16.vlgmr.msra.gmra.mxu0 %v6145_v26 }
  0x83   :  { %3390 = vmatmul.mubr.bf16.vlgmr.msra.gmra.mxu1 %v6158_v6  ;;  %3399 = vmatpush1.bf16.msra.mxu0 %v5053_v30  ;;  %v5128_v30 = vld [vmem:[%s7523_s1 + $0xb60] ss:$16 sps:$4 sm:$0xff]  }
  0x84   :  { %3440 = vmatpush1.bf16.msra.mxu1 %v5056_v31  ;;  %3400 = vmatprep.subr.bf16.mxu0 %v5061_v33  ;;  %v5133_v31 = vld [vmem:[%s7523_s1 + $0x944] ss:$16 sps:$4 sm:$0xff]  }
  0x85   :  { %3441 = vmatprep.subr.bf16.mxu1 %v5064_v34  ;;  %3430 = vmatprep.mubr.bf16.mxu0 %v6198_v41  ;;  %v5136_v33 = vld [vmem:[%s7523_s1 + $0xb44] ss:$16 sps:$4 sm:$0xff]   ;;  %v609_v34 = vcombine.high %v6169_v32, %v6169_v32 }
  0x86   :  { %3471 = vmatprep.mubr.bf16.mxu1 %v6203_v43  ;;  %v5142_v32 = vld [vmem:[%s7523_s1 + $0xb24] ss:$16 sps:$4 sm:$0xff]  }
  0x87   :  { %3401 = vmatpush1.bf16.msra.mxu0 %v5059_v37  ;;  %v5134_v37 = vld [vmem:[%s7523_s1 + $0xb40] ss:$16 sps:$4 sm:$0xff]  }
  0x88   :  { %3442 = vmatpush1.bf16.msra.mxu1 %v5062_v38  ;;  %3402 = vmatprep.subr.bf16.mxu0 %v5067_v39  ;;  %v5139_v38 = vld [vmem:[%s7523_s1 + $0x924] ss:$16 sps:$4 sm:$0xff]   ;;  %v6353_v39 = vrot.slane %v609_v34, %v5856_v49  ;;  %v5200_v34 = vld [vmem:[%s7523_s1 + $0xfe0] ss:$16 sps:$4 sm:$0xff]  }
  0x89   :  { %3443 = vmatprep.subr.bf16.mxu1 %v5070_v40  ;;  %v5137_v40 = vld [vmem:[%s7523_s1 + $0x920] ss:$16 sps:$4 sm:$0xff]  }
  0x8b   :  { %3403 = vmatpush1.bf16.msra.mxu0 %v5065_v44  ;;  %v5140_v44 = vld [vmem:[%s7523_s1 + $0xb20] ss:$16 sps:$4 sm:$0xff]  }
  0x8c   :  { %3444 = vmatpush1.bf16.msra.mxu1 %v5068_v45  ;;  %3404 = vmatprep.subr.bf16.mxu0 %v5073_v46  ;;  %v5145_v45 = vld [vmem:[%s7523_s1 + $0x904] ss:$16 sps:$4 sm:$0xff]  }
  0x8d   :  { %3445 = vmatprep.subr.bf16.mxu1 %v5076_v47  ;;  %v5148_v46 = vld [vmem:[%s7523_s1 + $0xb04] ss:$16 sps:$4 sm:$0xff]   ;;  %v625_v47 = vcombine.high %v6353_v39, %v6353_v39 }
  0x8f   :  { %3405 = vmatpush1.bf16.msra.mxu0 %v5071_v48  ;;  %v5143_v48 = vld [vmem:[%s7523_s1 + $0x900] ss:$16 sps:$4 sm:$0xff]  }
  0x90   :  { %3446 = vmatpush1.bf16.msra.mxu1 %v5074_v50  ;;  %3406 = vmatprep.subr.bf16.mxu0 %v5079_v51  ;;  %v6374_v50 = vrot.slane %v6179_v35, %v5856_v49  ;;  %v5146_v51 = vld [vmem:[%s7523_s1 + $0xb00] ss:$16 sps:$4 sm:$0xff]  }
  0x91   :  { %3447 = vmatprep.subr.bf16.mxu1 %v5082_v52  ;;  %v5151_v52 = vld [vmem:[%s7523_s1 + $0xce4] ss:$16 sps:$4 sm:$0xff]  }
  0x92   :  { %v6390_v35 = vcombine.high %v6374_v50, %v6374_v50 }
  0x93   :  { %3407 = vmatpush1.bf16.msra.mxu0 %v5077_v53  ;;  %v5154_v53 = vld [vmem:[%s7523_s1 + $0xee4] ss:$16 sps:$4 sm:$0xff]  }
  0x94   :  { %3448 = vmatpush1.bf16.msra.mxu1 %v5080_v54  ;;  %3408 = vmatprep.subr.bf16.mxu0 %v5085_v55  ;;  %v6386_v54 = vrot.slane %v625_v47, %v5856_v49  ;;  %v5149_v55 = vld [vmem:[%s7523_s1 + $0xce0] ss:$16 sps:$4 sm:$0xff]   ;;  %v5217_v47 = vld [vmem:[%s7523_s1 + $0xd84] ss:$16 sps:$4 sm:$0xff]  }
  0x95   :  { %3449 = vmatprep.subr.bf16.mxu1 %v5088_v56  ;;  %v5152_v56 = vld [vmem:[%s7523_s1 + $0xee0] ss:$16 sps:$4 sm:$0xff]  }
  0x97   :  { %3409 = vmatpush1.bf16.msra.mxu0 %v5083_v57  ;;  %v5157_v57 = vld [vmem:[%s7523_s1 + $0xcc4] ss:$16 sps:$4 sm:$0xff]  }
  0x98   :  { %3450 = vmatpush1.bf16.msra.mxu1 %v5086_v58  ;;  %3410 = vmatprep.subr.bf16.mxu0 %v5091_v59  ;;  %v5160_v58 = vld [vmem:[%s7523_s1 + $0xec4] ss:$16 sps:$4 sm:$0xff]   ;;  %v6406_v59 = vcombine.high %v6386_v54, %v6386_v54 }
  0x99   :  { %3451 = vmatprep.subr.bf16.mxu1 %v5094_v61  ;;  %v5155_v61 = vld [vmem:[%s7523_s1 + $0xcc0] ss:$16 sps:$4 sm:$0xff]  }
  0x9b   :  { %3411 = vmatpush1.bf16.msra.mxu0 %v5089_v62  ;;  %v5158_v62 = vld [vmem:[%s7523_s1 + $0xec0] ss:$16 sps:$4 sm:$0xff]  }
  0x9c   :  { %3452 = vmatpush1.bf16.msra.mxu1 %v5092_v63  ;;  %3412 = vmatprep.subr.bf16.mxu0 %v5097_v1  ;;  %v5163_v63 = vld [vmem:[%s7523_s1 + $0xca4] ss:$16 sps:$4 sm:$0xff]  }
  0x9d   :  { %3453 = vmatprep.subr.bf16.mxu1 %v5100_v2  ;;  %v5166_v1 = vld [vmem:[%s7523_s1 + $0xea4] ss:$16 sps:$4 sm:$0xff]   ;;  %v5161_v2 = vld [vmem:[%s7523_s1 + $0xca0] ss:$16 sps:$4 sm:$0xff]  }
  0x9f   :  { %3413 = vmatpush1.bf16.msra.mxu0 %v5095_v3  ;;  %v5164_v3 = vld [vmem:[%s7523_s1 + $0xea0] ss:$16 sps:$4 sm:$0xff]  }
  0xa0   :  { %3454 = vmatpush1.bf16.msra.mxu1 %v5098_v4  ;;  %3414 = vmatprep.subr.bf16.mxu0 %v5103_v5  ;;  %v5169_v4 = vld [vmem:[%s7523_s1 + $0xc84] ss:$16 sps:$4 sm:$0xff]  }
  0xa1   :  { %3455 = vmatprep.subr.bf16.mxu1 %v5106_v7  ;;  %v5172_v5 = vld [vmem:[%s7523_s1 + $0xe84] ss:$16 sps:$4 sm:$0xff]   ;;  %v5167_v7 = vld [vmem:[%s7523_s1 + $0xc80] ss:$16 sps:$4 sm:$0xff]  }
  0xa3   :  { %3415 = vmatpush2.bf16.msra.mxu0 %v5101_v8  ;;  %v5170_v8 = vld [vmem:[%s7523_s1 + $0xe80] ss:$16 sps:$4 sm:$0xff]  }
  0xa4   :  { %3456 = vmatpush2.bf16.msra.mxu1 %v5104_v9  ;;  %3416 = vmatprep.subr.bf16.mxu0 %v5109_v10  ;;  %v5175_v9 = vld [vmem:[%s7523_s1 + $0xc64] ss:$16 sps:$4 sm:$0xff]  }
  0xa5   :  { %3457 = vmatprep.subr.bf16.mxu1 %v5112_v11  ;;  %v5178_v10 = vld [vmem:[%s7523_s1 + $0xe64] ss:$16 sps:$4 sm:$0xff]   ;;  %v5173_v11 = vld [vmem:[%s7523_s1 + $0xc60] ss:$16 sps:$4 sm:$0xff]  }
  0xa7   :  { %3417 = vmatpush2.bf16.msra.mxu0 %v5107_v12  ;;  %v5176_v12 = vld [vmem:[%s7523_s1 + $0xe60] ss:$16 sps:$4 sm:$0xff]  }
  0xa8   :  { %3458 = vmatpush2.bf16.msra.mxu1 %v5110_v14  ;;  %3418 = vmatprep.subr.bf16.mxu0 %v5115_v15  ;;  %v5181_v14 = vld [vmem:[%s7523_s1 + $0xc44] ss:$16 sps:$4 sm:$0xff]  }
  0xa9   :  { %3459 = vmatprep.subr.bf16.mxu1 %v5118_v16  ;;  %v5184_v15 = vld [vmem:[%s7523_s1 + $0xe44] ss:$16 sps:$4 sm:$0xff]   ;;  %v5179_v16 = vld [vmem:[%s7523_s1 + $0xc40] ss:$16 sps:$4 sm:$0xff]  }
  0xab   :  { %3419 = vmatpush2.bf16.msra.mxu0 %v5113_v19  ;;  %v5182_v19 = vld [vmem:[%s7523_s1 + $0xe40] ss:$16 sps:$4 sm:$0xff]  }
  0xac   :  { %3460 = vmatpush2.bf16.msra.mxu1 %v5116_v20  ;;  %3420 = vmatprep.subr.bf16.mxu0 %v5121_v21  ;;  %v5187_v20 = vld [vmem:[%s7523_s1 + $0xc24] ss:$16 sps:$4 sm:$0xff]  }
  0xad   :  { %3461 = vmatprep.subr.bf16.mxu1 %v5124_v22  ;;  %v5190_v21 = vld [vmem:[%s7523_s1 + $0xe24] ss:$16 sps:$4 sm:$0xff]   ;;  %v5185_v22 = vld [vmem:[%s7523_s1 + $0xc20] ss:$16 sps:$4 sm:$0xff]  }
  0xaf   :  { %3421 = vmatpush2.bf16.msra.mxu0 %v5119_v24  ;;  %v5188_v24 = vld [vmem:[%s7523_s1 + $0xe20] ss:$16 sps:$4 sm:$0xff]  }
  0xb0   :  { %3462 = vmatpush2.bf16.msra.mxu1 %v5122_v25  ;;  %3422 = vmatprep.subr.bf16.mxu0 %v5127_v27  ;;  %v5193_v25 = vld [vmem:[%s7523_s1 + $0xc04] ss:$16 sps:$4 sm:$0xff]  }
  0xb1   :  { %3463 = vmatprep.subr.bf16.mxu1 %v5130_v28  ;;  %v5196_v27 = vld [vmem:[%s7523_s1 + $0xe04] ss:$16 sps:$4 sm:$0xff]   ;;  %v5191_v28 = vld [vmem:[%s7523_s1 + $0xc00] ss:$16 sps:$4 sm:$0xff]  }
  0xb3   :  { %3423 = vmatpush2.bf16.msra.mxu0 %v5125_v29  ;;  %v5194_v29 = vld [vmem:[%s7523_s1 + $0xe00] ss:$16 sps:$4 sm:$0xff]  }
  0xb4   :  { %3464 = vmatpush2.bf16.msra.mxu1 %v5128_v30  ;;  %3424 = vmatprep.subr.bf16.mxu0 %v5133_v31  ;;  %v5199_v30 = vld [vmem:[%s7523_s1 + $0xde4] ss:$16 sps:$4 sm:$0xff]  }
  0xb5   :  { %3465 = vmatprep.subr.bf16.mxu1 %v5136_v33  ;;  %v5202_v31 = vld [vmem:[%s7523_s1 + $0xfe4] ss:$16 sps:$4 sm:$0xff]   ;;  %v5197_v33 = vld [vmem:[%s7523_s1 + $0xde0] ss:$16 sps:$4 sm:$0xff]  }
  0xb7   :  { %3425 = vmatpush2.bf16.msra.mxu0 %v5131_v36  ;;  %v5205_v36 = vld [vmem:[%s7523_s1 + $0xdc4] ss:$16 sps:$4 sm:$0xff]  }
  0xb8   :  { %3466 = vmatpush2.bf16.msra.mxu1 %v5134_v37  ;;  %3426 = vmatprep.subr.bf16.mxu0 %v5139_v38  ;;  %v5208_v37 = vld [vmem:[%s7523_s1 + $0xfc4] ss:$16 sps:$4 sm:$0xff]   ;;  %v5203_v38 = vld [vmem:[%s7523_s1 + $0xdc0] ss:$16 sps:$4 sm:$0xff]  }
  0xb9   :  { %3467 = vmatprep.subr.bf16.mxu1 %v5142_v32  ;;  %v5206_v32 = vld [vmem:[%s7523_s1 + $0xfc0] ss:$16 sps:$4 sm:$0xff]  }
  0xbb   :  { %3427 = vmatpush2.bf16.msra.mxu0 %v5137_v40  ;;  %v5211_v40 = vld [vmem:[%s7523_s1 + $0xda4] ss:$16 sps:$4 sm:$0xff]  }
  0xbc   :  { %3468 = vmatpush2.bf16.msra.mxu1 %v5140_v44  ;;  %3428 = vmatprep.subr.bf16.mxu0 %v5145_v45  ;;  %v5214_v44 = vld [vmem:[%s7523_s1 + $0xfa4] ss:$16 sps:$4 sm:$0xff]   ;;  %v5209_v45 = vld [vmem:[%s7523_s1 + $0xda0] ss:$16 sps:$4 sm:$0xff]  }
  0xbd   :  { %3469 = vmatprep.subr.bf16.mxu1 %v5148_v46  ;;  %v5212_v46 = vld [vmem:[%s7523_s1 + $0xfa0] ss:$16 sps:$4 sm:$0xff]  }
  0xbf   :  { %3429 = vmatpush2.bf16.msra.mxu0 %v5143_v48  ;;  %v5220_v48 = vld [vmem:[%s7523_s1 + $0xf84] ss:$16 sps:$4 sm:$0xff]  }
  0xc0   :  { %3470 = vmatpush2.bf16.msra.mxu1 %v5146_v51  ;;  %3480 = vmatprep.subr.bf16.mxu0 %v5151_v52  ;;  %v5215_v51 = vld [vmem:[%s7523_s1 + $0xd80] ss:$16 sps:$4 sm:$0xff]  }
  0xc1   :  { %3521 = vmatprep.subr.bf16.mxu1 %v5154_v53  ;;  %v5218_v52 = vld [vmem:[%s7523_s1 + $0xf80] ss:$16 sps:$4 sm:$0xff]   ;;  %v5223_v53 = vld [vmem:[%s7523_s1 + $0xd64] ss:$16 sps:$4 sm:$0xff]  }
  0xc2   :  { %3431 = vmatmul.mubr.bf16.vlgmr.msra.gmra.mxu0 %v6374_v50 }
  0xc3   :  { %3472 = vmatmul.mubr.bf16.vlgmr.msra.gmra.mxu1 %v6390_v35  ;;  %3481 = vmatpush1.bf16.msra.mxu0 %v5149_v55  ;;  %v5226_v55 = vld [vmem:[%s7523_s1 + $0xf64] ss:$16 sps:$4 sm:$0xff]  }
  0xc4   :  { %3522 = vmatpush1.bf16.msra.mxu1 %v5152_v56  ;;  %3482 = vmatprep.subr.bf16.mxu0 %v5157_v57  ;;  %v5221_v56 = vld [vmem:[%s7523_s1 + $0xd60] ss:$16 sps:$4 sm:$0xff]  }
  0xc5   :  { %3523 = vmatprep.subr.bf16.mxu1 %v5160_v58  ;;  %3512 = vmatprep.mubr.bf16.mxu0 %v6386_v54  ;;  %v5224_v57 = vld [vmem:[%s7523_s1 + $0xf60] ss:$16 sps:$4 sm:$0xff]   ;;  %v5229_v58 = vld [vmem:[%s7523_s1 + $0xd44] ss:$16 sps:$4 sm:$0xff]  }
  0xc6   :  { %3553 = vmatprep.mubr.bf16.mxu1 %v6406_v59 }
  0xc7   :  { %3483 = vmatpush1.bf16.msra.mxu0 %v5155_v61  ;;  %v5232_v61 = vld [vmem:[%s7523_s1 + $0xf44] ss:$16 sps:$4 sm:$0xff]  }
  0xc8   :  { %3524 = vmatpush1.bf16.msra.mxu1 %v5158_v62  ;;  %3484 = vmatprep.subr.bf16.mxu0 %v5163_v63  ;;  %v5227_v62 = vld [vmem:[%s7523_s1 + $0xd40] ss:$16 sps:$4 sm:$0xff]  }
  0xc9   :  { %3525 = vmatprep.subr.bf16.mxu1 %v5166_v1  ;;  %v5230_v63 = vld [vmem:[%s7523_s1 + $0xf40] ss:$16 sps:$4 sm:$0xff]   ;;  %v5235_v1 = vld [vmem:[%s7523_s1 + $0xd24] ss:$16 sps:$4 sm:$0xff]  }
  0xcb   :  { %3485 = vmatpush1.bf16.msra.mxu0 %v5161_v2  ;;  %v5238_v2 = vld [vmem:[%s7523_s1 + $0xf24] ss:$16 sps:$4 sm:$0xff]  }
  0xcc   :  { %3526 = vmatpush1.bf16.msra.mxu1 %v5164_v3  ;;  %3486 = vmatprep.subr.bf16.mxu0 %v5169_v4  ;;  %v5233_v3 = vld [vmem:[%s7523_s1 + $0xd20] ss:$16 sps:$4 sm:$0xff]  }
  0xcd   :  { %3527 = vmatprep.subr.bf16.mxu1 %v5172_v5  ;;  %v5236_v4 = vld [vmem:[%s7523_s1 + $0xf20] ss:$16 sps:$4 sm:$0xff]   ;;  %v5241_v5 = vld [vmem:[%s7523_s1 + $0xd04] ss:$16 sps:$4 sm:$0xff]  }
  0xcf   :  { %3487 = vmatpush1.bf16.msra.mxu0 %v5167_v7  ;;  %v5244_v7 = vld [vmem:[%s7523_s1 + $0xf04] ss:$16 sps:$4 sm:$0xff]  }
  0xd0   :  { %3528 = vmatpush1.bf16.msra.mxu1 %v5170_v8  ;;  %3488 = vmatprep.subr.bf16.mxu0 %v5175_v9  ;;  %v5239_v8 = vld [vmem:[%s7523_s1 + $0xd00] ss:$16 sps:$4 sm:$0xff]  }
  0xd1   :  { %3529 = vmatprep.subr.bf16.mxu1 %v5178_v10  ;;  %v5242_v9 = vld [vmem:[%s7523_s1 + $0xf00] ss:$16 sps:$4 sm:$0xff]   ;;  %v6588_v10 = vrot.slane %v6353_v39, %v5856_v49  ;;  %v544_v49 = vsub.s32 1, %v5838_v42 }
  0xd3   :  { %3489 = vmatpush1.bf16.msra.mxu0 %v5173_v11  ;;  %v536_v11 = vld [vmem:[%s7524_s2] sm:$0xf]  ;;  %v6603_v39 = vcombine.high %v6588_v10, %v6588_v10 }
  0xd4   :  { %3530 = vmatpush1.bf16.msra.mxu1 %v5176_v12  ;;  %3490 = vmatprep.subr.bf16.mxu0 %v5181_v14  ;;  %v540_v12 = vsub.s32 0, %v5838_v42  ;;  %v5248_v14 = vld [vmem:[%s7523_s1 + $0xec] ss:$16 sps:$4 sm:$0xff]  }
  0xd5   :  { %3531 = vmatprep.subr.bf16.mxu1 %v5184_v15  ;;  %v5251_v15 = vld [vmem:[%s7523_s1 + $0x2ec] ss:$16 sps:$4 sm:$0xff]  }
  0xd7   :  { %3491 = vmatpush1.bf16.msra.mxu0 %v5179_v16  ;;  %v5246_v16 = vld [vmem:[%s7523_s1 + $0xe8] ss:$16 sps:$4 sm:$0xff]  }
  0xd8   :  { %3532 = vmatpush1.bf16.msra.mxu1 %v5182_v19  ;;  %3492 = vmatprep.subr.bf16.mxu0 %v5187_v20  ;;  %v541_v19 = vrot.slane %v536_v11, %v540_v12  ;;  %v5249_v20 = vld [vmem:[%s7523_s1 + $0x2e8] ss:$16 sps:$4 sm:$0xff]   ;;  %v5299_v12 = vld [vmem:[%s7523_s1 + $0x3ec] ss:$16 sps:$4 sm:$0xff]  }
  0xd9   :  { %3533 = vmatprep.subr.bf16.mxu1 %v5190_v21  ;;  %v5254_v21 = vld [vmem:[%s7523_s1 + $0xcc] ss:$16 sps:$4 sm:$0xff]  }
  0xdb   :  { %3493 = vmatpush1.bf16.msra.mxu0 %v5185_v22  ;;  %v5257_v22 = vld [vmem:[%s7523_s1 + $0x2cc] ss:$16 sps:$4 sm:$0xff]  }
  0xdc   :  { %3534 = vmatpush1.bf16.msra.mxu1 %v5188_v24  ;;  %3494 = vmatprep.subr.bf16.mxu0 %v5193_v25  ;;  %v545_v24 = vrot.slane %v536_v11, %v544_v49  ;;  %v5296_v11 = vld [vmem:[%s7523_s1 + $0x1ec] ss:$16 sps:$4 sm:$0xff]  }
  0xdd   :  { %3535 = vmatprep.subr.bf16.mxu1 %v5196_v27  ;;  %v5302_v49 = vld [vmem:[%s7523_s1 + $0x1cc] ss:$16 sps:$4 sm:$0xff]  }
  0xdf   :  { %3495 = vmatpush1.bf16.msra.mxu0 %v5191_v28  ;;  %v5252_v28 = vld [vmem:[%s7523_s1 + $0xc8] ss:$16 sps:$4 sm:$0xff]  }
  0xe0   :  { %3536 = vmatpush1.bf16.msra.mxu1 %v5194_v29  ;;  %3496 = vmatprep.subr.bf16.mxu0 %v5199_v30  ;;  %v5255_v29 = vld [vmem:[%s7523_s1 + $0x2c8] ss:$16 sps:$4 sm:$0xff]  }
  0xe1   :  { %3537 = vmatprep.subr.bf16.mxu1 %v5202_v31 }
  0xe3   :  { %3497 = vmatpush2.bf16.msra.mxu0 %v5197_v33 }
  0xe4   :  { %3538 = vmatpush2.bf16.msra.mxu1 %v5200_v34  ;;  %3498 = vmatprep.subr.bf16.mxu0 %v5205_v36  ;;  %v5260_v34 = vld [vmem:[%s7523_s1 + $0xac] ss:$16 sps:$4 sm:$0xff]  }
  0xe5   :  { %3539 = vmatprep.subr.bf16.mxu1 %v5208_v37  ;;  %v5263_v36 = vld [vmem:[%s7523_s1 + $0x2ac] ss:$16 sps:$4 sm:$0xff]  }
  0xe7   :  { %3499 = vmatpush2.bf16.msra.mxu0 %v5203_v38 }
  0xe8   :  { %3540 = vmatpush2.bf16.msra.mxu1 %v5206_v32  ;;  %3500 = vmatprep.subr.bf16.mxu0 %v5211_v40  ;;  %v5258_v32 = vld [vmem:[%s7523_s1 + $0xa8] ss:$16 sps:$4 sm:$0xff]  }
  0xe9   :  { %3541 = vmatprep.subr.bf16.mxu1 %v5214_v44  ;;  %v5261_v40 = vld [vmem:[%s7523_s1 + $0x2a8] ss:$16 sps:$4 sm:$0xff]  }
  0xeb   :  { %3501 = vmatpush2.bf16.msra.mxu0 %v5209_v45 }
  0xec   :  { %3542 = vmatpush2.bf16.msra.mxu1 %v5212_v46  ;;  %3502 = vmatprep.subr.bf16.mxu0 %v5217_v47 }
  0xed   :  { %3543 = vmatprep.subr.bf16.mxu1 %v5220_v48 }
  0xef   :  { %3503 = vmatpush2.bf16.msra.mxu0 %v5215_v51  ;;  %v5266_v51 = vld [vmem:[%s7523_s1 + $0x8c] ss:$16 sps:$4 sm:$0xff]  }
  0xf0   :  { %3544 = vmatpush2.bf16.msra.mxu1 %v5218_v52  ;;  %3504 = vmatprep.subr.bf16.mxu0 %v5223_v53  ;;  %v5267_v52 = vld [vmem:[%s7523_s1 + $0x288] ss:$16 sps:$4 sm:$0xff]   ;;  %v5272_v53 = vld [vmem:[%s7523_s1 + $0x6c] ss:$16 sps:$4 sm:$0xff]  }
  0xf1   :  { %3545 = vmatprep.subr.bf16.mxu1 %v5226_v55  ;;  %v5275_v55 = vld [vmem:[%s7523_s1 + $0x26c] ss:$16 sps:$4 sm:$0xff]  }
  0xf3   :  { %3505 = vmatpush2.bf16.msra.mxu0 %v5221_v56  ;;  %v5270_v56 = vld [vmem:[%s7523_s1 + $0x68] ss:$16 sps:$4 sm:$0xff]  }
  0xf4   :  { %3546 = vmatpush2.bf16.msra.mxu1 %v5224_v57  ;;  %3506 = vmatprep.subr.bf16.mxu0 %v5229_v58  ;;  %v5273_v57 = vld [vmem:[%s7523_s1 + $0x268] ss:$16 sps:$4 sm:$0xff]   ;;  %v5278_v58 = vld [vmem:[%s7523_s1 + $0x4c] ss:$16 sps:$4 sm:$0xff]  }
  0xf5   :  { %3547 = vmatprep.subr.bf16.mxu1 %v5232_v61  ;;  %v5281_v61 = vld [vmem:[%s7523_s1 + $0x24c] ss:$16 sps:$4 sm:$0xff]  }
  0xf7   :  { %3507 = vmatpush2.bf16.msra.mxu0 %v5227_v62  ;;  %v5276_v62 = vld [vmem:[%s7523_s1 + $0x48] ss:$16 sps:$4 sm:$0xff]  }
  0xf8   :  { %3548 = vmatpush2.bf16.msra.mxu1 %v5230_v63  ;;  %3508 = vmatprep.subr.bf16.mxu0 %v5235_v1  ;;  %v5279_v63 = vld [vmem:[%s7523_s1 + $0x248] ss:$16 sps:$4 sm:$0xff]   ;;  %v5284_v1 = vld [vmem:[%s7523_s1 + $0x2c] ss:$16 sps:$4 sm:$0xff]  }
  0xf9   :  { %3549 = vmatprep.subr.bf16.mxu1 %v5238_v2  ;;  %v5287_v2 = vld [vmem:[%s7523_s1 + $0x22c] ss:$16 sps:$4 sm:$0xff]  }
  0xfb   :  { %3509 = vmatpush2.bf16.msra.mxu0 %v5233_v3  ;;  %v5282_v3 = vld [vmem:[%s7523_s1 + $0x28] ss:$16 sps:$4 sm:$0xff]  }
  0xfc   :  { %3550 = vmatpush2.bf16.msra.mxu1 %v5236_v4  ;;  %3510 = vmatprep.subr.bf16.mxu0 %v5241_v5  ;;  %v5285_v4 = vld [vmem:[%s7523_s1 + $0x228] ss:$16 sps:$4 sm:$0xff]   ;;  %v5290_v5 = vld [vmem:[%s7523_s1 + $0xc] ss:$16 sps:$4 sm:$0xff]  }
  0xfd   :  { %3551 = vmatprep.subr.bf16.mxu1 %v5244_v7  ;;  %v5293_v7 = vld [vmem:[%s7523_s1 + $0x20c] ss:$16 sps:$4 sm:$0xff]  }
  0xff   :  { %3511 = vmatpush2.bf16.msra.mxu0 %v5239_v8  ;;  %v5288_v8 = vld [vmem:[%s7523_s1 + $0x8] ss:$16 sps:$4 sm:$0xff]  }
 0x100   :  { %3552 = vmatpush2.bf16.msra.mxu1 %v5242_v9  ;;  %3562 = vmatprep.subr.bf16.mxu0 %v5248_v14  ;;  %v5291_v9 = vld [vmem:[%s7523_s1 + $0x208] ss:$16 sps:$4 sm:$0xff]  }
 0x101   :  { %3603 = vmatprep.subr.bf16.mxu1 %v5251_v15  ;;  %v5294_v14 = vld [vmem:[%s7523_s1 + $0x1e8] ss:$16 sps:$4 sm:$0xff]  }
 0x102   :  { %v3268_v25 = vpop.f32.mrf.mxu0  ;;  %3513 = vmatmul.mubr.bf16.vlgmr.msra.gmra.mxu0 %v6588_v10  ;;  %v5297_v15 = vld [vmem:[%s7523_s1 + $0x3e8] ss:$16 sps:$4 sm:$0xff]  }
 0x103   :  { %v3309_v27 = vpop.f32.mrf.mxu1  ;;  %3554 = vmatmul.mubr.bf16.vlgmr.msra.gmra.mxu1 %v6603_v39  ;;  %v3269_v30 = vadd.f32 %v3268_v25, %v541_v19  ;;  %3563 = vmatpush1.bf16.msra.mxu0 %v5246_v16  ;;  %v5305_v16 = vld [vmem:[%s7523_s1 + $0x3cc] ss:$16 sps:$4 sm:$0xff]   ;;  %v5300_v19 = vld [vmem:[%s7523_s1 + $0x1c8] ss:$16 sps:$4 sm:$0xff]  }
 0x104   :  { %3604 = vmatpush1.bf16.msra.mxu1 %v5249_v20  ;;  %v3270_v31 = vpop.f32.mrf.mxu0  ;;  %3564 = vmatprep.subr.bf16.mxu0 %v5254_v21  ;;  %v5303_v20 = vld [vmem:[%s7523_s1 + $0x3c8] ss:$16 sps:$4 sm:$0xff]   ;;  %v5308_v21 = vld [vmem:[%s7523_s1 + $0x1ac] ss:$16 sps:$4 sm:$0xff]  }
 0x105   :  { %v3311_v33 = vpop.f32.mrf.mxu1  ;;  %3605 = vmatprep.subr.bf16.mxu1 %v5257_v22  ;;  %v6631_v37 = vadd.f32 %v3309_v27, %v3269_v30  ;;  %v3271_v38 = vadd.f32 %v3270_v31, %v545_v24  ;;  %3594 = vmatprep.mubr.bf16.mxu0 %v5884_v60  ;;  %v5269_v60 = vld [vmem:[%s7523_s1 + $0x28c] ss:$16 sps:$4 sm:$0xff]   ;;  %v5306_v24 = vld [vmem:[%s7523_s1 + $0x1a8] ss:$16 sps:$4 sm:$0xff]  }
 0x106   :  { %3635 = vmatprep.mubr.bf16.mxu1 %v5897_v0  ;;  %v3272_v44 = vpop.f32.mrf.mxu0  ;;  %v5264_v0 = vld [vmem:[%s7523_s1 + $0x88] ss:$16 sps:$4 sm:$0xff]   ;;  %v5311_v22 = vld [vmem:[%s7523_s1 + $0x3ac] ss:$16 sps:$4 sm:$0xff]  }
 0x107   :  { %v3313_v45 = vpop.f32.mrf.mxu1  ;;  %v6641_v46 = vadd.f32 %v3311_v33, %v3271_v38  ;;  %3565 = vmatpush1.bf16.msra.mxu0 %v5252_v28  ;;  %v5309_v25 = vld [vmem:[%s7523_s1 + $0x3a8] ss:$16 sps:$4 sm:$0xff]   ;;  %v5314_v27 = vld [vmem:[%s7523_s1 + $0x18c] ss:$16 sps:$4 sm:$0xff]  }
 0x108   :  { %3606 = vmatpush1.bf16.msra.mxu1 %v5255_v29  ;;  %v3273_v47 = vpop.f32.mrf.mxu0  ;;  %3566 = vmatprep.subr.bf16.mxu0 %v5260_v34  ;;  %v5317_v28 = vld [vmem:[%s7523_s1 + $0x38c] ss:$16 sps:$4 sm:$0xff]   ;;  %v5312_v29 = vld [vmem:[%s7523_s1 + $0x188] ss:$16 sps:$4 sm:$0xff]  }
 0x109   :  { %v3314_v48 = vpop.f32.mrf.mxu1  ;;  %3607 = vmatprep.subr.bf16.mxu1 %v5263_v36  ;;  %v5315_v30 = vld [vmem:[%s7523_s1 + $0x388] ss:$16 sps:$4 sm:$0xff]   ;;  %v5320_v31 = vld [vmem:[%s7523_s1 + $0x16c] ss:$16 sps:$4 sm:$0xff]  }
 0x10a   :  { %v5323_v33 = vld [vmem:[%s7523_s1 + $0x36c] ss:$16 sps:$4 sm:$0xff]   ;;  %v5318_v34 = vld [vmem:[%s7523_s1 + $0x168] ss:$16 sps:$4 sm:$0xff]  }
 0x10b   :  { %3567 = vmatpush1.bf16.msra.mxu0 %v5258_v32  ;;  %v5321_v36 = vld [vmem:[%s7523_s1 + $0x368] ss:$16 sps:$4 sm:$0xff]   ;;  %v5326_v38 = vld [vmem:[%s7523_s1 + $0x14c] ss:$16 sps:$4 sm:$0xff]  }
 0x10c   :  { %3608 = vmatpush1.bf16.msra.mxu1 %v5261_v40  ;;  %3568 = vmatprep.subr.bf16.mxu0 %v5266_v51  ;;  %v5329_v32 = vld [vmem:[%s7523_s1 + $0x34c] ss:$16 sps:$4 sm:$0xff]   ;;  %v5324_v40 = vld [vmem:[%s7523_s1 + $0x148] ss:$16 sps:$4 sm:$0xff]  }
 0x10d   :  { %3609 = vmatprep.subr.bf16.mxu1 %v5269_v60  ;;  %v5327_v44 = vld [vmem:[%s7523_s1 + $0x348] ss:$16 sps:$4 sm:$0xff]   ;;  %v5332_v45 = vld [vmem:[%s7523_s1 + $0x12c] ss:$16 sps:$4 sm:$0xff]  }
 0x10e   :  { %v5335_v47 = vld [vmem:[%s7523_s1 + $0x32c] ss:$16 sps:$4 sm:$0xff]   ;;  %v5330_v48 = vld [vmem:[%s7523_s1 + $0x128] ss:$16 sps:$4 sm:$0xff]  }
 0x10f   :  { %3569 = vmatpush1.bf16.msra.mxu0 %v5264_v0  ;;  %v5333_v51 = vld [vmem:[%s7523_s1 + $0x328] ss:$16 sps:$4 sm:$0xff]   ;;  %v5338_v60 = vld [vmem:[%s7523_s1 + $0x10c] ss:$16 sps:$4 sm:$0xff]  }
 0x110   :  { %3610 = vmatpush1.bf16.msra.mxu1 %v5267_v52  ;;  %3570 = vmatprep.subr.bf16.mxu0 %v5272_v53  ;;  %v5341_v0 = vld [vmem:[%s7523_s1 + $0x30c] ss:$16 sps:$4 sm:$0xff]   ;;  %v5336_v52 = vld [vmem:[%s7523_s1 + $0x108] ss:$16 sps:$4 sm:$0xff]  }
 0x111   :  { %3611 = vmatprep.subr.bf16.mxu1 %v5275_v55  ;;  %v5339_v53 = vld [vmem:[%s7523_s1 + $0x308] ss:$16 sps:$4 sm:$0xff]   ;;  %v5344_v55 = vld [vmem:[%s7523_s1 + $0x4ec] ss:$16 sps:$4 sm:$0xff]  }
 0x113   :  { %3571 = vmatpush1.bf16.msra.mxu0 %v5270_v56  ;;  %v5347_v56 = vld [vmem:[%s7523_s1 + $0x6ec] ss:$16 sps:$4 sm:$0xff]  }
 0x114   :  { %3612 = vmatpush1.bf16.msra.mxu1 %v5273_v57  ;;  %3572 = vmatprep.subr.bf16.mxu0 %v5278_v58  ;;  %v5342_v57 = vld [vmem:[%s7523_s1 + $0x4e8] ss:$16 sps:$4 sm:$0xff]  }
 0x115   :  { %3613 = vmatprep.subr.bf16.mxu1 %v5281_v61  ;;  %v5345_v58 = vld [vmem:[%s7523_s1 + $0x6e8] ss:$16 sps:$4 sm:$0xff]   ;;  %v5350_v61 = vld [vmem:[%s7523_s1 + $0x4cc] ss:$16 sps:$4 sm:$0xff]  }
 0x117   :  { %3573 = vmatpush1.bf16.msra.mxu0 %v5276_v62  ;;  %v5353_v62 = vld [vmem:[%s7523_s1 + $0x6cc] ss:$16 sps:$4 sm:$0xff]  }
 0x118   :  { %3614 = vmatpush1.bf16.msra.mxu1 %v5279_v63  ;;  %3574 = vmatprep.subr.bf16.mxu0 %v5284_v1  ;;  %v5348_v63 = vld [vmem:[%s7523_s1 + $0x4c8] ss:$16 sps:$4 sm:$0xff]  }
 0x119   :  { %3615 = vmatprep.subr.bf16.mxu1 %v5287_v2  ;;  %v5351_v1 = vld [vmem:[%s7523_s1 + $0x6c8] ss:$16 sps:$4 sm:$0xff]  }
 0x11b   :  { %3575 = vmatpush1.bf16.msra.mxu0 %v5282_v3 }
 0x11c   :  { %3616 = vmatpush1.bf16.msra.mxu1 %v5285_v4  ;;  %3576 = vmatprep.subr.bf16.mxu0 %v5290_v5 }
 0x11d   :  { %3617 = vmatprep.subr.bf16.mxu1 %v5293_v7 }
 0x11f   :  { %3577 = vmatpush1.bf16.msra.mxu0 %v5288_v8  ;;  %v5356_v8 = vld [vmem:[%s7523_s1 + $0x4ac] ss:$16 sps:$4 sm:$0xff]  }
 0x120   :  { %3618 = vmatpush1.bf16.msra.mxu1 %v5291_v9  ;;  %3578 = vmatprep.subr.bf16.mxu0 %v5296_v11  ;;  %v5359_v9 = vld [vmem:[%s7523_s1 + $0x6ac] ss:$16 sps:$4 sm:$0xff]  }
 0x121   :  { %3619 = vmatprep.subr.bf16.mxu1 %v5299_v12 }
 0x123   :  { %3579 = vmatpush2.bf16.msra.mxu0 %v5294_v14 }
 0x124   :  { %3620 = vmatpush2.bf16.msra.mxu1 %v5297_v15  ;;  %3580 = vmatprep.subr.bf16.mxu0 %v5302_v49 }
 0x125   :  { %3621 = vmatprep.subr.bf16.mxu1 %v5305_v16  ;;  %v5362_v16 = vld [vmem:[%s7523_s1 + $0x48c] ss:$16 sps:$4 sm:$0xff]  }
 0x127   :  { %3581 = vmatpush2.bf16.msra.mxu0 %v5300_v19  ;;  %v5363_v19 = vld [vmem:[%s7523_s1 + $0x688] ss:$16 sps:$4 sm:$0xff]  }
 0x128   :  { %3622 = vmatpush2.bf16.msra.mxu1 %v5303_v20  ;;  %3582 = vmatprep.subr.bf16.mxu0 %v5308_v21  ;;  %v5368_v20 = vld [vmem:[%s7523_s1 + $0x46c] ss:$16 sps:$4 sm:$0xff]  }
 0x129   :  { %3623 = vmatprep.subr.bf16.mxu1 %v5311_v22  ;;  %v5371_v21 = vld [vmem:[%s7523_s1 + $0x66c] ss:$16 sps:$4 sm:$0xff]   ;;  %v5366_v22 = vld [vmem:[%s7523_s1 + $0x468] ss:$16 sps:$4 sm:$0xff]  }
 0x12b   :  { %3583 = vmatpush2.bf16.msra.mxu0 %v5306_v24  ;;  %v5369_v24 = vld [vmem:[%s7523_s1 + $0x668] ss:$16 sps:$4 sm:$0xff]  }
 0x12c   :  { %3624 = vmatpush2.bf16.msra.mxu1 %v5309_v25  ;;  %3584 = vmatprep.subr.bf16.mxu0 %v5314_v27  ;;  %v5374_v25 = vld [vmem:[%s7523_s1 + $0x44c] ss:$16 sps:$4 sm:$0xff]  }
 0x12d   :  { %3625 = vmatprep.subr.bf16.mxu1 %v5317_v28  ;;  %v5377_v27 = vld [vmem:[%s7523_s1 + $0x64c] ss:$16 sps:$4 sm:$0xff]   ;;  %v5372_v28 = vld [vmem:[%s7523_s1 + $0x448] ss:$16 sps:$4 sm:$0xff]  }
 0x12f   :  { %3585 = vmatpush2.bf16.msra.mxu0 %v5312_v29  ;;  %v5375_v29 = vld [vmem:[%s7523_s1 + $0x648] ss:$16 sps:$4 sm:$0xff]  }
 0x130   :  { %3626 = vmatpush2.bf16.msra.mxu1 %v5315_v30  ;;  %3586 = vmatprep.subr.bf16.mxu0 %v5320_v31  ;;  %v5380_v30 = vld [vmem:[%s7523_s1 + $0x42c] ss:$16 sps:$4 sm:$0xff]  }
 0x131   :  { %3627 = vmatprep.subr.bf16.mxu1 %v5323_v33  ;;  %v5383_v31 = vld [vmem:[%s7523_s1 + $0x62c] ss:$16 sps:$4 sm:$0xff]   ;;  %v5378_v33 = vld [vmem:[%s7523_s1 + $0x428] ss:$16 sps:$4 sm:$0xff]  }
 0x133   :  { %3587 = vmatpush2.bf16.msra.mxu0 %v5318_v34  ;;  %v5381_v34 = vld [vmem:[%s7523_s1 + $0x628] ss:$16 sps:$4 sm:$0xff]  }
 0x134   :  { %3628 = vmatpush2.bf16.msra.mxu1 %v5321_v36  ;;  %3588 = vmatprep.subr.bf16.mxu0 %v5326_v38  ;;  %v5386_v36 = vld [vmem:[%s7523_s1 + $0x40c] ss:$16 sps:$4 sm:$0xff]  }
 0x135   :  { %3629 = vmatprep.subr.bf16.mxu1 %v5329_v32  ;;  %v5389_v38 = vld [vmem:[%s7523_s1 + $0x60c] ss:$16 sps:$4 sm:$0xff]   ;;  %v5384_v32 = vld [vmem:[%s7523_s1 + $0x408] ss:$16 sps:$4 sm:$0xff]  }
 0x137   :  { %3589 = vmatpush2.bf16.msra.mxu0 %v5324_v40  ;;  %v5387_v40 = vld [vmem:[%s7523_s1 + $0x608] ss:$16 sps:$4 sm:$0xff]  }
 0x138   :  { %3630 = vmatpush2.bf16.msra.mxu1 %v5327_v44  ;;  %3590 = vmatprep.subr.bf16.mxu0 %v5332_v45  ;;  %v5392_v44 = vld [vmem:[%s7523_s1 + $0x5ec] ss:$16 sps:$4 sm:$0xff]  }
 0x139   :  { %3631 = vmatprep.subr.bf16.mxu1 %v5335_v47  ;;  %v5395_v45 = vld [vmem:[%s7523_s1 + $0x7ec] ss:$16 sps:$4 sm:$0xff]   ;;  %v5390_v47 = vld [vmem:[%s7523_s1 + $0x5e8] ss:$16 sps:$4 sm:$0xff]  }
 0x13b   :  { %3591 = vmatpush2.bf16.msra.mxu0 %v5330_v48  ;;  %v5393_v48 = vld [vmem:[%s7523_s1 + $0x7e8] ss:$16 sps:$4 sm:$0xff]  }
 0x13c   :  { %3632 = vmatpush2.bf16.msra.mxu1 %v5333_v51  ;;  %3592 = vmatprep.subr.bf16.mxu0 %v5338_v60  ;;  %v5398_v51 = vld [vmem:[%s7523_s1 + $0x5cc] ss:$16 sps:$4 sm:$0xff]  }
 0x13d   :  { %3633 = vmatprep.subr.bf16.mxu1 %v5341_v0  ;;  %v5401_v60 = vld [vmem:[%s7523_s1 + $0x7cc] ss:$16 sps:$4 sm:$0xff]  }
 0x13f   :  { %3593 = vmatpush2.bf16.msra.mxu0 %v5336_v52 }
 0x140   :  { %3634 = vmatpush2.bf16.msra.mxu1 %v5339_v53  ;;  %3644 = vmatprep.subr.bf16.mxu0 %v5344_v55 }
 0x141   :  { %3685 = vmatprep.subr.bf16.mxu1 %v5347_v56 }
 0x142   :  { %v3350_v2 = vpop.f32.mrf.mxu0  ;;  %3595 = vmatmul.mubr.bf16.vlgmr.msra.gmra.mxu0 %v5934_v13 }
 0x143   :  { %v3391_v3 = vpop.f32.mrf.mxu1  ;;  %3636 = vmatmul.mubr.bf16.vlgmr.msra.gmra.mxu1 %v5950_v18  ;;  %v3351_v4 = vadd.f32 %v3350_v2, %v6631_v37  ;;  %3645 = vmatpush1.bf16.msra.mxu0 %v5342_v57  ;;  %v5354_v18 = vld [vmem:[%s7523_s1 + $0x4a8] ss:$16 sps:$4 sm:$0xff]  }
 0x144   :  { %3686 = vmatpush1.bf16.msra.mxu1 %v5345_v58  ;;  %v3352_v5 = vpop.f32.mrf.mxu0  ;;  %3646 = vmatprep.subr.bf16.mxu0 %v5350_v61  ;;  %v5357_v37 = vld [vmem:[%s7523_s1 + $0x6a8] ss:$16 sps:$4 sm:$0xff]  }
 0x145   :  { %v3393_v7 = vpop.f32.mrf.mxu1  ;;  %3687 = vmatprep.subr.bf16.mxu1 %v5353_v62  ;;  %v6832_v11 = vadd.f32 %v3391_v3, %v3351_v4  ;;  %v3353_v13 = vadd.f32 %v3352_v5, %v6641_v46  ;;  %3676 = vmatprep.mubr.bf16.mxu0 %v5946_v17  ;;  %v5365_v17 = vld [vmem:[%s7523_s1 + $0x68c] ss:$16 sps:$4 sm:$0xff]  }
 0x146   :  { %3717 = vmatprep.mubr.bf16.mxu1 %v5966_v23  ;;  %v3354_v12 = vpop.f32.mrf.mxu0  ;;  %v5360_v23 = vld [vmem:[%s7523_s1 + $0x488] ss:$16 sps:$4 sm:$0xff]  }
 0x147   :  { %v3395_v14 = vpop.f32.mrf.mxu1  ;;  %v6843_v15 = vadd.f32 %v3393_v7, %v3353_v13  ;;  %3647 = vmatpush1.bf16.msra.mxu0 %v5348_v63 }
 0x148   :  { %3688 = vmatpush1.bf16.msra.mxu1 %v5351_v1  ;;  %v3355_v49 = vpop.f32.mrf.mxu0  ;;  %3648 = vmatprep.subr.bf16.mxu0 %v5356_v8 }
 0x149   :  { %v3396_v46 = vpop.f32.mrf.mxu1  ;;  %3689 = vmatprep.subr.bf16.mxu1 %v5359_v9 }
 0x14b   :  { %3649 = vmatpush1.bf16.msra.mxu0 %v5354_v18 }
 0x14c   :  { %3690 = vmatpush1.bf16.msra.mxu1 %v5357_v37  ;;  %3650 = vmatprep.subr.bf16.mxu0 %v5362_v16 }
 0x14d   :  { %3691 = vmatprep.subr.bf16.mxu1 %v5365_v17 }
 0x14f   :  { %3651 = vmatpush1.bf16.msra.mxu0 %v5360_v23 }
 0x150   :  { %3692 = vmatpush1.bf16.msra.mxu1 %v5363_v19  ;;  %3652 = vmatprep.subr.bf16.mxu0 %v5368_v20 }
 0x151   :  { %3693 = vmatprep.subr.bf16.mxu1 %v5371_v21 }
 0x153   :  { %3653 = vmatpush1.bf16.msra.mxu0 %v5366_v22 }
 0x154   :  { %3694 = vmatpush1.bf16.msra.mxu1 %v5369_v24  ;;  %3654 = vmatprep.subr.bf16.mxu0 %v5374_v25 }
 0x155   :  { %3695 = vmatprep.subr.bf16.mxu1 %v5377_v27 }
 0x157   :  { %3655 = vmatpush1.bf16.msra.mxu0 %v5372_v28 }
 0x158   :  { %3696 = vmatpush1.bf16.msra.mxu1 %v5375_v29  ;;  %3656 = vmatprep.subr.bf16.mxu0 %v5380_v30 }
 0x159   :  { %3697 = vmatprep.subr.bf16.mxu1 %v5383_v31 }
 0x15b   :  { %3657 = vmatpush1.bf16.msra.mxu0 %v5378_v33 }
 0x15c   :  { %3698 = vmatpush1.bf16.msra.mxu1 %v5381_v34  ;;  %3658 = vmatprep.subr.bf16.mxu0 %v5386_v36 }
 0x15d   :  { %3699 = vmatprep.subr.bf16.mxu1 %v5389_v38 }
 0x15f   :  { %3659 = vmatpush1.bf16.msra.mxu0 %v5384_v32 }
 0x160   :  { %3700 = vmatpush1.bf16.msra.mxu1 %v5387_v40  ;;  %3660 = vmatprep.subr.bf16.mxu0 %v5392_v44 }
 0x161   :  { %3701 = vmatprep.subr.bf16.mxu1 %v5395_v45 }
 0x162   :  { %10 = vsyncpa [#allocation3], 0  ;;  %v5396_v0 = vld [vmem:[%s7523_s1 + $0x5c8] ss:$16 sps:$4 sm:$0xff]   ;;  %v5404_v53 = vld [vmem:[%s7523_s1 + $0x5ac] ss:$16 sps:$4 sm:$0xff]  }
 0x163   :  { %3661 = vmatpush2.bf16.msra.mxu0 %v5390_v47  ;;  %v5399_v52 = vld [vmem:[%s7523_s1 + $0x7c8] ss:$16 sps:$4 sm:$0xff]   ;;  %v5407_v55 = vld [vmem:[%s7523_s1 + $0x7ac] ss:$16 sps:$4 sm:$0xff]   ;;  %vm4241_vm0 = vcmask 74752  }
 0x164   :  { %3702 = vmatpush2.bf16.msra.mxu1 %v5393_v48  ;;  %3662 = vmatprep.subr.bf16.mxu0 %v5398_v51  ;;  %v5402_v56 = vld [vmem:[%s7523_s1 + $0x5a8] ss:$16 sps:$4 sm:$0xff]   ;;  %v5410_v58 = vld [vmem:[%s7523_s1 + $0x58c] ss:$16 sps:$4 sm:$0xff]  }
 0x165   :  { %3703 = vmatprep.subr.bf16.mxu1 %v5401_v60  ;;  %v5405_v57 = vld [vmem:[%s7523_s1 + $0x7a8] ss:$16 sps:$4 sm:$0xff]   ;;  %v5413_v61 = vld [vmem:[%s7523_s1 + $0x78c] ss:$16 sps:$4 sm:$0xff]  }
 0x166   :  { %v5408_v62 = vld [vmem:[%s7523_s1 + $0x588] ss:$16 sps:$4 sm:$0xff]   ;;  %v5416_v1 = vld [vmem:[%s7523_s1 + $0x56c] ss:$16 sps:$4 sm:$0xff]  }
 0x167   :  { %3663 = vmatpush2.bf16.msra.mxu0 %v5396_v0  ;;  %v5411_v63 = vld [vmem:[%s7523_s1 + $0x788] ss:$16 sps:$4 sm:$0xff]   ;;  %v5419_v2 = vld [vmem:[%s7523_s1 + $0x76c] ss:$16 sps:$4 sm:$0xff]  }
 0x168   :  { %3704 = vmatpush2.bf16.msra.mxu1 %v5399_v52  ;;  %3664 = vmatprep.subr.bf16.mxu0 %v5404_v53  ;;  %v5414_v3 = vld [vmem:[%s7523_s1 + $0x568] ss:$16 sps:$4 sm:$0xff]   ;;  %v5422_v5 = vld [vmem:[%s7523_s1 + $0x54c] ss:$16 sps:$4 sm:$0xff]  }
 0x169   :  { %3705 = vmatprep.subr.bf16.mxu1 %v5407_v55  ;;  %v5417_v4 = vld [vmem:[%s7523_s1 + $0x768] ss:$16 sps:$4 sm:$0xff]   ;;  %v5425_v7 = vld [vmem:[%s7523_s1 + $0x74c] ss:$16 sps:$4 sm:$0xff]  }
 0x16a   :  { %v5420_v8 = vld [vmem:[%s7523_s1 + $0x548] ss:$16 sps:$4 sm:$0xff]   ;;  %v5428_v13 = vld [vmem:[%s7523_s1 + $0x52c] ss:$16 sps:$4 sm:$0xff]  }
 0x16b   :  { %3665 = vmatpush2.bf16.msra.mxu0 %v5402_v56  ;;  %v5423_v9 = vld [vmem:[%s7523_s1 + $0x748] ss:$16 sps:$4 sm:$0xff]   ;;  %v5431_v18 = vld [vmem:[%s7523_s1 + $0x72c] ss:$16 sps:$4 sm:$0xff]  }
 0x16c   :  { %3706 = vmatpush2.bf16.msra.mxu1 %v5405_v57  ;;  %3666 = vmatprep.subr.bf16.mxu0 %v5410_v58  ;;  %v5426_v37 = vld [vmem:[%s7523_s1 + $0x528] ss:$16 sps:$4 sm:$0xff]   ;;  %v5434_v14 = vld [vmem:[%s7523_s1 + $0x50c] ss:$16 sps:$4 sm:$0xff]  }
 0x16d   :  { %3707 = vmatprep.subr.bf16.mxu1 %v5413_v61  ;;  %v5429_v12 = vld [vmem:[%s7523_s1 + $0x728] ss:$16 sps:$4 sm:$0xff]   ;;  %v5437_v49 = vld [vmem:[%s7523_s1 + $0x70c] ss:$16 sps:$4 sm:$0xff]  }
 0x16e   :  { %v5432_v46 = vld [vmem:[%s7523_s1 + $0x508] ss:$16 sps:$4 sm:$0xff]   ;;  %v5440_v17 = vld [vmem:[%s7523_s1 + $0x8ec] ss:$16 sps:$4 sm:$0xff]  }
 0x16f   :  { %3667 = vmatpush2.bf16.msra.mxu0 %v5408_v62  ;;  %v5435_v16 = vld [vmem:[%s7523_s1 + $0x708] ss:$16 sps:$4 sm:$0xff]   ;;  %v5443_v23 = vld [vmem:[%s7523_s1 + $0xaec] ss:$16 sps:$4 sm:$0xff]  }
 0x170   :  { %3708 = vmatpush2.bf16.msra.mxu1 %v5411_v63  ;;  %3668 = vmatprep.subr.bf16.mxu0 %v5416_v1  ;;  %v5438_v19 = vld [vmem:[%s7523_s1 + $0x8e8] ss:$16 sps:$4 sm:$0xff]   ;;  %v5446_v21 = vld [vmem:[%s7523_s1 + $0x8cc] ss:$16 sps:$4 sm:$0xff]  }
 0x171   :  { %3709 = vmatprep.subr.bf16.mxu1 %v5419_v2  ;;  %v5441_v20 = vld [vmem:[%s7523_s1 + $0xae8] ss:$16 sps:$4 sm:$0xff]   ;;  %v5449_v22 = vld [vmem:[%s7523_s1 + $0xacc] ss:$16 sps:$4 sm:$0xff]  }
 0x172   :  { %v5444_v28 = vld [vmem:[%s7523_s1 + $0x8c8] ss:$16 sps:$4 sm:$0xff]   ;;  %v5464_v48 = vld [vmem:[%s7523_s1 + $0x86c] ss:$16 sps:$4 sm:$0xff]  }
 0x173   :  { %3669 = vmatpush2.bf16.msra.mxu0 %v5414_v3  ;;  %v5447_v29 = vld [vmem:[%s7523_s1 + $0xac8] ss:$16 sps:$4 sm:$0xff]   ;;  %v5467_v51 = vld [vmem:[%s7523_s1 + $0xa6c] ss:$16 sps:$4 sm:$0xff]  }
 0x174   :  { %3710 = vmatpush2.bf16.msra.mxu1 %v5417_v4  ;;  %3670 = vmatprep.subr.bf16.mxu0 %v5422_v5  ;;  %v5450_v32 = vld [vmem:[%s7523_s1 + $0x8a8] ss:$16 sps:$4 sm:$0xff]   ;;  %v5470_v52 = vld [vmem:[%s7523_s1 + $0x84c] ss:$16 sps:$4 sm:$0xff]  }
 0x175   :  { %3711 = vmatprep.subr.bf16.mxu1 %v5425_v7  ;;  %v5453_v40 = vld [vmem:[%s7523_s1 + $0xaa8] ss:$16 sps:$4 sm:$0xff]   ;;  %v5473_v53 = vld [vmem:[%s7523_s1 + $0xa4c] ss:$16 sps:$4 sm:$0xff]  }
 0x176   :  { %v5456_v45 = vld [vmem:[%s7523_s1 + $0x888] ss:$16 sps:$4 sm:$0xff]   ;;  %v5476_v57 = vld [vmem:[%s7523_s1 + $0x82c] ss:$16 sps:$4 sm:$0xff]  }
 0x177   :  { %3671 = vmatpush2.bf16.msra.mxu0 %v5420_v8  ;;  %v5459_v47 = vld [vmem:[%s7523_s1 + $0xa88] ss:$16 sps:$4 sm:$0xff]   ;;  %v5479_v58 = vld [vmem:[%s7523_s1 + $0xa2c] ss:$16 sps:$4 sm:$0xff]  }
 0x178   :  { %3712 = vmatpush2.bf16.msra.mxu1 %v5423_v9  ;;  %3672 = vmatprep.subr.bf16.mxu0 %v5428_v13  ;;  %v5462_v60 = vld [vmem:[%s7523_s1 + $0x868] ss:$16 sps:$4 sm:$0xff]   ;;  %v5482_v63 = vld [vmem:[%s7523_s1 + $0x80c] ss:$16 sps:$4 sm:$0xff]  }
 0x179   :  { %3713 = vmatprep.subr.bf16.mxu1 %v5431_v18  ;;  %v5465_v0 = vld [vmem:[%s7523_s1 + $0xa68] ss:$16 sps:$4 sm:$0xff]   ;;  %v5485_v1 = vld [vmem:[%s7523_s1 + $0xa0c] ss:$16 sps:$4 sm:$0xff]  }
 0x17a   :  { %v5468_v55 = vld [vmem:[%s7523_s1 + $0x848] ss:$16 sps:$4 sm:$0xff]   ;;  %v5488_v4 = vld [vmem:[%s7523_s1 + $0x9ec] ss:$16 sps:$4 sm:$0xff]  }
 0x17b   :  { %3673 = vmatpush2.bf16.msra.mxu0 %v5426_v37  ;;  %v5471_v56 = vld [vmem:[%s7523_s1 + $0xa48] ss:$16 sps:$4 sm:$0xff]   ;;  %v5491_v5 = vld [vmem:[%s7523_s1 + $0xbec] ss:$16 sps:$4 sm:$0xff]  }
 0x17c   :  { %3714 = vmatpush2.bf16.msra.mxu1 %v5429_v12  ;;  %3674 = vmatprep.subr.bf16.mxu0 %v5434_v14  ;;  %v5474_v61 = vld [vmem:[%s7523_s1 + $0x828] ss:$16 sps:$4 sm:$0xff]   ;;  %v5494_v9 = vld [vmem:[%s7523_s1 + $0x9cc] ss:$16 sps:$4 sm:$0xff]  }
 0x17d   :  { %3715 = vmatprep.subr.bf16.mxu1 %v5437_v49  ;;  %v5477_v62 = vld [vmem:[%s7523_s1 + $0xa28] ss:$16 sps:$4 sm:$0xff]   ;;  %v5497_v13 = vld [vmem:[%s7523_s1 + $0xbcc] ss:$16 sps:$4 sm:$0xff]  }
 0x17e   :  { %v5480_v2 = vld [vmem:[%s7523_s1 + $0x808] ss:$16 sps:$4 sm:$0xff]   ;;  %v5500_v12 = vld [vmem:[%s7523_s1 + $0x9ac] ss:$16 sps:$4 sm:$0xff]  }
 0x17f   :  { %3675 = vmatpush2.bf16.msra.mxu0 %v5432_v46  ;;  %v5483_v3 = vld [vmem:[%s7523_s1 + $0xa08] ss:$16 sps:$4 sm:$0xff]   ;;  %v5503_v14 = vld [vmem:[%s7523_s1 + $0xbac] ss:$16 sps:$4 sm:$0xff]  }
 0x180   :  { %3716 = vmatpush2.bf16.msra.mxu1 %v5435_v16  ;;  %3726 = vmatprep.subr.bf16.mxu0 %v5440_v17  ;;  %v5486_v7 = vld [vmem:[%s7523_s1 + $0x9e8] ss:$16 sps:$4 sm:$0xff]   ;;  %v5506_v16 = vld [vmem:[%s7523_s1 + $0x98c] ss:$16 sps:$4 sm:$0xff]  }
 0x181   :  { %3767 = vmatprep.subr.bf16.mxu1 %v5443_v23  ;;  %v5489_v8 = vld [vmem:[%s7523_s1 + $0xbe8] ss:$16 sps:$4 sm:$0xff]   ;;  %v5509_v17 = vld [vmem:[%s7523_s1 + $0xb8c] ss:$16 sps:$4 sm:$0xff]  }
 0x182   :  { %v3432_v24 = vpop.f32.mrf.mxu0  ;;  %3677 = vmatmul.mubr.bf16.vlgmr.msra.gmra.mxu0 %v6145_v26  ;;  %v5452_v26 = vld [vmem:[%s7523_s1 + $0x8ac] ss:$16 sps:$4 sm:$0xff]   ;;  %v5492_v18 = vld [vmem:[%s7523_s1 + $0x9c8] ss:$16 sps:$4 sm:$0xff]  }
 0x183   :  { %v3473_v25 = vpop.f32.mrf.mxu1  ;;  %3718 = vmatmul.mubr.bf16.vlgmr.msra.gmra.mxu1 %v6158_v6  ;;  %v3433_v27 = vadd.f32 %v3432_v24, %v6832_v11  ;;  %3727 = vmatpush1.bf16.msra.mxu0 %v5438_v19  ;;  %v5455_v6 = vld [vmem:[%s7523_s1 + $0xaac] ss:$16 sps:$4 sm:$0xff]   ;;  %v5495_v37 = vld [vmem:[%s7523_s1 + $0xbc8] ss:$16 sps:$4 sm:$0xff]  }
 0x184   :  { %3768 = vmatpush1.bf16.msra.mxu1 %v5441_v20  ;;  %v3434_v30 = vpop.f32.mrf.mxu0  ;;  %3728 = vmatprep.subr.bf16.mxu0 %v5446_v21  ;;  %v5498_v49 = vld [vmem:[%s7523_s1 + $0x9a8] ss:$16 sps:$4 sm:$0xff]   ;;  %v5512_v20 = vld [vmem:[%s7523_s1 + $0x96c] ss:$16 sps:$4 sm:$0xff]  }
 0x185   :  { %v3475_v31 = vpop.f32.mrf.mxu1  ;;  %3769 = vmatprep.subr.bf16.mxu1 %v5449_v22  ;;  %v7034_v11 = vadd.f32 %v3473_v25, %v3433_v27  ;;  %v3435_v33 = vadd.f32 %v3434_v30, %v6843_v15  ;;  %3758 = vmatprep.mubr.bf16.mxu0 %v6198_v41  ;;  %v5458_v41 = vld [vmem:[%s7523_s1 + $0x88c] ss:$16 sps:$4 sm:$0xff]   ;;  %v5501_v46 = vld [vmem:[%s7523_s1 + $0xba8] ss:$16 sps:$4 sm:$0xff]  }
 0x186   :  { %3799 = vmatprep.mubr.bf16.mxu1 %v6203_v43  ;;  %v3436_v34 = vpop.f32.mrf.mxu0  ;;  %v5461_v43 = vld [vmem:[%s7523_s1 + $0xa8c] ss:$16 sps:$4 sm:$0xff]   ;;  %v5504_v23 = vld [vmem:[%s7523_s1 + $0x988] ss:$16 sps:$4 sm:$0xff]  }
 0x187   :  { %v3477_v36 = vpop.f32.mrf.mxu1  ;;  %v7039_v38 = vadd.f32 %v3475_v31, %v3435_v33  ;;  %3729 = vmatpush1.bf16.msra.mxu0 %v5444_v28  ;;  %v5507_v19 = vld [vmem:[%s7523_s1 + $0xb88] ss:$16 sps:$4 sm:$0xff]   ;;  %v5515_v21 = vld [vmem:[%s7523_s1 + $0xb6c] ss:$16 sps:$4 sm:$0xff]  }
 0x188   :  { %3770 = vmatpush1.bf16.msra.mxu1 %v5447_v29  ;;  %v3437_v44 = vpop.f32.mrf.mxu0  ;;  %3730 = vmatprep.subr.bf16.mxu0 %v5452_v26  ;;  %v5510_v22 = vld [vmem:[%s7523_s1 + $0x968] ss:$16 sps:$4 sm:$0xff]   ;;  %v5518_v25 = vld [vmem:[%s7523_s1 + $0x94c] ss:$16 sps:$4 sm:$0xff]  }
 0x189   :  { %v3478_v15 = vpop.f32.mrf.mxu1  ;;  %3771 = vmatprep.subr.bf16.mxu1 %v5455_v6  ;;  %v5513_v24 = vld [vmem:[%s7523_s1 + $0xb68] ss:$16 sps:$4 sm:$0xff]   ;;  %v5521_v27 = vld [vmem:[%s7523_s1 + $0xb4c] ss:$16 sps:$4 sm:$0xff]  }
 0x18a   :  { %v5516_v28 = vld [vmem:[%s7523_s1 + $0x948] ss:$16 sps:$4 sm:$0xff]   ;;  %v5524_v30 = vld [vmem:[%s7523_s1 + $0x92c] ss:$16 sps:$4 sm:$0xff]  }
 0x18b   :  { %3731 = vmatpush1.bf16.msra.mxu0 %v5450_v32  ;;  %v5519_v29 = vld [vmem:[%s7523_s1 + $0xb48] ss:$16 sps:$4 sm:$0xff]   ;;  %v5527_v31 = vld [vmem:[%s7523_s1 + $0xb2c] ss:$16 sps:$4 sm:$0xff]  }
 0x18c   :  { %3772 = vmatpush1.bf16.msra.mxu1 %v5453_v40  ;;  %3732 = vmatprep.subr.bf16.mxu0 %v5458_v41  ;;  %v5522_v26 = vld [vmem:[%s7523_s1 + $0x928] ss:$16 sps:$4 sm:$0xff]   ;;  %v5530_v33 = vld [vmem:[%s7523_s1 + $0x90c] ss:$16 sps:$4 sm:$0xff]  }
 0x18d   :  { %3773 = vmatprep.subr.bf16.mxu1 %v5461_v43  ;;  %v5525_v6 = vld [vmem:[%s7523_s1 + $0xb28] ss:$16 sps:$4 sm:$0xff]   ;;  %v5533_v34 = vld [vmem:[%s7523_s1 + $0xb0c] ss:$16 sps:$4 sm:$0xff]  }
 0x18e   :  { %v5528_v36 = vld [vmem:[%s7523_s1 + $0x908] ss:$16 sps:$4 sm:$0xff]   ;;  %v5536_v40 = vld [vmem:[%s7523_s1 + $0xcec] ss:$16 sps:$4 sm:$0xff]  }
 0x18f   :  { %3733 = vmatpush1.bf16.msra.mxu0 %v5456_v45  ;;  %v5531_v32 = vld [vmem:[%s7523_s1 + $0xb08] ss:$16 sps:$4 sm:$0xff]   ;;  %v5539_v44 = vld [vmem:[%s7523_s1 + $0xeec] ss:$16 sps:$4 sm:$0xff]  }
 0x190   :  { %3774 = vmatpush1.bf16.msra.mxu1 %v5459_v47  ;;  %3734 = vmatprep.subr.bf16.mxu0 %v5464_v48  ;;  %v5534_v15 = vld [vmem:[%s7523_s1 + $0xce8] ss:$16 sps:$4 sm:$0xff]   ;;  %v5542_v43 = vld [vmem:[%s7523_s1 + $0xccc] ss:$16 sps:$4 sm:$0xff]  }
 0x191   :  { %3775 = vmatprep.subr.bf16.mxu1 %v5467_v51  ;;  %v5537_v41 = vld [vmem:[%s7523_s1 + $0xee8] ss:$16 sps:$4 sm:$0xff]   ;;  %v5545_v45 = vld [vmem:[%s7523_s1 + $0xecc] ss:$16 sps:$4 sm:$0xff]  }
 0x193   :  { %3735 = vmatpush1.bf16.msra.mxu0 %v5462_v60  ;;  %v5540_v60 = vld [vmem:[%s7523_s1 + $0xcc8] ss:$16 sps:$4 sm:$0xff]  }
 0x194   :  { %3776 = vmatpush1.bf16.msra.mxu1 %v5465_v0  ;;  %3736 = vmatprep.subr.bf16.mxu0 %v5470_v52  ;;  %v5543_v0 = vld [vmem:[%s7523_s1 + $0xec8] ss:$16 sps:$4 sm:$0xff]  }
 0x195   :  { %3777 = vmatprep.subr.bf16.mxu1 %v5473_v53 }
 0x197   :  { %3737 = vmatpush1.bf16.msra.mxu0 %v5468_v55 }
 0x198   :  { %3778 = vmatpush1.bf16.msra.mxu1 %v5471_v56  ;;  %3738 = vmatprep.subr.bf16.mxu0 %v5476_v57  ;;  %v5546_v57 = vld [vmem:[%s7523_s1 + $0xca8] ss:$16 sps:$4 sm:$0xff]  }
 0x199   :  { %3779 = vmatprep.subr.bf16.mxu1 %v5479_v58  ;;  %v5549_v58 = vld [vmem:[%s7523_s1 + $0xea8] ss:$16 sps:$4 sm:$0xff]  }
 0x19b   :  { %3739 = vmatpush1.bf16.msra.mxu0 %v5474_v61 }
 0x19c   :  { %3780 = vmatpush1.bf16.msra.mxu1 %v5477_v62  ;;  %3740 = vmatprep.subr.bf16.mxu0 %v5482_v63  ;;  %v5552_v63 = vld [vmem:[%s7523_s1 + $0xc88] ss:$16 sps:$4 sm:$0xff]  }
 0x19d   :  { %3781 = vmatprep.subr.bf16.mxu1 %v5485_v1  ;;  %v5555_v1 = vld [vmem:[%s7523_s1 + $0xe88] ss:$16 sps:$4 sm:$0xff]  }
 0x19f   :  { %3741 = vmatpush1.bf16.msra.mxu0 %v5480_v2  ;;  %v5560_v2 = vld [vmem:[%s7523_s1 + $0xc6c] ss:$16 sps:$4 sm:$0xff]  }
 0x1a0   :  { %3782 = vmatpush1.bf16.msra.mxu1 %v5483_v3  ;;  %3742 = vmatprep.subr.bf16.mxu0 %v5488_v4  ;;  %v5563_v3 = vld [vmem:[%s7523_s1 + $0xe6c] ss:$16 sps:$4 sm:$0xff]   ;;  %v5558_v4 = vld [vmem:[%s7523_s1 + $0xc68] ss:$16 sps:$4 sm:$0xff]  }
 0x1a1   :  { %3783 = vmatprep.subr.bf16.mxu1 %v5491_v5  ;;  %v5561_v5 = vld [vmem:[%s7523_s1 + $0xe68] ss:$16 sps:$4 sm:$0xff]  }
 0x1a3   :  { %3743 = vmatpush2.bf16.msra.mxu0 %v5486_v7  ;;  %v5566_v7 = vld [vmem:[%s7523_s1 + $0xc4c] ss:$16 sps:$4 sm:$0xff]  }
 0x1a4   :  { %3784 = vmatpush2.bf16.msra.mxu1 %v5489_v8  ;;  %3744 = vmatprep.subr.bf16.mxu0 %v5494_v9  ;;  %v5569_v8 = vld [vmem:[%s7523_s1 + $0xe4c] ss:$16 sps:$4 sm:$0xff]   ;;  %v5564_v9 = vld [vmem:[%s7523_s1 + $0xc48] ss:$16 sps:$4 sm:$0xff]  }
 0x1a5   :  { %3785 = vmatprep.subr.bf16.mxu1 %v5497_v13  ;;  %v5567_v13 = vld [vmem:[%s7523_s1 + $0xe48] ss:$16 sps:$4 sm:$0xff]  }
 0x1a7   :  { %3745 = vmatpush2.bf16.msra.mxu0 %v5492_v18  ;;  %v5572_v18 = vld [vmem:[%s7523_s1 + $0xc2c] ss:$16 sps:$4 sm:$0xff]  }
 0x1a8   :  { %3786 = vmatpush2.bf16.msra.mxu1 %v5495_v37  ;;  %3746 = vmatprep.subr.bf16.mxu0 %v5500_v12  ;;  %v5575_v37 = vld [vmem:[%s7523_s1 + $0xe2c] ss:$16 sps:$4 sm:$0xff]   ;;  %v5570_v12 = vld [vmem:[%s7523_s1 + $0xc28] ss:$16 sps:$4 sm:$0xff]  }
 0x1a9   :  { %3787 = vmatprep.subr.bf16.mxu1 %v5503_v14  ;;  %v5573_v14 = vld [vmem:[%s7523_s1 + $0xe28] ss:$16 sps:$4 sm:$0xff]  }
 0x1ab   :  { %3747 = vmatpush2.bf16.msra.mxu0 %v5498_v49  ;;  %v5578_v49 = vld [vmem:[%s7523_s1 + $0xc0c] ss:$16 sps:$4 sm:$0xff]  }
 0x1ac   :  { %3788 = vmatpush2.bf16.msra.mxu1 %v5501_v46  ;;  %3748 = vmatprep.subr.bf16.mxu0 %v5506_v16  ;;  %v5581_v46 = vld [vmem:[%s7523_s1 + $0xe0c] ss:$16 sps:$4 sm:$0xff]   ;;  %v5576_v16 = vld [vmem:[%s7523_s1 + $0xc08] ss:$16 sps:$4 sm:$0xff]  }
 0x1ad   :  { %3789 = vmatprep.subr.bf16.mxu1 %v5509_v17  ;;  %v5579_v17 = vld [vmem:[%s7523_s1 + $0xe08] ss:$16 sps:$4 sm:$0xff]  }
 0x1af   :  { %3749 = vmatpush2.bf16.msra.mxu0 %v5504_v23  ;;  %v5584_v23 = vld [vmem:[%s7523_s1 + $0xdec] ss:$16 sps:$4 sm:$0xff]  }
 0x1b0   :  { %3790 = vmatpush2.bf16.msra.mxu1 %v5507_v19  ;;  %3750 = vmatprep.subr.bf16.mxu0 %v5512_v20  ;;  %v5587_v19 = vld [vmem:[%s7523_s1 + $0xfec] ss:$16 sps:$4 sm:$0xff]   ;;  %v5582_v20 = vld [vmem:[%s7523_s1 + $0xde8] ss:$16 sps:$4 sm:$0xff]  }
 0x1b1   :  { %3791 = vmatprep.subr.bf16.mxu1 %v5515_v21  ;;  %v5585_v21 = vld [vmem:[%s7523_s1 + $0xfe8] ss:$16 sps:$4 sm:$0xff]  }
 0x1b3   :  { %3751 = vmatpush2.bf16.msra.mxu0 %v5510_v22  ;;  %v5590_v22 = vld [vmem:[%s7523_s1 + $0xdcc] ss:$16 sps:$4 sm:$0xff]  }
 0x1b4   :  { %3792 = vmatpush2.bf16.msra.mxu1 %v5513_v24  ;;  %3752 = vmatprep.subr.bf16.mxu0 %v5518_v25  ;;  %v5593_v24 = vld [vmem:[%s7523_s1 + $0xfcc] ss:$16 sps:$4 sm:$0xff]   ;;  %v5588_v25 = vld [vmem:[%s7523_s1 + $0xdc8] ss:$16 sps:$4 sm:$0xff]  }
 0x1b5   :  { %3793 = vmatprep.subr.bf16.mxu1 %v5521_v27  ;;  %v5591_v27 = vld [vmem:[%s7523_s1 + $0xfc8] ss:$16 sps:$4 sm:$0xff]  }
 0x1b7   :  { %3753 = vmatpush2.bf16.msra.mxu0 %v5516_v28  ;;  %v5596_v28 = vld [vmem:[%s7523_s1 + $0xdac] ss:$16 sps:$4 sm:$0xff]  }
 0x1b8   :  { %3794 = vmatpush2.bf16.msra.mxu1 %v5519_v29  ;;  %3754 = vmatprep.subr.bf16.mxu0 %v5524_v30  ;;  %v5599_v29 = vld [vmem:[%s7523_s1 + $0xfac] ss:$16 sps:$4 sm:$0xff]   ;;  %v5594_v30 = vld [vmem:[%s7523_s1 + $0xda8] ss:$16 sps:$4 sm:$0xff]  }
 0x1b9   :  { %3795 = vmatprep.subr.bf16.mxu1 %v5527_v31  ;;  %v5597_v31 = vld [vmem:[%s7523_s1 + $0xfa8] ss:$16 sps:$4 sm:$0xff]  }
 0x1bb   :  { %3755 = vmatpush2.bf16.msra.mxu0 %v5522_v26  ;;  %v5602_v26 = vld [vmem:[%s7523_s1 + $0xd8c] ss:$16 sps:$4 sm:$0xff]  }
 0x1bc   :  { %3796 = vmatpush2.bf16.msra.mxu1 %v5525_v6  ;;  %3756 = vmatprep.subr.bf16.mxu0 %v5530_v33  ;;  %v5605_v6 = vld [vmem:[%s7523_s1 + $0xf8c] ss:$16 sps:$4 sm:$0xff]   ;;  %v5600_v33 = vld [vmem:[%s7523_s1 + $0xd88] ss:$16 sps:$4 sm:$0xff]  }
 0x1bd   :  { %3797 = vmatprep.subr.bf16.mxu1 %v5533_v34  ;;  %v5603_v34 = vld [vmem:[%s7523_s1 + $0xf88] ss:$16 sps:$4 sm:$0xff]  }
 0x1bf   :  { %3757 = vmatpush2.bf16.msra.mxu0 %v5528_v36  ;;  %v5608_v36 = vld [vmem:[%s7523_s1 + $0xd6c] ss:$16 sps:$4 sm:$0xff]  }
 0x1c0   :  { %3798 = vmatpush2.bf16.msra.mxu1 %v5531_v32  ;;  %3808 = vmatprep.subr.bf16.mxu0 %v5536_v40  ;;  %v5611_v32 = vld [vmem:[%s7523_s1 + $0xf6c] ss:$16 sps:$4 sm:$0xff]   ;;  %v5606_v40 = vld [vmem:[%s7523_s1 + $0xd68] ss:$16 sps:$4 sm:$0xff]  }
 0x1c1   :  { %3849 = vmatprep.subr.bf16.mxu1 %v5539_v44  ;;  %v5609_v44 = vld [vmem:[%s7523_s1 + $0xf68] ss:$16 sps:$4 sm:$0xff]  }
 0x1c2   :  { %v3514_v47 = vpop.f32.mrf.mxu0  ;;  %3759 = vmatmul.mubr.bf16.vlgmr.msra.gmra.mxu0 %v6374_v50  ;;  %v5548_v50 = vld [vmem:[%s7523_s1 + $0xcac] ss:$16 sps:$4 sm:$0xff]  }
 0x1c3   :  { %v3555_v48 = vpop.f32.mrf.mxu1  ;;  %3800 = vmatmul.mubr.bf16.vlgmr.msra.gmra.mxu1 %v6390_v35  ;;  %v3515_v51 = vadd.f32 %v3514_v47, %v7034_v11  ;;  %3809 = vmatpush1.bf16.msra.mxu0 %v5534_v15  ;;  %v5551_v35 = vld [vmem:[%s7523_s1 + $0xeac] ss:$16 sps:$4 sm:$0xff]  }
 0x1c4   :  { %3850 = vmatpush1.bf16.msra.mxu1 %v5537_v41  ;;  %v7230_v52 = vpop.f32.mrf.mxu0  ;;  %3810 = vmatprep.subr.bf16.mxu0 %v5542_v43  ;;  %v5614_v15 = vld [vmem:[%s7523_s1 + $0xd4c] ss:$16 sps:$4 sm:$0xff]   ;;  %v5612_v43 = vld [vmem:[%s7523_s1 + $0xd48] ss:$16 sps:$4 sm:$0xff]  }
 0x1c5   :  { %v7232_v53 = vpop.f32.mrf.mxu1  ;;  %3851 = vmatprep.subr.bf16.mxu1 %v5545_v45  ;;  %v7240_v11 = vadd.f32 %v3555_v48, %v3515_v51  ;;  %3840 = vmatprep.mubr.bf16.mxu0 %v6386_v54  ;;  %v5554_v54 = vld [vmem:[%s7523_s1 + $0xc8c] ss:$16 sps:$4 sm:$0xff]   ;;  %v5615_v45 = vld [vmem:[%s7523_s1 + $0xf48] ss:$16 sps:$4 sm:$0xff]   ;;  %v3517_v51 = vadd.f32 %v7230_v52, %v7039_v38 }
 0x1c6   :  { %3881 = vmatprep.mubr.bf16.mxu1 %v6406_v59  ;;  %v3518_v55 = vpop.f32.mrf.mxu0  ;;  %v5557_v59 = vld [vmem:[%s7523_s1 + $0xe8c] ss:$16 sps:$4 sm:$0xff]  }
 0x1c7   :  { %v3559_v56 = vpop.f32.mrf.mxu1  ;;  %3811 = vmatpush1.bf16.msra.mxu0 %v5540_v60  ;;  %v5617_v41 = vld [vmem:[%s7523_s1 + $0xf4c] ss:$16 sps:$4 sm:$0xff]   ;;  %v5618_v60 = vld [vmem:[%s7523_s1 + $0xd28] ss:$16 sps:$4 sm:$0xff]   ;;  %v3558_v52 = vadd.f32 %v7232_v53, %v3517_v51  ;;  %v552_v53 = vsub.s32 3, %v5838_v42 }
 0x1c8   :  { %3852 = vmatpush1.bf16.msra.mxu1 %v5543_v0  ;;  %v3519_v61 = vpop.f32.mrf.mxu0  ;;  %3812 = vmatprep.subr.bf16.mxu0 %v5548_v50  ;;  %v5620_v47 = vld [vmem:[%s7523_s1 + $0xd2c] ss:$16 sps:$4 sm:$0xff]   ;;  %v5621_v0 = vld [vmem:[%s7523_s1 + $0xf28] ss:$16 sps:$4 sm:$0xff]   ;;  %v548_v56 = vsub.s32 2, %v5838_v42 }
 0x1c9   :  { %v3560_v62 = vpop.f32.mrf.mxu1  ;;  %3853 = vmatprep.subr.bf16.mxu1 %v5551_v35  ;;  %v5623_v48 = vld [vmem:[%s7523_s1 + $0xf2c] ss:$16 sps:$4 sm:$0xff]   ;;  %v5624_v35 = vld [vmem:[%s7523_s1 + $0xd08] ss:$16 sps:$4 sm:$0xff]   ;;  %v5666_v61 = vld [vmem:[%s7524_s2] sm:$0xf] }
 0x1ca   :  { %v5626_v50 = vld [vmem:[%s7523_s1 + $0xd0c] ss:$16 sps:$4 sm:$0xff]   ;;  %v5627_v55 = vld [vmem:[%s7523_s1 + $0xf08] ss:$16 sps:$4 sm:$0xff]   ;;  %v549_v62 = vrot.slane %v5666_v61, %v548_v56  ;;  %v5661_v56 = vld [vmem:[%s7525_s3 + $0x80] sm:$0xff]  }
 0x1cb   :  { %3813 = vmatpush1.bf16.msra.mxu0 %v5546_v57  ;;  %v5629_v38 = vld [vmem:[%s7523_s1 + $0xf0c] ss:$16 sps:$4 sm:$0xff]  }
 0x1cc   :  { %3854 = vmatpush1.bf16.msra.mxu1 %v5549_v58  ;;  %3814 = vmatprep.subr.bf16.mxu0 %v5554_v54  ;;  %v5630_v57 = vld [vmem:[%s7525_s3 + $0x78] sm:$0xff]   ;;  %v3891_v58 = vmax.f32 %v3558_v52, 0.0 }
 0x1cd   :  { %3855 = vmatprep.subr.bf16.mxu1 %v5557_v59  ;;  %v5631_v54 = vld [vmem:[%s7525_s3 + $0x38] sm:$0xff]   ;;  %v5632_v59 = vld [vmem:[%s7525_s3 + $0x70] sm:$0xff]  }
 0x1cf   :  { %3815 = vmatpush1.bf16.msra.mxu0 %v5552_v63  ;;  %v3895_v63 = vpack.c.bf16 %v3891_v58, %v3891_v58 }
 0x1d0   :  { %3856 = vmatpush1.bf16.msra.mxu1 %v5555_v1  ;;  %3816 = vmatprep.subr.bf16.mxu0 %v5560_v2  ;;  %v553_v1 = vrot.slane %v5666_v61, %v552_v53 }
 0x1d1   :  { %3857 = vmatprep.subr.bf16.mxu1 %v5563_v3 }
 0x1d3   :  { %3817 = vmatpush1.bf16.msra.mxu0 %v5558_v4  ;;  %v5633_v4 = vld [vmem:[%s7525_s3 + $0x30] sm:$0xff]  }
 0x1d4   :  { %3858 = vmatpush1.bf16.msra.mxu1 %v5561_v5  ;;  %3818 = vmatprep.subr.bf16.mxu0 %v5566_v7 }
 0x1d5   :  { %3859 = vmatprep.subr.bf16.mxu1 %v5569_v8  ;;  %v5634_v8 = vld [vmem:[%s7525_s3 + $0x68] sm:$0xff]  }
 0x1d7   :  { %3819 = vmatpush1.bf16.msra.mxu0 %v5564_v9 }
 0x1d8   :  { %3860 = vmatpush1.bf16.msra.mxu1 %v5567_v13  ;;  %3820 = vmatprep.subr.bf16.mxu0 %v5572_v18 }
 0x1d9   :  { %3861 = vmatprep.subr.bf16.mxu1 %v5575_v37 }
 0x1db   :  { %3821 = vmatpush1.bf16.msra.mxu0 %v5570_v12  ;;  %v5636_v12 = vld [vmem:[%s7525_s3 + $0x60] sm:$0xff]  }
 0x1dc   :  { %3862 = vmatpush1.bf16.msra.mxu1 %v5573_v14  ;;  %3822 = vmatprep.subr.bf16.mxu0 %v5578_v49 }
 0x1dd   :  { %3863 = vmatprep.subr.bf16.mxu1 %v5581_v46  ;;  %v5646_v46 = vld [vmem:[%s7525_s3 + $0xf8] sm:$0xff]  }
 0x1df   :  { %3823 = vmatpush1.bf16.msra.mxu0 %v5576_v16  ;;  %v5647_v16 = vld [vmem:[%s7525_s3 + $0xb8] sm:$0xff]  }
 0x1e0   :  { %3864 = vmatpush1.bf16.msra.mxu1 %v5579_v17  ;;  %3824 = vmatprep.subr.bf16.mxu0 %v5584_v23  ;;  %v5648_v17 = vld [vmem:[%s7525_s3 + $0xf0] sm:$0xff]   ;;  %v5637_v23 = vld [vmem:[%s7525_s3 + $0x20] sm:$0xff]  }
 0x1e1   :  { %3865 = vmatprep.subr.bf16.mxu1 %v5587_v19  ;;  %v5649_v19 = vld [vmem:[%s7525_s3 + $0xb0] sm:$0xff]  }
 0x1e3   :  { %3825 = vmatpush2.bf16.msra.mxu0 %v5582_v20  ;;  %v5638_v20 = vld [vmem:[%s7525_s3 + $0x58] sm:$0xff]  }
 0x1e4   :  { %3866 = vmatpush2.bf16.msra.mxu1 %v5585_v21  ;;  %3826 = vmatprep.subr.bf16.mxu0 %v5590_v22  ;;  %v5650_v21 = vld [vmem:[%s7525_s3 + $0xe8] sm:$0xff]   ;;  %v5639_v22 = vld [vmem:[%s7525_s3 + $0x18] sm:$0xff]  }
 0x1e5   :  { %3867 = vmatprep.subr.bf16.mxu1 %v5593_v24  ;;  %v5651_v24 = vld [vmem:[%s7525_s3 + $0xa8] sm:$0xff]  }
 0x1e7   :  { %3827 = vmatpush2.bf16.msra.mxu0 %v5588_v25  ;;  %v5640_v25 = vld [vmem:[%s7525_s3 + $0x50] sm:$0xff]  }
 0x1e8   :  { %3868 = vmatpush2.bf16.msra.mxu1 %v5591_v27  ;;  %3828 = vmatprep.subr.bf16.mxu0 %v5596_v28  ;;  %v5652_v27 = vld [vmem:[%s7525_s3 + $0xe0] sm:$0xff]   ;;  %v5641_v28 = vld [vmem:[%s7525_s3 + $0x10] sm:$0xff]  }
 0x1e9   :  { %3869 = vmatprep.subr.bf16.mxu1 %v5599_v29  ;;  %v5653_v29 = vld [vmem:[%s7525_s3 + $0xa0] sm:$0xff]  }
 0x1eb   :  { %3829 = vmatpush2.bf16.msra.mxu0 %v5594_v30  ;;  %v5642_v30 = vld [vmem:[%s7525_s3 + $0x48] sm:$0xff]  }
 0x1ec   :  { %3870 = vmatpush2.bf16.msra.mxu1 %v5597_v31  ;;  %3830 = vmatprep.subr.bf16.mxu0 %v5602_v26  ;;  %v5654_v31 = vld [vmem:[%s7525_s3 + $0xd8] sm:$0xff]   ;;  %v5643_v26 = vld [vmem:[%s7525_s3 + $0x8] sm:$0xff]  }
 0x1ed   :  { %3871 = vmatprep.subr.bf16.mxu1 %v5605_v6  ;;  %v5655_v6 = vld [vmem:[%s7525_s3 + $0x98] sm:$0xff]  }
 0x1ef   :  { %3831 = vmatpush2.bf16.msra.mxu0 %v5600_v33  ;;  %v5644_v33 = vld [vmem:[%s7525_s3 + $0x40] sm:$0xff]  }
 0x1f0   :  { %3872 = vmatpush2.bf16.msra.mxu1 %v5603_v34  ;;  %3832 = vmatprep.subr.bf16.mxu0 %v5608_v36  ;;  %v5645_v34 = vld [vmem:[%s7525_s3] sm:$0xff]   ;;  %v3890_v36 = vmax.f32 %v7240_v11, 0.0  ;;  %v5658_v11 = vld [vmem:[%s7525_s3 + $0xc8] sm:$0xff]  }
 0x1f1   :  { %3873 = vmatprep.subr.bf16.mxu1 %v5611_v32 }
 0x1f2   :  { %v3894_v32 = vpack.c.bf16 %v3890_v36, %v3890_v36 }
 0x1f3   :  { %3833 = vmatpush2.bf16.msra.mxu0 %v5606_v40  ;;  %v5656_v40 = vld [vmem:[%s7525_s3 + $0xd0] sm:$0xff]  }
 0x1f4   :  { %3874 = vmatpush2.bf16.msra.mxu1 %v5609_v44  ;;  %3834 = vmatprep.subr.bf16.mxu0 %v5614_v15  ;;  %v5657_v44 = vld [vmem:[%s7525_s3 + $0x90] sm:$0xff]  }
 0x1f5   :  { %3875 = vmatprep.subr.bf16.mxu1 %v5617_v41 }
 0x1f7   :  { %3835 = vmatpush2.bf16.msra.mxu0 %v5612_v43 }
 0x1f8   :  { %3876 = vmatpush2.bf16.msra.mxu1 %v5615_v45  ;;  %3836 = vmatprep.subr.bf16.mxu0 %v5620_v47 }
 0x1f9   :  { %3877 = vmatprep.subr.bf16.mxu1 %v5623_v48 }
 0x1fb   :  { %3837 = vmatpush2.bf16.msra.mxu0 %v5618_v60  ;;  %v5659_v60 = vld [vmem:[%s7525_s3 + $0x88] sm:$0xff]  }
 0x1fc   :  { %3878 = vmatpush2.bf16.msra.mxu1 %v5621_v0  ;;  %3838 = vmatprep.subr.bf16.mxu0 %v5626_v50 }
 0x1fd   :  { %3879 = vmatprep.subr.bf16.mxu1 %v5629_v38 }
 0x1ff   :  { %3839 = vmatpush2.bf16.msra.mxu0 %v5624_v35 }
 0x200   :  { %3880 = vmatpush2.bf16.msra.mxu1 %v5627_v55  ;;  %4814 = vmatprep.subr.bf16.mxu0 %v5630_v57  ;;  %v5660_v55 = vld [vmem:[%s7525_s3 + $0xc0] sm:$0xff]  }
 0x201   :  { %4836 = vmatprep.subr.bf16.mxu1 %v5646_v46 }
 0x202   :  { %v3596_v2 = vpop.f32.mrf.mxu0  ;;  %3841 = vmatmul.mubr.bf16.vlgmr.msra.gmra.mxu0 %v6588_v10 }
 0x203   :  { %v3637_v42 = vpop.f32.mrf.mxu1  ;;  %3882 = vmatmul.mubr.bf16.vlgmr.msra.gmra.mxu1 %v6603_v39  ;;  %v3597_v3 = vadd.f32 %v3596_v2, %v549_v62  ;;  %4815 = vmatpush3.bf16.msra.mxu0 %v5631_v54  ;;  %v5635_v39 = vld [vmem:[%s7525_s3 + $0x28] sm:$0xff]  }
 0x204   :  { %4193 = vmatprep.mubr.bf16.mxu0 %v3895_v63  ;;  %v3598_v5 = vpop.f32.mrf.mxu0  ;;  %4816 = vmatprep.subr.bf16.mxu0 %v5632_v59 }
 0x205   :  { %v3639_v7 = vpop.f32.mrf.mxu1  ;;  %v3638_v9 = vadd.f32 %v3637_v42, %v3597_v3  ;;  %v3599_v13 = vadd.f32 %v3598_v5, %v553_v1  ;;  %4837 = vmatpush3.bf16.msra.mxu1 %v5647_v16 }
 0x206   :  { %v3600_v18 = vpop.f32.mrf.mxu0  ;;  %4838 = vmatprep.subr.bf16.mxu1 %v5648_v17 }
 0x207   :  { %v3641_v10 = vpop.f32.mrf.mxu1  ;;  %v3640_v37 = vadd.f32 %v3639_v7, %v3599_v13  ;;  %4817 = vmatpush3.bf16.msra.mxu0 %v5633_v4 }
 0x208   :  { %v3601_v14 = vpop.f32.mrf.mxu0  ;;  %4818 = vmatprep.subr.bf16.mxu0 %v5634_v8 }
 0x209   :  { %v3642_v49 = vpop.f32.mrf.mxu1  ;;  %4839 = vmatpush3.bf16.msra.mxu1 %v5649_v19 }
 0x20a   :  { %4840 = vmatprep.subr.bf16.mxu1 %v5650_v21 }
 0x20b   :  { %4819 = vmatpush3.bf16.msra.mxu0 %v5635_v39 }
 0x20c   :  { %4820 = vmatprep.subr.bf16.mxu0 %v5636_v12 }
 0x20d   :  { %4841 = vmatpush3.bf16.msra.mxu1 %v5651_v24  ;;  %v4781_v24 = vld [vmem:[%s7526_s4] ss:$0 sm:$0xff]  ;;  %s5690_s4 = smov [#allocation2]  }
 0x20e   :  { %4842 = vmatprep.subr.bf16.mxu1 %v5652_v27  ;;  %s4261_s27 = sshll.u32 %s5690_s4, 4  ;;  %s4262_s27 = int_to_ptr.vmem [resolvable:$true] %s4261_s27 }
 0x20f   :  { %4821 = vmatpush3.bf16.msra.mxu0 %v5637_v23  ;;  %s5667_s28 = scalar_lea.vmem %s4262_s27, 32  ;;  %p5672_p1 = scmp.lt.s32.totalorder %s4262_s27, %s4262_s27 }
 0x210   :  { %4822 = vmatprep.subr.bf16.mxu0 %v5638_v20  ;;  %p5668_p0 = scmp.ne.s32.totalorder %s4262_s27, %s5667_s28  ;;  %p5673_p2 = scmp.lt.s32.totalorder %s5667_s28, %s5667_s28 }
 0x211   :  { %4843 = vmatpush3.bf16.msra.mxu1 %v5653_v29 }
 0x212   :  { %4844 = vmatprep.subr.bf16.mxu1 %v5654_v31  ;;  %p5674_p3 = por %p5673_p2, %p5672_p1 }
 0x213   :  { %4823 = vmatpush3.bf16.msra.mxu0 %v5639_v22 }
 0x214   :  { %4824 = vmatprep.subr.bf16.mxu0 %v5640_v25  ;;  %p5675_p4 = pnand %p5674_p3, %p5668_p0 }
 0x215   :  { %4845 = vmatpush3.bf16.msra.mxu1 %v5655_v6 }
 0x216   :  { %4846 = vmatprep.subr.bf16.mxu1 %v5656_v40 }
 0x217   :  { %4825 = vmatpush3.bf16.msra.mxu0 %v5641_v28 }
 0x218   :  { %4826 = vmatprep.subr.bf16.mxu0 %v5642_v30 }
 0x219   :  { %4847 = vmatpush3.bf16.msra.mxu1 %v5657_v44 }
 0x21a   :  { %4848 = vmatprep.subr.bf16.mxu1 %v5658_v11 }
 0x21b   :  { %4827 = vmatpush3.bf16.msra.mxu0 %v5643_v26 }
 0x21c   :  { %4828 = vmatprep.subr.bf16.mxu0 %v5644_v33 }
 0x21d   :  { %4849 = vmatpush3.bf16.msra.mxu1 %v5659_v60 }
 0x21e   :  { %4850 = vmatprep.subr.bf16.mxu1 %v5660_v55 }
 0x21f   :  { %4829 = vmatpush3.bf16.msra.mxu0 %v5645_v34 }
 0x221   :  { %4851 = vmatpush3.bf16.msra.mxu1 %v5661_v56 }
 0x222   :  { %4194 = vmatmul.mubr.bf16.vlgmr.msra.gmra.mxu0 %v3894_v32 }
 0x242   :  { %v3678_v15 = vpop.f32.mrf.mxu0 }
 0x243   :  { %v3719_v41 = vpop.f32.mrf.mxu1  ;;  %v3679_v43 = vadd.f32 %v3678_v15, %v3638_v9 }
 0x244   :  { %v3680_v45 = vpop.f32.mrf.mxu0 }
 0x245   :  { %v3721_v47 = vpop.f32.mrf.mxu1  ;;  %v3720_v48 = vadd.f32 %v3719_v41, %v3679_v43  ;;  %v3681_v51 = vadd.f32 %v3680_v45, %v3640_v37 }
 0x246   :  { %v3682_v0 = vpop.f32.mrf.mxu0 }
 0x247   :  { %v3723_v50 = vpop.f32.mrf.mxu1  ;;  %v3722_v38 = vadd.f32 %v3721_v47, %v3681_v51 }
 0x248   :  { %v3683_v52 = vpop.f32.mrf.mxu0 }
 0x249   :  { %v3724_v35 = vpop.f32.mrf.mxu1 }
 0x282   :  { %v3760_v57 = vpop.f32.mrf.mxu0 }
 0x283   :  { %v3801_v58 = vpop.f32.mrf.mxu1  ;;  %v3761_v53 = vadd.f32 %v3760_v57, %v3720_v48 }
 0x284   :  { %v3762_v61 = vpop.f32.mrf.mxu0 }
 0x285   :  { %v3803_v62 = vpop.f32.mrf.mxu1  ;;  %v3802_v54 = vadd.f32 %v3801_v58, %v3761_v53  ;;  %v3763_v42 = vadd.f32 %v3762_v61, %v3722_v38 }
 0x286   :  { %v3764_v59 = vpop.f32.mrf.mxu0 }
 0x287   :  { %v3805_v63 = vpop.f32.mrf.mxu1  ;;  %v3804_v5 = vadd.f32 %v3803_v62, %v3763_v42 }
 0x288   :  { %v3765_v1 = vpop.f32.mrf.mxu0 }
 0x289   :  { %v3806_v2 = vpop.f32.mrf.mxu1 }
 0x2c2   :  { %v3842_v3 = vpop.f32.mrf.mxu0 }
 0x2c3   :  { %v3883_v4 = vpop.f32.mrf.mxu1  ;;  %v3843_v7 = vadd.f32 %v3842_v3, %v3802_v54 }
 0x2c4   :  { %v3844_v8 = vpop.f32.mrf.mxu0 }
 0x2c5   :  { %v3885_v9 = vpop.f32.mrf.mxu1  ;;  %v3884_v13 = vadd.f32 %v3883_v4, %v3843_v7  ;;  %v3845_v18 = vadd.f32 %v3844_v8, %v3804_v5 }
 0x2c6   :  { %v3846_v10 = vpop.f32.mrf.mxu0 }
 0x2c7   :  { %v3887_v37 = vpop.f32.mrf.mxu1  ;;  %v3886_v39 = vadd.f32 %v3885_v9, %v3845_v18  ;;  %v3892_v12 = vmax.f32 %v3884_v13, 0.0 }
 0x2c8   :  { %v3847_v14 = vpop.f32.mrf.mxu0 }
 0x2c9   :  { %v3888_v49 = vpop.f32.mrf.mxu1  ;;  %v3893_v46 = vmax.f32 %v3886_v39, 0.0  ;;  %v3896_v17 = vpack.c.bf16 %v3892_v12, %v3892_v12 }
 0x2cb   :  { %v3897_v16 = vpack.c.bf16 %v3893_v46, %v3893_v46 }
 0x2cd   :  { %4233 = vmatprep.mubr.bf16.mxu1 %v3897_v16 }
 0x2ce   :  { %4234 = vmatmul.mubr.bf16.vlgmr.msra.gmra.mxu1 %v3896_v17 }
 0x2e2   :  { %v4830_v23 = vpop.f32.mrf.mxu0 }
 0x2e4   :  { %v4831_v19 = vpop.f32.mrf.mxu0 }
 0x2e5   :  { %v4832_v20 = vadd.f32 %v4831_v19, %v4830_v23 }
 0x2e6   :  { %v4833_v21 = vpop.f32.mrf.mxu0 }
 0x2e7   :  { %v4196_v28 = vadd.f32 %v4832_v20, %v4781_v24 }
 0x2e8   :  { %v4834_v22 = vpop.f32.mrf.mxu0 }
 0x38e   :  { %v4852_v25 = vpop.f32.mrf.mxu1 }
 0x390   :  { %v4853_v27 = vpop.f32.mrf.mxu1 }
 0x391   :  { %v4854_v29 = vadd.f32 %v4853_v27, %v4852_v25 }
 0x392   :  { %v4855_v30 = vpop.f32.mrf.mxu1 }
 0x393   :  { %v4236_v31 = vadd.f32 %v4854_v29, %v4196_v28 }
 0x394   :  { %v4856_v26 = vpop.f32.mrf.mxu1 }
 0x395   :  { %v4242_v6 = vsel %vm4241_vm0, %v4236_v31, -inf }
 0x396   :  { %4243 = vmax.xlane.f32.xlu0 %v4242_v6 }
 0x41f   :  { %v4244_v33 = vpop.xlane.xlu0 %4243 }
 0x420   :  { %v4245_v34 = vsub.f32 %v4236_v31, %v4244_v33 }
 0x422   :  { %v4246_v36 = vmul.f32 1.442695, %v4245_v34 }
 0x424   :  { %5662 = vpow2.f32 %v4246_v36 }
 0x431   :  { %v5663_v32 = vpop.eup %5662 }
 0x432   :  { %v4248_v40 = vsel %vm4241_vm0, %v5663_v32, 0.0 }
 0x433   :  { %4249 = vadd.xlane.f32.xlu0 %v4248_v40 }
 0x4bc   :  { %v4250_v44 = vpop.xlane.xlu0 %4249 }
 0x4bd   :  { %5664 = vlog2.f32 %v4250_v44 }
 0x4ca   :  { %v5665_v15 = vpop.eup %5664 }
 0x4cb   :  { %v4252_v41 = vmul.f32 0.6931472, %v5665_v15 }
 0x4cd   :  { %v4253_v43 = vsub.f32 %v4245_v34, %v4252_v41 }
 0x4cf   :  { %4254 = vst.msk [vmem:[#allocation2] sm:$0x3] %vm4241_vm0, %v4253_v43 }
 0x4d0   :  { %5678 = shalt.err (!%p5675_p4)
}
 0x4d1   :  { %4264 = dma.vmem_to_hbm [thread:$0]  %s4262_s27, 32, %s7527_s5, [#allocation3]  }
 0x4d2   :  { %5687 = dma.done.wait [#allocation3], 32  }
 0x4d3   :  { %5688 = vsyncadd [#allocation3], 4294967264 }
 0x4d4   :  { %4268 = vsyncpa [#allocation3], 1 }

</bundles_post_ra>
